<compile_context>
chip_gen: v7x
topology: tpu7x:2x2x1
jax: 0.10.0
libtpu: 0.0.40
codegen_flags: <defaults>
</compile_context>

<pallas_src>
import jax
import jax.numpy as jnp
from jax import lax
from jax.experimental import pallas as pl
from jax.experimental.pallas import tpu as pltpu

LANE = 128
SUBLANE = 8


def _round_up(n, m):
    return ((n + m - 1) // m) * m


def lstm_classifier_kernel(
    tmax_ref,    # (1,)             i32  SMEM scalar prefetch: max valid timestep
    len_ref,     # (Bp, 1)          i32  sequence lengths (padded rows = 0)
    x_ref,       # (Tt, Bp, D)      f32  time-major input chunk (streamed over T)
    wih_ref,     # (D, 4*Hp)        f32  input->gates (per-gate lane-padded)
    whh_ref,     # (Hp, 4*Hp)       f32  hidden->gates
    b_ref,       # (1, 4*Hp)        f32  b_ih + b_hh
    wfc_ref,     # (Hp, Hp)         f32
    bfc_ref,     # (1, Hp)          f32
    wfc2_ref,    # (Hp, Op)         f32
    bfc2_ref,    # (1, Op)          f32
    out_ref,     # (Bp, Op)         f32  sigmoid(fc2(fc(h_n)))
    h_scr,       # (Bp, Hp)         f32  VMEM scratch: hidden state
    c_scr,       # (Bp, Hp)         f32  VMEM scratch: cell state
    xp_scr,      # (Tt, Bp, 4*Hp)   f32  VMEM scratch: hoisted input projection
):
    t_chunk = pl.program_id(0)
    n_chunks = pl.num_programs(0)
    Tt, Bp, D = x_ref.shape
    Gp = wih_ref.shape[1]
    Hp = Gp // 4

    @pl.when(t_chunk == 0)
    def _init():
        h_scr[...] = jnp.zeros_like(h_scr)
        c_scr[...] = jnp.zeros_like(c_scr)

    t_max = tmax_ref[0]
    t_base = t_chunk * Tt

    @pl.when(t_base < t_max)
    def _chunk():
        # Hoisted input projection: one (Tt*Bp, D) x (D, 4Hp) GEMM on the MXU.
        xb = x_ref[...].reshape(Tt * Bp, D)
        proj = jnp.dot(xb, wih_ref[...], preferred_element_type=jnp.float32) + b_ref[...]
        xp_scr[...] = proj.reshape(Tt, Bp, Gp)

        # Hoist the length broadcast once per chunk (int compare stays per-step).
        lens_b = jnp.broadcast_to(len_ref[...], (Bp, Hp))  # (Bp, Hp) int32

        def step(tt, carry):
            t = t_base + tt

            @pl.when(t < t_max)
            def _active_step():
                # Only the recurrent matmul remains on the serial critical path.
                gates = xp_scr[tt] + jnp.dot(
                    h_scr[...], whh_ref[...], preferred_element_type=jnp.float32
                )  # (Bp, 4Hp); per-gate slices are lane-dense (Hp multiple of 128)
                # PyTorch gate order: input, forget, cell(g), output
                i_g = jax.nn.sigmoid(gates[:, 0 * Hp:1 * Hp])
                f_g = jax.nn.sigmoid(gates[:, 1 * Hp:2 * Hp])
                g_g = jnp.tanh(gates[:, 2 * Hp:3 * Hp])
                o_g = jax.nn.sigmoid(gates[:, 3 * Hp:4 * Hp])

                c_new = f_g * c_scr[...] + i_g * g_g
                h_new = o_g * jnp.tanh(c_new)

                # Freeze states once t >= length (pack_padded_sequence h_n semantics):
                # a single vselect per state instead of the mask*new+(1-mask)*old blend.
                active = t < lens_b
                h_scr[...] = jnp.where(active, h_new, h_scr[...])
                c_scr[...] = jnp.where(active, c_new, c_scr[...])

            return carry

        lax.fori_loop(0, Tt, step, 0, unroll=True)

    @pl.when(t_chunk == n_chunks - 1)
    def _finalize():
        l1 = jnp.dot(h_scr[...], wfc_ref[...], preferred_element_type=jnp.float32) + bfc_ref[...]
        l2 = jnp.dot(l1, wfc2_ref[...], preferred_element_type=jnp.float32) + bfc2_ref[...]
        out_ref[...] = jax.nn.sigmoid(l2)  # lane-dense (Bp, Op) store


def lstm_personality_classifier(x, lengths, params, *, t_tile=None):
    """x: (B, T, D) float32 batch-first, lengths: (B,) int. Returns (B, O) float32."""
    B, T, D = x.shape
    H = params["w_hh"].shape[0]
    O = params["w_fc2"].shape[1]

    Hp = _round_up(H, LANE)
    Op = _round_up(O, LANE)
    Bp = _round_up(B, SUBLANE)
    Gp = 4 * Hp

    if t_tile is None:
        t_tile = min(T, 16)  # kept small: the recurrence is fully unrolled in-kernel
    Tp = _round_up(T, t_tile)
    n_chunks = Tp // t_tile

    # --- Pad weights so every gate slice / output is lane-dense. Padded hidden
    # lanes see zero weights & bias, so they stay exactly zero through the LSTM. ---
    def pad_gates(w, rows):
        r = w.shape[0]
        w4 = w.reshape(r, 4, H)
        w4 = jnp.pad(w4, ((0, rows - r), (0, 0), (0, Hp - H)))
        return w4.reshape(rows, Gp)

    w_ih = pad_gates(params["w_ih"], D)
    w_hh = pad_gates(params["w_hh"], Hp)
    b_lstm = pad_gates(params["b_lstm"], 1)
    w_fc = jnp.pad(params["w_fc"], ((0, Hp - H), (0, Hp - H)))
    b_fc = jnp.pad(params["b_fc"], ((0, 0), (0, Hp - H)))
    w_fc2 = jnp.pad(params["w_fc2"], ((0, Hp - H), (0, Op - O)))
    b_fc2 = jnp.pad(params["b_fc2"], ((0, 0), (0, Op - O)))

    # Time-major, batch/time padded input. Padded batch rows get length 0 (never
    # update state); padded timesteps are masked by lengths and skipped via t_max.
    x_tm = jnp.transpose(x, (1, 0, 2)).astype(jnp.float32)
    x_tm = jnp.pad(x_tm, ((0, Tp - T), (0, Bp - B), (0, 0)))

    lens = jnp.pad(lengths.astype(jnp.int32), (0, Bp - B))
    len2d = lens.reshape(Bp, 1)
    t_max = jnp.minimum(jnp.max(lengths.astype(jnp.int32)), T).reshape(1)

    grid_spec = pltpu.PrefetchScalarGridSpec(
        num_scalar_prefetch=1,                    # t_max -> SMEM
        grid=(n_chunks,),                         # sequential recurrence over T-chunks
        in_specs=[
            pl.BlockSpec((Bp, 1), lambda t, tm: (0, 0)),             # lengths (resident)
            pl.BlockSpec((t_tile, Bp, D), lambda t, tm: (t, 0, 0)),  # x streamed over T
            pl.BlockSpec((D, Gp), lambda t, tm: (0, 0)),             # weights stay resident
            pl.BlockSpec((Hp, Gp), lambda t, tm: (0, 0)),
            pl.BlockSpec((1, Gp), lambda t, tm: (0, 0)),
            pl.BlockSpec((Hp, Hp), lambda t, tm: (0, 0)),
            pl.BlockSpec((1, Hp), lambda t, tm: (0, 0)),
            pl.BlockSpec((Hp, Op), lambda t, tm: (0, 0)),
            pl.BlockSpec((1, Op), lambda t, tm: (0, 0)),
        ],
        out_specs=pl.BlockSpec((Bp, Op), lambda t, tm: (0, 0)),
        scratch_shapes=[
            pltpu.VMEM((Bp, Hp), jnp.float32),        # h
            pltpu.VMEM((Bp, Hp), jnp.float32),        # c
            pltpu.VMEM((t_tile, Bp, Gp), jnp.float32),  # hoisted input projection
        ],
    )

    out_padded = pl.pallas_call(
        lstm_classifier_kernel,
        out_shape=jax.ShapeDtypeStruct((Bp, Op), jnp.float32),
        grid_spec=grid_spec,
        compiler_params=pltpu.CompilerParams(
            dimension_semantics=("arbitrary",),       # recurrence is sequential over T
            vmem_limit_bytes=48 * 1024 * 1024,        # headroom-safe on v7x (64 MiB VMEM)
        ),
    )(t_max, len2d, x_tm, w_ih, w_hh, b_lstm, w_fc, b_fc, w_fc2, b_fc2)

    return out_padded[:B, :O]


def reference_forward(x, lengths, params):
    """Pure-JAX reference matching PyTorch nn.LSTM + Linear + Linear + sigmoid."""
    B, T, D = x.shape
    H = params["w_hh"].shape[0]
    h = jnp.zeros((B, H), jnp.float32)
    c = jnp.zeros((B, H), jnp.float32)
    for t in range(T):
        gates = x[:, t, :] @ params["w_ih"] + h @ params["w_hh"] + params["b_lstm"]
        i_g = jax.nn.sigmoid(gates[:, 0 * H:1 * H])
        f_g = jax.nn.sigmoid(gates[:, 1 * H:2 * H])
        g_g = jnp.tanh(gates[:, 2 * H:3 * H])
        o_g = jax.nn.sigmoid(gates[:, 3 * H:4 * H])
        c_new = f_g * c + i_g * g_g
        h_new = o_g * jnp.tanh(c_new)
        m = (t < lengths)[:, None]
        h = jnp.where(m, h_new, h)
        c = jnp.where(m, c_new, c)
    l1 = h @ params["w_fc"] + params["b_fc"]
    l2 = l1 @ params["w_fc2"] + params["b_fc2"]
    return jax.nn.sigmoid(l2)


if __name__ == "__main__":
    B, T, D, H, O = 2, 8, 16, 32, 5  # Big-Five style output

    key = jax.random.PRNGKey(0)
    keys = jax.random.split(key, 10)

    def u(k, shape, scale=0.1):
        return (jax.random.uniform(k, shape, jnp.float32) * 2.0 - 1.0) * scale

    params = {
        # LSTM: PyTorch weight_ih is (4H, D); stored here already transposed.
        "w_ih": u(keys[0], (D, 4 * H)),
        "w_hh": u(keys[1], (H, 4 * H)),
        "b_lstm": u(keys[2], (1, 4 * H)) + u(keys[3], (1, 4 * H)),  # b_ih + b_hh
        # fc: nn.Linear(H, H) weight transposed to (in, out).
        "w_fc": u(keys[4], (H, H)),
        "b_fc": u(keys[5], (1, H)),
        # fc2: nn.Linear(H, O) transposed to (H, O).
        "w_fc2": u(keys[6], (H, O)),
        "b_fc2": u(keys[7], (1, O)),
    }

    x = jax.random.normal(keys[8], (B, T, D), jnp.float32)
    lengths = jnp.array([5, 8], dtype=jnp.int32)

    out = lstm_personality_classifier(x, lengths, params)
    out = jax.block_until_ready(out)

    ref = reference_forward(x, lengths, params)
    assert out.shape == (B, O)
    assert jnp.allclose(out, ref, atol=2e-5, rtol=2e-5), (out, ref)

    print("KERNEL_OK")
</pallas_src>

<mosaic_0001>
module attributes {stable_mosaic.version = 11 : i64} {
  func.func @lstm_classifier_kernel(%arg0: i32, %arg1: memref<1xi32, #tpu.memory_space<smem>>, %arg2: memref<8x1xi32, #tpu.memory_space<vmem>>, %arg3: memref<8x8x16xf32, #tpu.memory_space<vmem>>, %arg4: memref<16x512xf32, #tpu.memory_space<vmem>>, %arg5: memref<128x512xf32, #tpu.memory_space<vmem>>, %arg6: memref<1x512xf32, #tpu.memory_space<vmem>>, %arg7: memref<128x128xf32, #tpu.memory_space<vmem>>, %arg8: memref<1x128xf32, #tpu.memory_space<vmem>>, %arg9: memref<128x128xf32, #tpu.memory_space<vmem>>, %arg10: memref<1x128xf32, #tpu.memory_space<vmem>>, %arg11: memref<8x128xf32, #tpu.memory_space<vmem>>, %arg12: memref<8x128xf32, #tpu.memory_space<vmem>>, %arg13: memref<8x128xf32, #tpu.memory_space<vmem>>, %arg14: memref<8x8x512xf32, #tpu.memory_space<vmem>>) attributes {dimension_semantics = [#tpu.dimension_semantics<arbitrary>], iteration_bounds = array<i64: 1>, scalar_prefetch = 1 : i64, scratch_operands = 3 : i64, tpu.core_type = #tpu.core_type<tc>, window_params = [{pipeline_mode = #tpu.pipeline_mode<synchronous>, transform_indices = @transform_0, window_bounds = array<i64: 8, 1>}, {transform_indices = @transform_1, window_bounds = array<i64: 8, 8, 16>}, {pipeline_mode = #tpu.pipeline_mode<synchronous>, transform_indices = @transform_2, window_bounds = array<i64: 16, 512>}, {pipeline_mode = #tpu.pipeline_mode<synchronous>, transform_indices = @transform_3, window_bounds = array<i64: 128, 512>}, {pipeline_mode = #tpu.pipeline_mode<synchronous>, transform_indices = @transform_4, window_bounds = array<i64: 1, 512>}, {pipeline_mode = #tpu.pipeline_mode<synchronous>, transform_indices = @transform_5, window_bounds = array<i64: 128, 128>}, {pipeline_mode = #tpu.pipeline_mode<synchronous>, transform_indices = @transform_6, window_bounds = array<i64: 1, 128>}, {pipeline_mode = #tpu.pipeline_mode<synchronous>, transform_indices = @transform_7, window_bounds = array<i64: 128, 128>}, {pipeline_mode = #tpu.pipeline_mode<synchronous>, transform_indices = @transform_8, window_bounds = array<i64: 1, 128>}, {pipeline_mode = #tpu.pipeline_mode<synchronous>, transform_indices = @transform_9, window_bounds = array<i64: 8, 128>}]} {
    %c0_i32 = arith.constant 0 : i32
    %0 = arith.cmpi eq, %arg0, %c0_i32 : i32
    %1 = arith.extui %0 : i1 to i32
    %c0_i32_0 = arith.constant 0 : i32
    %2 = arith.cmpi ne, %1, %c0_i32_0 : i32
    scf.if %2 {
      %cst = arith.constant 0.000000e+00 : f32
      %11 = vector.broadcast %cst : f32 to vector<8x128xf32>
      %c0_4 = arith.constant 0 : index
      %c0_5 = arith.constant 0 : index
      %12 = vector.load %arg12[%c0_4, %c0_5] : memref<8x128xf32, #tpu.memory_space<vmem>>, vector<8x128xf32>
      tpu.vector_store %arg12[%c0_4, %c0_5], %11 {strides = array<i32>} : memref<8x128xf32, #tpu.memory_space<vmem>>, vector<8x128xf32>,
      %cst_6 = arith.constant 0.000000e+00 : f32
      %13 = vector.broadcast %cst_6 : f32 to vector<8x128xf32>
      %c0_7 = arith.constant 0 : index
      %c0_8 = arith.constant 0 : index
      %14 = vector.load %arg13[%c0_7, %c0_8] : memref<8x128xf32, #tpu.memory_space<vmem>>, vector<8x128xf32>
      tpu.vector_store %arg13[%c0_7, %c0_8], %13 {strides = array<i32>} : memref<8x128xf32, #tpu.memory_space<vmem>>, vector<8x128xf32>,
    } else {
    }
    %c0 = arith.constant 0 : index
    %3 = memref.load %arg1[%c0] : memref<1xi32, #tpu.memory_space<smem>>
    %c8_i32 = arith.constant 8 : i32
    %4 = arith.muli %arg0, %c8_i32 : i32
    %5 = arith.cmpi slt, %4, %3 : i32
    %6 = arith.extui %5 : i1 to i32
    %c0_i32_1 = arith.constant 0 : i32
    %7 = arith.cmpi ne, %6, %c0_i32_1 : i32
    scf.if %7 {
      %c0_4 = arith.constant 0 : index
      %c0_5 = arith.constant 0 : index
      %c0_6 = arith.constant 0 : index
      %11 = vector.load %arg3[%c0_4, %c0_5, %c0_6] : memref<8x8x16xf32, #tpu.memory_space<vmem>>, vector<8x8x16xf32>
      %12 = vector.shape_cast %11 : vector<8x8x16xf32> to vector<64x16xf32>
      %c0_7 = arith.constant 0 : index
      %c0_8 = arith.constant 0 : index
      %13 = vector.load %arg4[%c0_7, %c0_8] : memref<16x512xf32, #tpu.memory_space<vmem>>, vector<16x512xf32>
      %cst = arith.constant dense<0.000000e+00> : vector<64x512xf32>
      %14 = tpu.matmul %12, %13, %cst {dimension_numbers = #tpu.dot_dimension_numbers<[1], [0], [0], [1], [0, 0, 1, 1], [], []>} : vector<64x16xf32>, vector<16x512xf32>, vector<64x512xf32> -> vector<64x512xf32>
      %c0_9 = arith.constant 0 : index
      %c0_10 = arith.constant 0 : index
      %15 = vector.load %arg6[%c0_9, %c0_10] : memref<1x512xf32, #tpu.memory_space<vmem>>, vector<1x512xf32>
      %16 = vector.broadcast %15 : vector<1x512xf32> to vector<64x512xf32>
      %17 = arith.addf %14, %16 : vector<64x512xf32>
      %18 = vector.shape_cast %17 : vector<64x512xf32> to vector<8x8x512xf32>
      %c0_11 = arith.constant 0 : index
      %c0_12 = arith.constant 0 : index
      %c0_13 = arith.constant 0 : index
      %19 = vector.load %arg14[%c0_11, %c0_12, %c0_13] : memref<8x8x512xf32, #tpu.memory_space<vmem>>, vector<8x8x512xf32>
      tpu.vector_store %arg14[%c0_11, %c0_12, %c0_13], %18 {strides = array<i32>} : memref<8x8x512xf32, #tpu.memory_space<vmem>>, vector<8x8x512xf32>,
      %c0_14 = arith.constant 0 : index
      %c0_15 = arith.constant 0 : index
      %20 = vector.load %arg2[%c0_14, %c0_15] : memref<8x1xi32, #tpu.memory_space<vmem>>, vector<8x1xi32>
      %21 = vector.shape_cast %20 : vector<8x1xi32> to vector<8x1xi32>
      %22 = vector.broadcast %21 : vector<8x1xi32> to vector<8x128xi32>
      %c0_i32_16 = arith.constant 0 : i32
      %23 = arith.addi %4, %c0_i32_16 : i32
      %24 = arith.cmpi slt, %23, %3 : i32
      %25 = arith.extui %24 : i1 to i32
      %c0_i32_17 = arith.constant 0 : i32
      %26 = arith.cmpi ne, %25, %c0_i32_17 : i32
      scf.if %26 {
        %55 = arith.index_cast %c0_i32_16 : i32 to index
        %c0_26 = arith.constant 0 : index
        %c0_27 = arith.constant 0 : index
        %56 = vector.load %arg14[%55, %c0_26, %c0_27] : memref<8x8x512xf32, #tpu.memory_space<vmem>>, vector<1x8x512xf32>
        %57 = vector.shape_cast %56 : vector<1x8x512xf32> to vector<8x512xf32>
        %c0_28 = arith.constant 0 : index
        %c0_29 = arith.constant 0 : index
        %58 = vector.load %arg12[%c0_28, %c0_29] : memref<8x128xf32, #tpu.memory_space<vmem>>, vector<8x128xf32>
        %c0_30 = arith.constant 0 : index
        %c0_31 = arith.constant 0 : index
        %59 = vector.load %arg5[%c0_30, %c0_31] : memref<128x512xf32, #tpu.memory_space<vmem>>, vector<128x512xf32>
        %cst_32 = arith.constant dense<0.000000e+00> : vector<8x512xf32>
        %60 = tpu.matmul %58, %59, %cst_32 {dimension_numbers = #tpu.dot_dimension_numbers<[1], [0], [0], [1], [0, 0, 1, 1], [], []>} : vector<8x128xf32>, vector<128x512xf32>, vector<8x512xf32> -> vector<8x512xf32>
        %61 = arith.addf %57, %60 : vector<8x512xf32>
        %62 = vector.extract_strided_slice %61 {offsets = [0, 0], sizes = [8, 128], strides = [1, 1]} : vector<8x512xf32> to vector<8x128xf32>
        %63 = arith.negf %62 : vector<8x128xf32>
        %64 = math.exp %63 : vector<8x128xf32>
        %cst_33 = arith.constant 1.000000e+00 : f32
        %65 = vector.broadcast %cst_33 : f32 to vector<8x128xf32>
        %66 = arith.addf %65, %64 : vector<8x128xf32>
        %67 = arith.divf %65, %66 : vector<8x128xf32>
        %68 = vector.extract_strided_slice %61 {offsets = [0, 128], sizes = [8, 128], strides = [1, 1]} : vector<8x512xf32> to vector<8x128xf32>
        %69 = arith.negf %68 : vector<8x128xf32>
        %70 = math.exp %69 : vector<8x128xf32>
        %cst_34 = arith.constant 1.000000e+00 : f32
        %71 = vector.broadcast %cst_34 : f32 to vector<8x128xf32>
        %72 = arith.addf %71, %70 : vector<8x128xf32>
        %73 = arith.divf %71, %72 : vector<8x128xf32>
        %74 = vector.extract_strided_slice %61 {offsets = [0, 256], sizes = [8, 128], strides = [1, 1]} : vector<8x512xf32> to vector<8x128xf32>
        %75 = math.tanh %74 : vector<8x128xf32>
        %76 = vector.extract_strided_slice %61 {offsets = [0, 384], sizes = [8, 128], strides = [1, 1]} : vector<8x512xf32> to vector<8x128xf32>
        %77 = arith.negf %76 : vector<8x128xf32>
        %78 = math.exp %77 : vector<8x128xf32>
        %cst_35 = arith.constant 1.000000e+00 : f32
        %79 = vector.broadcast %cst_35 : f32 to vector<8x128xf32>
        %80 = arith.addf %79, %78 : vector<8x128xf32>
        %81 = arith.divf %79, %80 : vector<8x128xf32>
        %c0_36 = arith.constant 0 : index
        %c0_37 = arith.constant 0 : index
        %82 = vector.load %arg13[%c0_36, %c0_37] : memref<8x128xf32, #tpu.memory_space<vmem>>, vector<8x128xf32>
        %83 = arith.mulf %73, %82 : vector<8x128xf32>
        %84 = arith.mulf %67, %75 : vector<8x128xf32>
        %85 = arith.addf %83, %84 : vector<8x128xf32>
        %86 = math.tanh %85 : vector<8x128xf32>
        %87 = arith.mulf %81, %86 : vector<8x128xf32>
        %88 = vector.broadcast %23 : i32 to vector<8x128xi32>
        %89 = arith.cmpi slt, %88, %22 : vector<8x128xi32>
        %c0_38 = arith.constant 0 : index
        %c0_39 = arith.constant 0 : index
        %90 = vector.load %arg12[%c0_38, %c0_39] : memref<8x128xf32, #tpu.memory_space<vmem>>, vector<8x128xf32>
        %91 = arith.select %89, %87, %90 : vector<8x128xi1>, vector<8x128xf32>
        %c0_40 = arith.constant 0 : index
        %c0_41 = arith.constant 0 : index
        %92 = vector.load %arg12[%c0_40, %c0_41] : memref<8x128xf32, #tpu.memory_space<vmem>>, vector<8x128xf32>
        tpu.vector_store %arg12[%c0_40, %c0_41], %91 {strides = array<i32>} : memref<8x128xf32, #tpu.memory_space<vmem>>, vector<8x128xf32>,
        %c0_42 = arith.constant 0 : index
        %c0_43 = arith.constant 0 : index
        %93 = vector.load %arg13[%c0_42, %c0_43] : memref<8x128xf32, #tpu.memory_space<vmem>>, vector<8x128xf32>
        %94 = arith.select %89, %85, %93 : vector<8x128xi1>, vector<8x128xf32>
        %c0_44 = arith.constant 0 : index
        %c0_45 = arith.constant 0 : index
        %95 = vector.load %arg13[%c0_44, %c0_45] : memref<8x128xf32, #tpu.memory_space<vmem>>, vector<8x128xf32>
        tpu.vector_store %arg13[%c0_44, %c0_45], %94 {strides = array<i32>} : memref<8x128xf32, #tpu.memory_space<vmem>>, vector<8x128xf32>,
      } else {
      }
      %c1_i32 = arith.constant 1 : i32
      %27 = arith.addi %4, %c1_i32 : i32
      %28 = arith.cmpi slt, %27, %3 : i32
      %29 = arith.extui %28 : i1 to i32
      %c0_i32_18 = arith.constant 0 : i32
      %30 = arith.cmpi ne, %29, %c0_i32_18 : i32
      scf.if %30 {
        %55 = arith.index_cast %c1_i32 : i32 to index
        %c0_26 = arith.constant 0 : index
        %c0_27 = arith.constant 0 : index
        %56 = vector.load %arg14[%55, %c0_26, %c0_27] : memref<8x8x512xf32, #tpu.memory_space<vmem>>, vector<1x8x512xf32>
        %57 = vector.shape_cast %56 : vector<1x8x512xf32> to vector<8x512xf32>
        %c0_28 = arith.constant 0 : index
        %c0_29 = arith.constant 0 : index
        %58 = vector.load %arg12[%c0_28, %c0_29] : memref<8x128xf32, #tpu.memory_space<vmem>>, vector<8x128xf32>
        %c0_30 = arith.constant 0 : index
        %c0_31 = arith.constant 0 : index
        %59 = vector.load %arg5[%c0_30, %c0_31] : memref<128x512xf32, #tpu.memory_space<vmem>>, vector<128x512xf32>
        %cst_32 = arith.constant dense<0.000000e+00> : vector<8x512xf32>
        %60 = tpu.matmul %58, %59, %cst_32 {dimension_numbers = #tpu.dot_dimension_numbers<[1], [0], [0], [1], [0, 0, 1, 1], [], []>} : vector<8x128xf32>, vector<128x512xf32>, vector<8x512xf32> -> vector<8x512xf32>
        %61 = arith.addf %57, %60 : vector<8x512xf32>
        %62 = vector.extract_strided_slice %61 {offsets = [0, 0], sizes = [8, 128], strides = [1, 1]} : vector<8x512xf32> to vector<8x128xf32>
        %63 = arith.negf %62 : vector<8x128xf32>
        %64 = math.exp %63 : vector<8x128xf32>
        %cst_33 = arith.constant 1.000000e+00 : f32
        %65 = vector.broadcast %cst_33 : f32 to vector<8x128xf32>
        %66 = arith.addf %65, %64 : vector<8x128xf32>
        %67 = arith.divf %65, %66 : vector<8x128xf32>
        %68 = vector.extract_strided_slice %61 {offsets = [0, 128], sizes = [8, 128], strides = [1, 1]} : vector<8x512xf32> to vector<8x128xf32>
        %69 = arith.negf %68 : vector<8x128xf32>
        %70 = math.exp %69 : vector<8x128xf32>
        %cst_34 = arith.constant 1.000000e+00 : f32
        %71 = vector.broadcast %cst_34 : f32 to vector<8x128xf32>
        %72 = arith.addf %71, %70 : vector<8x128xf32>
        %73 = arith.divf %71, %72 : vector<8x128xf32>
        %74 = vector.extract_strided_slice %61 {offsets = [0, 256], sizes = [8, 128], strides = [1, 1]} : vector<8x512xf32> to vector<8x128xf32>
        %75 = math.tanh %74 : vector<8x128xf32>
        %76 = vector.extract_strided_slice %61 {offsets = [0, 384], sizes = [8, 128], strides = [1, 1]} : vector<8x512xf32> to vector<8x128xf32>
        %77 = arith.negf %76 : vector<8x128xf32>
        %78 = math.exp %77 : vector<8x128xf32>
        %cst_35 = arith.constant 1.000000e+00 : f32
        %79 = vector.broadcast %cst_35 : f32 to vector<8x128xf32>
        %80 = arith.addf %79, %78 : vector<8x128xf32>
        %81 = arith.divf %79, %80 : vector<8x128xf32>
        %c0_36 = arith.constant 0 : index
        %c0_37 = arith.constant 0 : index
        %82 = vector.load %arg13[%c0_36, %c0_37] : memref<8x128xf32, #tpu.memory_space<vmem>>, vector<8x128xf32>
        %83 = arith.mulf %73, %82 : vector<8x128xf32>
        %84 = arith.mulf %67, %75 : vector<8x128xf32>
        %85 = arith.addf %83, %84 : vector<8x128xf32>
        %86 = math.tanh %85 : vector<8x128xf32>
        %87 = arith.mulf %81, %86 : vector<8x128xf32>
        %88 = vector.broadcast %27 : i32 to vector<8x128xi32>
        %89 = arith.cmpi slt, %88, %22 : vector<8x128xi32>
        %c0_38 = arith.constant 0 : index
        %c0_39 = arith.constant 0 : index
        %90 = vector.load %arg12[%c0_38, %c0_39] : memref<8x128xf32, #tpu.memory_space<vmem>>, vector<8x128xf32>
        %91 = arith.select %89, %87, %90 : vector<8x128xi1>, vector<8x128xf32>
        %c0_40 = arith.constant 0 : index
        %c0_41 = arith.constant 0 : index
        %92 = vector.load %arg12[%c0_40, %c0_41] : memref<8x128xf32, #tpu.memory_space<vmem>>, vector<8x128xf32>
        tpu.vector_store %arg12[%c0_40, %c0_41], %91 {strides = array<i32>} : memref<8x128xf32, #tpu.memory_space<vmem>>, vector<8x128xf32>,
        %c0_42 = arith.constant 0 : index
        %c0_43 = arith.constant 0 : index
        %93 = vector.load %arg13[%c0_42, %c0_43] : memref<8x128xf32, #tpu.memory_space<vmem>>, vector<8x128xf32>
        %94 = arith.select %89, %85, %93 : vector<8x128xi1>, vector<8x128xf32>
        %c0_44 = arith.constant 0 : index
        %c0_45 = arith.constant 0 : index
        %95 = vector.load %arg13[%c0_44, %c0_45] : memref<8x128xf32, #tpu.memory_space<vmem>>, vector<8x128xf32>
        tpu.vector_store %arg13[%c0_44, %c0_45], %94 {strides = array<i32>} : memref<8x128xf32, #tpu.memory_space<vmem>>, vector<8x128xf32>,
      } else {
      }
      %c2_i32 = arith.constant 2 : i32
      %31 = arith.addi %4, %c2_i32 : i32
      %32 = arith.cmpi slt, %31, %3 : i32
      %33 = arith.extui %32 : i1 to i32
      %c0_i32_19 = arith.constant 0 : i32
      %34 = arith.cmpi ne, %33, %c0_i32_19 : i32
      scf.if %34 {
        %55 = arith.index_cast %c2_i32 : i32 to index
        %c0_26 = arith.constant 0 : index
        %c0_27 = arith.constant 0 : index
        %56 = vector.load %arg14[%55, %c0_26, %c0_27] : memref<8x8x512xf32, #tpu.memory_space<vmem>>, vector<1x8x512xf32>
        %57 = vector.shape_cast %56 : vector<1x8x512xf32> to vector<8x512xf32>
        %c0_28 = arith.constant 0 : index
        %c0_29 = arith.constant 0 : index
        %58 = vector.load %arg12[%c0_28, %c0_29] : memref<8x128xf32, #tpu.memory_space<vmem>>, vector<8x128xf32>
        %c0_30 = arith.constant 0 : index
        %c0_31 = arith.constant 0 : index
        %59 = vector.load %arg5[%c0_30, %c0_31] : memref<128x512xf32, #tpu.memory_space<vmem>>, vector<128x512xf32>
        %cst_32 = arith.constant dense<0.000000e+00> : vector<8x512xf32>
        %60 = tpu.matmul %58, %59, %cst_32 {dimension_numbers = #tpu.dot_dimension_numbers<[1], [0], [0], [1], [0, 0, 1, 1], [], []>} : vector<8x128xf32>, vector<128x512xf32>, vector<8x512xf32> -> vector<8x512xf32>
        %61 = arith.addf %57, %60 : vector<8x512xf32>
        %62 = vector.extract_strided_slice %61 {offsets = [0, 0], sizes = [8, 128], strides = [1, 1]} : vector<8x512xf32> to vector<8x128xf32>
        %63 = arith.negf %62 : vector<8x128xf32>
        %64 = math.exp %63 : vector<8x128xf32>
        %cst_33 = arith.constant 1.000000e+00 : f32
        %65 = vector.broadcast %cst_33 : f32 to vector<8x128xf32>
        %66 = arith.addf %65, %64 : vector<8x128xf32>
        %67 = arith.divf %65, %66 : vector<8x128xf32>
        %68 = vector.extract_strided_slice %61 {offsets = [0, 128], sizes = [8, 128], strides = [1, 1]} : vector<8x512xf32> to vector<8x128xf32>
        %69 = arith.negf %68 : vector<8x128xf32>
        %70 = math.exp %69 : vector<8x128xf32>
        %cst_34 = arith.constant 1.000000e+00 : f32
        %71 = vector.broadcast %cst_34 : f32 to vector<8x128xf32>
        %72 = arith.addf %71, %70 : vector<8x128xf32>
        %73 = arith.divf %71, %72 : vector<8x128xf32>
        %74 = vector.extract_strided_slice %61 {offsets = [0, 256], sizes = [8, 128], strides = [1, 1]} : vector<8x512xf32> to vector<8x128xf32>
        %75 = math.tanh %74 : vector<8x128xf32>
        %76 = vector.extract_strided_slice %61 {offsets = [0, 384], sizes = [8, 128], strides = [1, 1]} : vector<8x512xf32> to vector<8x128xf32>
        %77 = arith.negf %76 : vector<8x128xf32>
        %78 = math.exp %77 : vector<8x128xf32>
        %cst_35 = arith.constant 1.000000e+00 : f32
        %79 = vector.broadcast %cst_35 : f32 to vector<8x128xf32>
        %80 = arith.addf %79, %78 : vector<8x128xf32>
        %81 = arith.divf %79, %80 : vector<8x128xf32>
        %c0_36 = arith.constant 0 : index
        %c0_37 = arith.constant 0 : index
        %82 = vector.load %arg13[%c0_36, %c0_37] : memref<8x128xf32, #tpu.memory_space<vmem>>, vector<8x128xf32>
        %83 = arith.mulf %73, %82 : vector<8x128xf32>
        %84 = arith.mulf %67, %75 : vector<8x128xf32>
        %85 = arith.addf %83, %84 : vector<8x128xf32>
        %86 = math.tanh %85 : vector<8x128xf32>
        %87 = arith.mulf %81, %86 : vector<8x128xf32>
        %88 = vector.broadcast %31 : i32 to vector<8x128xi32>
        %89 = arith.cmpi slt, %88, %22 : vector<8x128xi32>
        %c0_38 = arith.constant 0 : index
        %c0_39 = arith.constant 0 : index
        %90 = vector.load %arg12[%c0_38, %c0_39] : memref<8x128xf32, #tpu.memory_space<vmem>>, vector<8x128xf32>
        %91 = arith.select %89, %87, %90 : vector<8x128xi1>, vector<8x128xf32>
        %c0_40 = arith.constant 0 : index
        %c0_41 = arith.constant 0 : index
        %92 = vector.load %arg12[%c0_40, %c0_41] : memref<8x128xf32, #tpu.memory_space<vmem>>, vector<8x128xf32>
        tpu.vector_store %arg12[%c0_40, %c0_41], %91 {strides = array<i32>} : memref<8x128xf32, #tpu.memory_space<vmem>>, vector<8x128xf32>,
        %c0_42 = arith.constant 0 : index
        %c0_43 = arith.constant 0 : index
        %93 = vector.load %arg13[%c0_42, %c0_43] : memref<8x128xf32, #tpu.memory_space<vmem>>, vector<8x128xf32>
        %94 = arith.select %89, %85, %93 : vector<8x128xi1>, vector<8x128xf32>
        %c0_44 = arith.constant 0 : index
        %c0_45 = arith.constant 0 : index
        %95 = vector.load %arg13[%c0_44, %c0_45] : memref<8x128xf32, #tpu.memory_space<vmem>>, vector<8x128xf32>
        tpu.vector_store %arg13[%c0_44, %c0_45], %94 {strides = array<i32>} : memref<8x128xf32, #tpu.memory_space<vmem>>, vector<8x128xf32>,
      } else {
      }
      %c3_i32 = arith.constant 3 : i32
      %35 = arith.addi %4, %c3_i32 : i32
      %36 = arith.cmpi slt, %35, %3 : i32
      %37 = arith.extui %36 : i1 to i32
      %c0_i32_20 = arith.constant 0 : i32
      %38 = arith.cmpi ne, %37, %c0_i32_20 : i32
      scf.if %38 {
        %55 = arith.index_cast %c3_i32 : i32 to index
        %c0_26 = arith.constant 0 : index
        %c0_27 = arith.constant 0 : index
        %56 = vector.load %arg14[%55, %c0_26, %c0_27] : memref<8x8x512xf32, #tpu.memory_space<vmem>>, vector<1x8x512xf32>
        %57 = vector.shape_cast %56 : vector<1x8x512xf32> to vector<8x512xf32>
        %c0_28 = arith.constant 0 : index
        %c0_29 = arith.constant 0 : index
        %58 = vector.load %arg12[%c0_28, %c0_29] : memref<8x128xf32, #tpu.memory_space<vmem>>, vector<8x128xf32>
        %c0_30 = arith.constant 0 : index
        %c0_31 = arith.constant 0 : index
        %59 = vector.load %arg5[%c0_30, %c0_31] : memref<128x512xf32, #tpu.memory_space<vmem>>, vector<128x512xf32>
        %cst_32 = arith.constant dense<0.000000e+00> : vector<8x512xf32>
        %60 = tpu.matmul %58, %59, %cst_32 {dimension_numbers = #tpu.dot_dimension_numbers<[1], [0], [0], [1], [0, 0, 1, 1], [], []>} : vector<8x128xf32>, vector<128x512xf32>, vector<8x512xf32> -> vector<8x512xf32>
        %61 = arith.addf %57, %60 : vector<8x512xf32>
        %62 = vector.extract_strided_slice %61 {offsets = [0, 0], sizes = [8, 128], strides = [1, 1]} : vector<8x512xf32> to vector<8x128xf32>
        %63 = arith.negf %62 : vector<8x128xf32>
        %64 = math.exp %63 : vector<8x128xf32>
        %cst_33 = arith.constant 1.000000e+00 : f32
        %65 = vector.broadcast %cst_33 : f32 to vector<8x128xf32>
        %66 = arith.addf %65, %64 : vector<8x128xf32>
        %67 = arith.divf %65, %66 : vector<8x128xf32>
        %68 = vector.extract_strided_slice %61 {offsets = [0, 128], sizes = [8, 128], strides = [1, 1]} : vector<8x512xf32> to vector<8x128xf32>
        %69 = arith.negf %68 : vector<8x128xf32>
        %70 = math.exp %69 : vector<8x128xf32>
        %cst_34 = arith.constant 1.000000e+00 : f32
        %71 = vector.broadcast %cst_34 : f32 to vector<8x128xf32>
        %72 = arith.addf %71, %70 : vector<8x128xf32>
        %73 = arith.divf %71, %72 : vector<8x128xf32>
        %74 = vector.extract_strided_slice %61 {offsets = [0, 256], sizes = [8, 128], strides = [1, 1]} : vector<8x512xf32> to vector<8x128xf32>
        %75 = math.tanh %74 : vector<8x128xf32>
        %76 = vector.extract_strided_slice %61 {offsets = [0, 384], sizes = [8, 128], strides = [1, 1]} : vector<8x512xf32> to vector<8x128xf32>
        %77 = arith.negf %76 : vector<8x128xf32>
        %78 = math.exp %77 : vector<8x128xf32>
        %cst_35 = arith.constant 1.000000e+00 : f32
        %79 = vector.broadcast %cst_35 : f32 to vector<8x128xf32>
        %80 = arith.addf %79, %78 : vector<8x128xf32>
        %81 = arith.divf %79, %80 : vector<8x128xf32>
        %c0_36 = arith.constant 0 : index
        %c0_37 = arith.constant 0 : index
        %82 = vector.load %arg13[%c0_36, %c0_37] : memref<8x128xf32, #tpu.memory_space<vmem>>, vector<8x128xf32>
        %83 = arith.mulf %73, %82 : vector<8x128xf32>
        %84 = arith.mulf %67, %75 : vector<8x128xf32>
        %85 = arith.addf %83, %84 : vector<8x128xf32>
        %86 = math.tanh %85 : vector<8x128xf32>
        %87 = arith.mulf %81, %86 : vector<8x128xf32>
        %88 = vector.broadcast %35 : i32 to vector<8x128xi32>
        %89 = arith.cmpi slt, %88, %22 : vector<8x128xi32>
        %c0_38 = arith.constant 0 : index
        %c0_39 = arith.constant 0 : index
        %90 = vector.load %arg12[%c0_38, %c0_39] : memref<8x128xf32, #tpu.memory_space<vmem>>, vector<8x128xf32>
        %91 = arith.select %89, %87, %90 : vector<8x128xi1>, vector<8x128xf32>
        %c0_40 = arith.constant 0 : index
        %c0_41 = arith.constant 0 : index
        %92 = vector.load %arg12[%c0_40, %c0_41] : memref<8x128xf32, #tpu.memory_space<vmem>>, vector<8x128xf32>
        tpu.vector_store %arg12[%c0_40, %c0_41], %91 {strides = array<i32>} : memref<8x128xf32, #tpu.memory_space<vmem>>, vector<8x128xf32>,
        %c0_42 = arith.constant 0 : index
        %c0_43 = arith.constant 0 : index
        %93 = vector.load %arg13[%c0_42, %c0_43] : memref<8x128xf32, #tpu.memory_space<vmem>>, vector<8x128xf32>
        %94 = arith.select %89, %85, %93 : vector<8x128xi1>, vector<8x128xf32>
        %c0_44 = arith.constant 0 : index
        %c0_45 = arith.constant 0 : index
        %95 = vector.load %arg13[%c0_44, %c0_45] : memref<8x128xf32, #tpu.memory_space<vmem>>, vector<8x128xf32>
        tpu.vector_store %arg13[%c0_44, %c0_45], %94 {strides = array<i32>} : memref<8x128xf32, #tpu.memory_space<vmem>>, vector<8x128xf32>,
      } else {
      }
      %c4_i32 = arith.constant 4 : i32
      %39 = arith.addi %4, %c4_i32 : i32
      %40 = arith.cmpi slt, %39, %3 : i32
      %41 = arith.extui %40 : i1 to i32
      %c0_i32_21 = arith.constant 0 : i32
      %42 = arith.cmpi ne, %41, %c0_i32_21 : i32
      scf.if %42 {
        %55 = arith.index_cast %c4_i32 : i32 to index
        %c0_26 = arith.constant 0 : index
        %c0_27 = arith.constant 0 : index
        %56 = vector.load %arg14[%55, %c0_26, %c0_27] : memref<8x8x512xf32, #tpu.memory_space<vmem>>, vector<1x8x512xf32>
        %57 = vector.shape_cast %56 : vector<1x8x512xf32> to vector<8x512xf32>
        %c0_28 = arith.constant 0 : index
        %c0_29 = arith.constant 0 : index
        %58 = vector.load %arg12[%c0_28, %c0_29] : memref<8x128xf32, #tpu.memory_space<vmem>>, vector<8x128xf32>
        %c0_30 = arith.constant 0 : index
        %c0_31 = arith.constant 0 : index
        %59 = vector.load %arg5[%c0_30, %c0_31] : memref<128x512xf32, #tpu.memory_space<vmem>>, vector<128x512xf32>
        %cst_32 = arith.constant dense<0.000000e+00> : vector<8x512xf32>
        %60 = tpu.matmul %58, %59, %cst_32 {dimension_numbers = #tpu.dot_dimension_numbers<[1], [0], [0], [1], [0, 0, 1, 1], [], []>} : vector<8x128xf32>, vector<128x512xf32>, vector<8x512xf32> -> vector<8x512xf32>
        %61 = arith.addf %57, %60 : vector<8x512xf32>
        %62 = vector.extract_strided_slice %61 {offsets = [0, 0], sizes = [8, 128], strides = [1, 1]} : vector<8x512xf32> to vector<8x128xf32>
        %63 = arith.negf %62 : vector<8x128xf32>
        %64 = math.exp %63 : vector<8x128xf32>
        %cst_33 = arith.constant 1.000000e+00 : f32
        %65 = vector.broadcast %cst_33 : f32 to vector<8x128xf32>
        %66 = arith.addf %65, %64 : vector<8x128xf32>
        %67 = arith.divf %65, %66 : vector<8x128xf32>
        %68 = vector.extract_strided_slice %61 {offsets = [0, 128], sizes = [8, 128], strides = [1, 1]} : vector<8x512xf32> to vector<8x128xf32>
        %69 = arith.negf %68 : vector<8x128xf32>
        %70 = math.exp %69 : vector<8x128xf32>
        %cst_34 = arith.constant 1.000000e+00 : f32
        %71 = vector.broadcast %cst_34 : f32 to vector<8x128xf32>
        %72 = arith.addf %71, %70 : vector<8x128xf32>
        %73 = arith.divf %71, %72 : vector<8x128xf32>
        %74 = vector.extract_strided_slice %61 {offsets = [0, 256], sizes = [8, 128], strides = [1, 1]} : vector<8x512xf32> to vector<8x128xf32>
        %75 = math.tanh %74 : vector<8x128xf32>
        %76 = vector.extract_strided_slice %61 {offsets = [0, 384], sizes = [8, 128], strides = [1, 1]} : vector<8x512xf32> to vector<8x128xf32>
        %77 = arith.negf %76 : vector<8x128xf32>
        %78 = math.exp %77 : vector<8x128xf32>
        %cst_35 = arith.constant 1.000000e+00 : f32
        %79 = vector.broadcast %cst_35 : f32 to vector<8x128xf32>
        %80 = arith.addf %79, %78 : vector<8x128xf32>
        %81 = arith.divf %79, %80 : vector<8x128xf32>
        %c0_36 = arith.constant 0 : index
        %c0_37 = arith.constant 0 : index
        %82 = vector.load %arg13[%c0_36, %c0_37] : memref<8x128xf32, #tpu.memory_space<vmem>>, vector<8x128xf32>
        %83 = arith.mulf %73, %82 : vector<8x128xf32>
        %84 = arith.mulf %67, %75 : vector<8x128xf32>
        %85 = arith.addf %83, %84 : vector<8x128xf32>
        %86 = math.tanh %85 : vector<8x128xf32>
        %87 = arith.mulf %81, %86 : vector<8x128xf32>
        %88 = vector.broadcast %39 : i32 to vector<8x128xi32>
        %89 = arith.cmpi slt, %88, %22 : vector<8x128xi32>
        %c0_38 = arith.constant 0 : index
        %c0_39 = arith.constant 0 : index
        %90 = vector.load %arg12[%c0_38, %c0_39] : memref<8x128xf32, #tpu.memory_space<vmem>>, vector<8x128xf32>
        %91 = arith.select %89, %87, %90 : vector<8x128xi1>, vector<8x128xf32>
        %c0_40 = arith.constant 0 : index
        %c0_41 = arith.constant 0 : index
        %92 = vector.load %arg12[%c0_40, %c0_41] : memref<8x128xf32, #tpu.memory_space<vmem>>, vector<8x128xf32>
        tpu.vector_store %arg12[%c0_40, %c0_41], %91 {strides = array<i32>} : memref<8x128xf32, #tpu.memory_space<vmem>>, vector<8x128xf32>,
        %c0_42 = arith.constant 0 : index
        %c0_43 = arith.constant 0 : index
        %93 = vector.load %arg13[%c0_42, %c0_43] : memref<8x128xf32, #tpu.memory_space<vmem>>, vector<8x128xf32>
        %94 = arith.select %89, %85, %93 : vector<8x128xi1>, vector<8x128xf32>
        %c0_44 = arith.constant 0 : index
        %c0_45 = arith.constant 0 : index
        %95 = vector.load %arg13[%c0_44, %c0_45] : memref<8x128xf32, #tpu.memory_space<vmem>>, vector<8x128xf32>
        tpu.vector_store %arg13[%c0_44, %c0_45], %94 {strides = array<i32>} : memref<8x128xf32, #tpu.memory_space<vmem>>, vector<8x128xf32>,
      } else {
      }
      %c5_i32 = arith.constant 5 : i32
      %43 = arith.addi %4, %c5_i32 : i32
      %44 = arith.cmpi slt, %43, %3 : i32
      %45 = arith.extui %44 : i1 to i32
      %c0_i32_22 = arith.constant 0 : i32
      %46 = arith.cmpi ne, %45, %c0_i32_22 : i32
      scf.if %46 {
        %55 = arith.index_cast %c5_i32 : i32 to index
        %c0_26 = arith.constant 0 : index
        %c0_27 = arith.constant 0 : index
        %56 = vector.load %arg14[%55, %c0_26, %c0_27] : memref<8x8x512xf32, #tpu.memory_space<vmem>>, vector<1x8x512xf32>
        %57 = vector.shape_cast %56 : vector<1x8x512xf32> to vector<8x512xf32>
        %c0_28 = arith.constant 0 : index
        %c0_29 = arith.constant 0 : index
        %58 = vector.load %arg12[%c0_28, %c0_29] : memref<8x128xf32, #tpu.memory_space<vmem>>, vector<8x128xf32>
        %c0_30 = arith.constant 0 : index
        %c0_31 = arith.constant 0 : index
        %59 = vector.load %arg5[%c0_30, %c0_31] : memref<128x512xf32, #tpu.memory_space<vmem>>, vector<128x512xf32>
        %cst_32 = arith.constant dense<0.000000e+00> : vector<8x512xf32>
        %60 = tpu.matmul %58, %59, %cst_32 {dimension_numbers = #tpu.dot_dimension_numbers<[1], [0], [0], [1], [0, 0, 1, 1], [], []>} : vector<8x128xf32>, vector<128x512xf32>, vector<8x512xf32> -> vector<8x512xf32>
        %61 = arith.addf %57, %60 : vector<8x512xf32>
        %62 = vector.extract_strided_slice %61 {offsets = [0, 0], sizes = [8, 128], strides = [1, 1]} : vector<8x512xf32> to vector<8x128xf32>
        %63 = arith.negf %62 : vector<8x128xf32>
        %64 = math.exp %63 : vector<8x128xf32>
        %cst_33 = arith.constant 1.000000e+00 : f32
        %65 = vector.broadcast %cst_33 : f32 to vector<8x128xf32>
        %66 = arith.addf %65, %64 : vector<8x128xf32>
        %67 = arith.divf %65, %66 : vector<8x128xf32>
        %68 = vector.extract_strided_slice %61 {offsets = [0, 128], sizes = [8, 128], strides = [1, 1]} : vector<8x512xf32> to vector<8x128xf32>
        %69 = arith.negf %68 : vector<8x128xf32>
        %70 = math.exp %69 : vector<8x128xf32>
        %cst_34 = arith.constant 1.000000e+00 : f32
        %71 = vector.broadcast %cst_34 : f32 to vector<8x128xf32>
        %72 = arith.addf %71, %70 : vector<8x128xf32>
        %73 = arith.divf %71, %72 : vector<8x128xf32>
        %74 = vector.extract_strided_slice %61 {offsets = [0, 256], sizes = [8, 128], strides = [1, 1]} : vector<8x512xf32> to vector<8x128xf32>
        %75 = math.tanh %74 : vector<8x128xf32>
        %76 = vector.extract_strided_slice %61 {offsets = [0, 384], sizes = [8, 128], strides = [1, 1]} : vector<8x512xf32> to vector<8x128xf32>
        %77 = arith.negf %76 : vector<8x128xf32>
        %78 = math.exp %77 : vector<8x128xf32>
        %cst_35 = arith.constant 1.000000e+00 : f32
        %79 = vector.broadcast %cst_35 : f32 to vector<8x128xf32>
        %80 = arith.addf %79, %78 : vector<8x128xf32>
        %81 = arith.divf %79, %80 : vector<8x128xf32>
        %c0_36 = arith.constant 0 : index
        %c0_37 = arith.constant 0 : index
        %82 = vector.load %arg13[%c0_36, %c0_37] : memref<8x128xf32, #tpu.memory_space<vmem>>, vector<8x128xf32>
        %83 = arith.mulf %73, %82 : vector<8x128xf32>
        %84 = arith.mulf %67, %75 : vector<8x128xf32>
        %85 = arith.addf %83, %84 : vector<8x128xf32>
        %86 = math.tanh %85 : vector<8x128xf32>
        %87 = arith.mulf %81, %86 : vector<8x128xf32>
        %88 = vector.broadcast %43 : i32 to vector<8x128xi32>
        %89 = arith.cmpi slt, %88, %22 : vector<8x128xi32>
        %c0_38 = arith.constant 0 : index
        %c0_39 = arith.constant 0 : index
        %90 = vector.load %arg12[%c0_38, %c0_39] : memref<8x128xf32, #tpu.memory_space<vmem>>, vector<8x128xf32>
        %91 = arith.select %89, %87, %90 : vector<8x128xi1>, vector<8x128xf32>
        %c0_40 = arith.constant 0 : index
        %c0_41 = arith.constant 0 : index
        %92 = vector.load %arg12[%c0_40, %c0_41] : memref<8x128xf32, #tpu.memory_space<vmem>>, vector<8x128xf32>
        tpu.vector_store %arg12[%c0_40, %c0_41], %91 {strides = array<i32>} : memref<8x128xf32, #tpu.memory_space<vmem>>, vector<8x128xf32>,
        %c0_42 = arith.constant 0 : index
        %c0_43 = arith.constant 0 : index
        %93 = vector.load %arg13[%c0_42, %c0_43] : memref<8x128xf32, #tpu.memory_space<vmem>>, vector<8x128xf32>
        %94 = arith.select %89, %85, %93 : vector<8x128xi1>, vector<8x128xf32>
        %c0_44 = arith.constant 0 : index
        %c0_45 = arith.constant 0 : index
        %95 = vector.load %arg13[%c0_44, %c0_45] : memref<8x128xf32, #tpu.memory_space<vmem>>, vector<8x128xf32>
        tpu.vector_store %arg13[%c0_44, %c0_45], %94 {strides = array<i32>} : memref<8x128xf32, #tpu.memory_space<vmem>>, vector<8x128xf32>,
      } else {
      }
      %c6_i32 = arith.constant 6 : i32
      %47 = arith.addi %4, %c6_i32 : i32
      %48 = arith.cmpi slt, %47, %3 : i32
      %49 = arith.extui %48 : i1 to i32
      %c0_i32_23 = arith.constant 0 : i32
      %50 = arith.cmpi ne, %49, %c0_i32_23 : i32
      scf.if %50 {
        %55 = arith.index_cast %c6_i32 : i32 to index
        %c0_26 = arith.constant 0 : index
        %c0_27 = arith.constant 0 : index
        %56 = vector.load %arg14[%55, %c0_26, %c0_27] : memref<8x8x512xf32, #tpu.memory_space<vmem>>, vector<1x8x512xf32>
        %57 = vector.shape_cast %56 : vector<1x8x512xf32> to vector<8x512xf32>
        %c0_28 = arith.constant 0 : index
        %c0_29 = arith.constant 0 : index
        %58 = vector.load %arg12[%c0_28, %c0_29] : memref<8x128xf32, #tpu.memory_space<vmem>>, vector<8x128xf32>
        %c0_30 = arith.constant 0 : index
        %c0_31 = arith.constant 0 : index
        %59 = vector.load %arg5[%c0_30, %c0_31] : memref<128x512xf32, #tpu.memory_space<vmem>>, vector<128x512xf32>
        %cst_32 = arith.constant dense<0.000000e+00> : vector<8x512xf32>
        %60 = tpu.matmul %58, %59, %cst_32 {dimension_numbers = #tpu.dot_dimension_numbers<[1], [0], [0], [1], [0, 0, 1, 1], [], []>} : vector<8x128xf32>, vector<128x512xf32>, vector<8x512xf32> -> vector<8x512xf32>
        %61 = arith.addf %57, %60 : vector<8x512xf32>
        %62 = vector.extract_strided_slice %61 {offsets = [0, 0], sizes = [8, 128], strides = [1, 1]} : vector<8x512xf32> to vector<8x128xf32>
        %63 = arith.negf %62 : vector<8x128xf32>
        %64 = math.exp %63 : vector<8x128xf32>
        %cst_33 = arith.constant 1.000000e+00 : f32
        %65 = vector.broadcast %cst_33 : f32 to vector<8x128xf32>
        %66 = arith.addf %65, %64 : vector<8x128xf32>
        %67 = arith.divf %65, %66 : vector<8x128xf32>
        %68 = vector.extract_strided_slice %61 {offsets = [0, 128], sizes = [8, 128], strides = [1, 1]} : vector<8x512xf32> to vector<8x128xf32>
        %69 = arith.negf %68 : vector<8x128xf32>
        %70 = math.exp %69 : vector<8x128xf32>
        %cst_34 = arith.constant 1.000000e+00 : f32
        %71 = vector.broadcast %cst_34 : f32 to vector<8x128xf32>
        %72 = arith.addf %71, %70 : vector<8x128xf32>
        %73 = arith.divf %71, %72 : vector<8x128xf32>
        %74 = vector.extract_strided_slice %61 {offsets = [0, 256], sizes = [8, 128], strides = [1, 1]} : vector<8x512xf32> to vector<8x128xf32>
        %75 = math.tanh %74 : vector<8x128xf32>
        %76 = vector.extract_strided_slice %61 {offsets = [0, 384], sizes = [8, 128], strides = [1, 1]} : vector<8x512xf32> to vector<8x128xf32>
        %77 = arith.negf %76 : vector<8x128xf32>
        %78 = math.exp %77 : vector<8x128xf32>
        %cst_35 = arith.constant 1.000000e+00 : f32
        %79 = vector.broadcast %cst_35 : f32 to vector<8x128xf32>
        %80 = arith.addf %79, %78 : vector<8x128xf32>
        %81 = arith.divf %79, %80 : vector<8x128xf32>
        %c0_36 = arith.constant 0 : index
        %c0_37 = arith.constant 0 : index
        %82 = vector.load %arg13[%c0_36, %c0_37] : memref<8x128xf32, #tpu.memory_space<vmem>>, vector<8x128xf32>
        %83 = arith.mulf %73, %82 : vector<8x128xf32>
        %84 = arith.mulf %67, %75 : vector<8x128xf32>
        %85 = arith.addf %83, %84 : vector<8x128xf32>
        %86 = math.tanh %85 : vector<8x128xf32>
        %87 = arith.mulf %81, %86 : vector<8x128xf32>
        %88 = vector.broadcast %47 : i32 to vector<8x128xi32>
        %89 = arith.cmpi slt, %88, %22 : vector<8x128xi32>
        %c0_38 = arith.constant 0 : index
        %c0_39 = arith.constant 0 : index
        %90 = vector.load %arg12[%c0_38, %c0_39] : memref<8x128xf32, #tpu.memory_space<vmem>>, vector<8x128xf32>
        %91 = arith.select %89, %87, %90 : vector<8x128xi1>, vector<8x128xf32>
        %c0_40 = arith.constant 0 : index
        %c0_41 = arith.constant 0 : index
        %92 = vector.load %arg12[%c0_40, %c0_41] : memref<8x128xf32, #tpu.memory_space<vmem>>, vector<8x128xf32>
        tpu.vector_store %arg12[%c0_40, %c0_41], %91 {strides = array<i32>} : memref<8x128xf32, #tpu.memory_space<vmem>>, vector<8x128xf32>,
        %c0_42 = arith.constant 0 : index
        %c0_43 = arith.constant 0 : index
        %93 = vector.load %arg13[%c0_42, %c0_43] : memref<8x128xf32, #tpu.memory_space<vmem>>, vector<8x128xf32>
        %94 = arith.select %89, %85, %93 : vector<8x128xi1>, vector<8x128xf32>
        %c0_44 = arith.constant 0 : index
        %c0_45 = arith.constant 0 : index
        %95 = vector.load %arg13[%c0_44, %c0_45] : memref<8x128xf32, #tpu.memory_space<vmem>>, vector<8x128xf32>
        tpu.vector_store %arg13[%c0_44, %c0_45], %94 {strides = array<i32>} : memref<8x128xf32, #tpu.memory_space<vmem>>, vector<8x128xf32>,
      } else {
      }
      %c7_i32 = arith.constant 7 : i32
      %51 = arith.addi %4, %c7_i32 : i32
      %52 = arith.cmpi slt, %51, %3 : i32
      %53 = arith.extui %52 : i1 to i32
      %c0_i32_24 = arith.constant 0 : i32
      %54 = arith.cmpi ne, %53, %c0_i32_24 : i32
      scf.if %54 {
        %55 = arith.index_cast %c7_i32 : i32 to index
        %c0_26 = arith.constant 0 : index
        %c0_27 = arith.constant 0 : index
        %56 = vector.load %arg14[%55, %c0_26, %c0_27] : memref<8x8x512xf32, #tpu.memory_space<vmem>>, vector<1x8x512xf32>
        %57 = vector.shape_cast %56 : vector<1x8x512xf32> to vector<8x512xf32>
        %c0_28 = arith.constant 0 : index
        %c0_29 = arith.constant 0 : index
        %58 = vector.load %arg12[%c0_28, %c0_29] : memref<8x128xf32, #tpu.memory_space<vmem>>, vector<8x128xf32>
        %c0_30 = arith.constant 0 : index
        %c0_31 = arith.constant 0 : index
        %59 = vector.load %arg5[%c0_30, %c0_31] : memref<128x512xf32, #tpu.memory_space<vmem>>, vector<128x512xf32>
        %cst_32 = arith.constant dense<0.000000e+00> : vector<8x512xf32>
        %60 = tpu.matmul %58, %59, %cst_32 {dimension_numbers = #tpu.dot_dimension_numbers<[1], [0], [0], [1], [0, 0, 1, 1], [], []>} : vector<8x128xf32>, vector<128x512xf32>, vector<8x512xf32> -> vector<8x512xf32>
        %61 = arith.addf %57, %60 : vector<8x512xf32>
        %62 = vector.extract_strided_slice %61 {offsets = [0, 0], sizes = [8, 128], strides = [1, 1]} : vector<8x512xf32> to vector<8x128xf32>
        %63 = arith.negf %62 : vector<8x128xf32>
        %64 = math.exp %63 : vector<8x128xf32>
        %cst_33 = arith.constant 1.000000e+00 : f32
        %65 = vector.broadcast %cst_33 : f32 to vector<8x128xf32>
        %66 = arith.addf %65, %64 : vector<8x128xf32>
        %67 = arith.divf %65, %66 : vector<8x128xf32>
        %68 = vector.extract_strided_slice %61 {offsets = [0, 128], sizes = [8, 128], strides = [1, 1]} : vector<8x512xf32> to vector<8x128xf32>
        %69 = arith.negf %68 : vector<8x128xf32>
        %70 = math.exp %69 : vector<8x128xf32>
        %cst_34 = arith.constant 1.000000e+00 : f32
        %71 = vector.broadcast %cst_34 : f32 to vector<8x128xf32>
        %72 = arith.addf %71, %70 : vector<8x128xf32>
        %73 = arith.divf %71, %72 : vector<8x128xf32>
        %74 = vector.extract_strided_slice %61 {offsets = [0, 256], sizes = [8, 128], strides = [1, 1]} : vector<8x512xf32> to vector<8x128xf32>
        %75 = math.tanh %74 : vector<8x128xf32>
        %76 = vector.extract_strided_slice %61 {offsets = [0, 384], sizes = [8, 128], strides = [1, 1]} : vector<8x512xf32> to vector<8x128xf32>
        %77 = arith.negf %76 : vector<8x128xf32>
        %78 = math.exp %77 : vector<8x128xf32>
        %cst_35 = arith.constant 1.000000e+00 : f32
        %79 = vector.broadcast %cst_35 : f32 to vector<8x128xf32>
        %80 = arith.addf %79, %78 : vector<8x128xf32>
        %81 = arith.divf %79, %80 : vector<8x128xf32>
        %c0_36 = arith.constant 0 : index
        %c0_37 = arith.constant 0 : index
        %82 = vector.load %arg13[%c0_36, %c0_37] : memref<8x128xf32, #tpu.memory_space<vmem>>, vector<8x128xf32>
        %83 = arith.mulf %73, %82 : vector<8x128xf32>
        %84 = arith.mulf %67, %75 : vector<8x128xf32>
        %85 = arith.addf %83, %84 : vector<8x128xf32>
        %86 = math.tanh %85 : vector<8x128xf32>
        %87 = arith.mulf %81, %86 : vector<8x128xf32>
        %88 = vector.broadcast %51 : i32 to vector<8x128xi32>
        %89 = arith.cmpi slt, %88, %22 : vector<8x128xi32>
        %c0_38 = arith.constant 0 : index
        %c0_39 = arith.constant 0 : index
        %90 = vector.load %arg12[%c0_38, %c0_39] : memref<8x128xf32, #tpu.memory_space<vmem>>, vector<8x128xf32>
        %91 = arith.select %89, %87, %90 : vector<8x128xi1>, vector<8x128xf32>
        %c0_40 = arith.constant 0 : index
        %c0_41 = arith.constant 0 : index
        %92 = vector.load %arg12[%c0_40, %c0_41] : memref<8x128xf32, #tpu.memory_space<vmem>>, vector<8x128xf32>
        tpu.vector_store %arg12[%c0_40, %c0_41], %91 {strides = array<i32>} : memref<8x128xf32, #tpu.memory_space<vmem>>, vector<8x128xf32>,
        %c0_42 = arith.constant 0 : index
        %c0_43 = arith.constant 0 : index
        %93 = vector.load %arg13[%c0_42, %c0_43] : memref<8x128xf32, #tpu.memory_space<vmem>>, vector<8x128xf32>
        %94 = arith.select %89, %85, %93 : vector<8x128xi1>, vector<8x128xf32>
        %c0_44 = arith.constant 0 : index
        %c0_45 = arith.constant 0 : index
        %95 = vector.load %arg13[%c0_44, %c0_45] : memref<8x128xf32, #tpu.memory_space<vmem>>, vector<8x128xf32>
        tpu.vector_store %arg13[%c0_44, %c0_45], %94 {strides = array<i32>} : memref<8x128xf32, #tpu.memory_space<vmem>>, vector<8x128xf32>,
      } else {
      }
      %c8_i32_25 = arith.constant 8 : i32
    } else {
    }
    %c0_i32_2 = arith.constant 0 : i32
    %8 = arith.cmpi eq, %arg0, %c0_i32_2 : i32
    %9 = arith.extui %8 : i1 to i32
    %c0_i32_3 = arith.constant 0 : i32
    %10 = arith.cmpi ne, %9, %c0_i32_3 : i32
    scf.if %10 {
      %c0_4 = arith.constant 0 : index
      %c0_5 = arith.constant 0 : index
      %11 = vector.load %arg12[%c0_4, %c0_5] : memref<8x128xf32, #tpu.memory_space<vmem>>, vector<8x128xf32>
      %c0_6 = arith.constant 0 : index
      %c0_7 = arith.constant 0 : index
      %12 = vector.load %arg7[%c0_6, %c0_7] : memref<128x128xf32, #tpu.memory_space<vmem>>, vector<128x128xf32>
      %cst = arith.constant dense<0.000000e+00> : vector<8x128xf32>
      %13 = tpu.matmul %11, %12, %cst {dimension_numbers = #tpu.dot_dimension_numbers<[1], [0], [0], [1], [0, 0, 1, 1], [], []>} : vector<8x128xf32>, vector<128x128xf32>, vector<8x128xf32> -> vector<8x128xf32>
      %c0_8 = arith.constant 0 : index
      %c0_9 = arith.constant 0 : index
      %14 = vector.load %arg8[%c0_8, %c0_9] : memref<1x128xf32, #tpu.memory_space<vmem>>, vector<1x128xf32>
      %15 = vector.broadcast %14 : vector<1x128xf32> to vector<8x128xf32>
      %16 = arith.addf %13, %15 : vector<8x128xf32>
      %c0_10 = arith.constant 0 : index
      %c0_11 = arith.constant 0 : index
      %17 = vector.load %arg9[%c0_10, %c0_11] : memref<128x128xf32, #tpu.memory_space<vmem>>, vector<128x128xf32>
      %cst_12 = arith.constant dense<0.000000e+00> : vector<8x128xf32>
      %18 = tpu.matmul %16, %17, %cst_12 {dimension_numbers = #tpu.dot_dimension_numbers<[1], [0], [0], [1], [0, 0, 1, 1], [], []>} : vector<8x128xf32>, vector<128x128xf32>, vector<8x128xf32> -> vector<8x128xf32>
      %c0_13 = arith.constant 0 : index
      %c0_14 = arith.constant 0 : index
      %19 = vector.load %arg10[%c0_13, %c0_14] : memref<1x128xf32, #tpu.memory_space<vmem>>, vector<1x128xf32>
      %20 = vector.broadcast %19 : vector<1x128xf32> to vector<8x128xf32>
      %21 = arith.addf %18, %20 : vector<8x128xf32>
      %22 = arith.negf %21 : vector<8x128xf32>
      %23 = math.exp %22 : vector<8x128xf32>
      %cst_15 = arith.constant 1.000000e+00 : f32
      %24 = vector.broadcast %cst_15 : f32 to vector<8x128xf32>
      %25 = arith.addf %24, %23 : vector<8x128xf32>
      %26 = arith.divf %24, %25 : vector<8x128xf32>
      %c0_16 = arith.constant 0 : index
      %c0_17 = arith.constant 0 : index
      %27 = vector.load %arg11[%c0_16, %c0_17] : memref<8x128xf32, #tpu.memory_space<vmem>>, vector<8x128xf32>
      tpu.vector_store %arg11[%c0_16, %c0_17], %26 {strides = array<i32>} : memref<8x128xf32, #tpu.memory_space<vmem>>, vector<8x128xf32>,
    } else {
    }
    return
  }
  func.func @transform_0(%arg0: i32, %arg1: memref<1xi32, #tpu.memory_space<smem>>) -> (i32, i32) {
    %c0_i32 = arith.constant 0 : i32
    %c0_i32_0 = arith.constant 0 : i32
    %c0_i32_1 = arith.constant 0 : i32
    return %c0_i32, %c0_i32_0 : i32, i32
  }
  func.func @transform_1(%arg0: i32, %arg1: memref<1xi32, #tpu.memory_space<smem>>) -> (i32, i32, i32) {
    %c0_i32 = arith.constant 0 : i32
    %c0_i32_0 = arith.constant 0 : i32
    %c0_i32_1 = arith.constant 0 : i32
    return %arg0, %c0_i32, %c0_i32_0 : i32, i32, i32
  }
  func.func @transform_2(%arg0: i32, %arg1: memref<1xi32, #tpu.memory_space<smem>>) -> (i32, i32) {
    %c0_i32 = arith.constant 0 : i32
    %c0_i32_0 = arith.constant 0 : i32
    %c0_i32_1 = arith.constant 0 : i32
    return %c0_i32, %c0_i32_0 : i32, i32
  }
  func.func @transform_3(%arg0: i32, %arg1: memref<1xi32, #tpu.memory_space<smem>>) -> (i32, i32) {
    %c0_i32 = arith.constant 0 : i32
    %c0_i32_0 = arith.constant 0 : i32
    %c0_i32_1 = arith.constant 0 : i32
    return %c0_i32, %c0_i32_0 : i32, i32
  }
  func.func @transform_4(%arg0: i32, %arg1: memref<1xi32, #tpu.memory_space<smem>>) -> (i32, i32) {
    %c0_i32 = arith.constant 0 : i32
    %c0_i32_0 = arith.constant 0 : i32
    %c0_i32_1 = arith.constant 0 : i32
    return %c0_i32, %c0_i32_0 : i32, i32
  }
  func.func @transform_5(%arg0: i32, %arg1: memref<1xi32, #tpu.memory_space<smem>>) -> (i32, i32) {
    %c0_i32 = arith.constant 0 : i32
    %c0_i32_0 = arith.constant 0 : i32
    %c0_i32_1 = arith.constant 0 : i32
    return %c0_i32, %c0_i32_0 : i32, i32
  }
  func.func @transform_6(%arg0: i32, %arg1: memref<1xi32, #tpu.memory_space<smem>>) -> (i32, i32) {
    %c0_i32 = arith.constant 0 : i32
    %c0_i32_0 = arith.constant 0 : i32
    %c0_i32_1 = arith.constant 0 : i32
    return %c0_i32, %c0_i32_0 : i32, i32
  }
  func.func @transform_7(%arg0: i32, %arg1: memref<1xi32, #tpu.memory_space<smem>>) -> (i32, i32) {
    %c0_i32 = arith.constant 0 : i32
    %c0_i32_0 = arith.constant 0 : i32
    %c0_i32_1 = arith.constant 0 : i32
    return %c0_i32, %c0_i32_0 : i32, i32
  }
  func.func @transform_8(%arg0: i32, %arg1: memref<1xi32, #tpu.memory_space<smem>>) -> (i32, i32) {
    %c0_i32 = arith.constant 0 : i32
    %c0_i32_0 = arith.constant 0 : i32
    %c0_i32_1 = arith.constant 0 : i32
    return %c0_i32, %c0_i32_0 : i32, i32
  }
  func.func @transform_9(%arg0: i32, %arg1: memref<1xi32, #tpu.memory_space<smem>>) -> (i32, i32) {
    %c0_i32 = arith.constant 0 : i32
    %c0_i32_0 = arith.constant 0 : i32
    %c0_i32_1 = arith.constant 0 : i32
    return %c0_i32, %c0_i32_0 : i32, i32
  }
}

</mosaic_0001>

<bundles_post_ra>
// kernel: tpu_custom_call.1
= control target key start
LH: loop header
LB: loop body
LE: loop exit
PB: predicated region body
PF: predicated region fallthrough
CT: control target
= control target key end

     0   :  { %16 = vsyncpa [#allocation8], 0  ;;  %s4037_s0 = inlined_call_operand.<no memory space> [shape: s32[1], index: 0, kind: input, shape index: {}]   ;;  %s4038_s1 = inlined_call_operand.vmem [shape: s32[8,1], index: 1, kind: input, shape index: {}]   ;;  %s4039_s2 = inlined_call_operand.hbm [shape: f32[8,8,16], index: 2, kind: input, shape index: {}]   ;;  %s4040_s3 = inlined_call_operand.hbm [shape: f32[16,512], index: 3, kind: input, shape index: {}]   ;;  %s4041_s4 = inlined_call_operand.hbm [shape: f32[128,512], index: 4, kind: input, shape index: {}]   ;;  %s4042_s5 = inlined_call_operand.vmem [shape: f32[1,512], index: 5, kind: input, shape index: {}]   ;;  %s4043_s6 = inlined_call_operand.hbm [shape: f32[128,128], index: 6, kind: input, shape index: {}]   ;;  %s4044_s7 = inlined_call_operand.vmem [shape: f32[1,128], index: 7, kind: input, shape index: {}]   ;;  %s4045_s8 = inlined_call_operand.hbm [shape: f32[128,128], index: 8, kind: input, shape index: {}]   ;;  %s4046_s9 = inlined_call_operand.vmem [shape: f32[1,128], index: 9, kind: input, shape index: {}]   ;;  %s4047_s10 = inlined_call_operand.hbm [shape: f32[8,128], index: 10, kind: output, shape index: {}]  }
   0x1   :  { %17 = vsyncpa [#allocation11], 0 }
   0x2   :  { %18 = vsyncpa [#allocation14], 0 }
   0x3   :  { %19 = vsyncpa [#allocation9], 0  ;;  %s3722_s13 = smov [#allocation10]   ;;  %s3582_s17 = scalar_lea.hbm %s4040_s3, 1024 }
   0x4   :  { %s39_s14 = sshll.u32 %s3722_s13, 4  ;;  %p3583_p0 = scmp.ne.s32.totalorder %s4040_s3, %s3582_s17  ;;  %s40_s14 = int_to_ptr.vmem [resolvable:$true] %s39_s14 }
   0x5   :  { %p3586_p1 = scmp.lt.u32.totalorder %s3582_s17, %s4040_s3 }
   0x7   :  { %p3588_p2 = pnand %p3586_p1, %p3583_p0 }
   0x9   :  { %3591 = shalt.err (!%p3588_p2)
}
   0xa   :  { %s3592_s22 = scalar_lea.vmem %s40_s14, 1024  ;;  %p3597_p4 = scmp.lt.s32.totalorder %s40_s14, %s40_s14 }
   0xb   :  { %p3593_p3 = scmp.ne.s32.totalorder %s40_s14, %s3592_s22  ;;  %p3598_p5 = scmp.lt.s32.totalorder %s3592_s22, %s3592_s22 }
   0xd   :  { %p3599_p6 = por %p3598_p5, %p3597_p4 }
   0xf   :  { %p3600_p7 = pnand %p3599_p6, %p3593_p3 }
  0x11   :  { %3603 = shalt.err (!%p3600_p7)
}
  0x12   :  { %s3723_s23 = smov 512   ;;  %s3724_s24 = smov 32  }
  0x13   :  { %45 = dma.hbm_to_vmem [thread:$0]  %s4040_s3, 1024, %s40_s14, [#allocation11], %s3723_s23, %s3723_s23, %s3724_s24  }
  0x14   :  { %s3725_s27 = smov [#allocation13]   ;;  %s3726_s29 = smov [#allocation7]  }
  0x15   :  { %s65_s28 = sshll.u32 %s3725_s27, 4  ;;  %s27_s30 = sshll.u32 %s3726_s29, 4  ;;  %s66_s28 = int_to_ptr.vmem [resolvable:$true] %s65_s28  ;;  %s28_s30 = int_to_ptr.vmem [resolvable:$true] %s27_s30 }
  0x16   :  { %s3604_s13 = scalar_lea.hbm %s4043_s6, 2048 }
  0x17   :  { %p3605_p8 = scmp.ne.s32.totalorder %s4043_s6, %s3604_s13  ;;  %p3608_p9 = scmp.lt.u32.totalorder %s3604_s13, %s4043_s6 }
  0x19   :  { %p3610_p10 = pnand %p3608_p9, %p3605_p8 }
  0x1b   :  { %3613 = shalt.err (!%p3610_p10)
}
  0x1c   :  { %s3614_s3 = scalar_lea.vmem %s66_s28, 2048  ;;  %p3619_p12 = scmp.lt.s32.totalorder %s66_s28, %s66_s28 }
  0x1d   :  { %p3615_p11 = scmp.ne.s32.totalorder %s66_s28, %s3614_s3  ;;  %p3620_p13 = scmp.lt.s32.totalorder %s3614_s3, %s3614_s3 }
  0x1f   :  { %p3621_p0 = por %p3620_p13, %p3619_p12 }
  0x21   :  { %p3622_p1 = pnand %p3621_p0, %p3615_p11 }
  0x23   :  { %3625 = shalt.err (!%p3622_p1)
}
  0x24   :  { %s3727_s14 = smov 128   ;;  %s3728_s19 = smov 8  }
  0x25   :  { %71 = dma.hbm_to_vmem [thread:$0]  %s4043_s6, 2048, %s66_s28, [#allocation14], %s3727_s14, %s3727_s14, %s3728_s19  }
  0x26   :  { %s3626_s26 = scalar_lea.hbm %s4039_s2, 1024 }
  0x27   :  { %p3627_p2 = scmp.ne.s32.totalorder %s4039_s2, %s3626_s26  ;;  %p3630_p3 = scmp.lt.u32.totalorder %s3626_s26, %s4039_s2 }
  0x29   :  { %p3632_p4 = pnand %p3630_p3, %p3627_p2 }
  0x2b   :  { %3635 = shalt.err (!%p3632_p4)
}
  0x2c   :  { %s3636_s13 = scalar_lea.vmem %s28_s30, 1024  ;;  %p3641_p6 = scmp.lt.s32.totalorder %s28_s30, %s28_s30 }
  0x2d   :  { %p3637_p5 = scmp.ne.s32.totalorder %s28_s30, %s3636_s13  ;;  %p3642_p7 = scmp.lt.s32.totalorder %s3636_s13, %s3636_s13 }
  0x2f   :  { %p3643_p8 = por %p3642_p7, %p3641_p6 }
  0x31   :  { %p3644_p9 = pnand %p3643_p8, %p3637_p5 }
  0x33   :  { %3647 = shalt.err (!%p3644_p9)
}
  0x34   :  { %33 = dma.hbm_to_vmem [thread:$0]  %s4039_s2, 1024, %s28_s30, [#allocation8], %s3727_s14, %s3727_s14, %s3728_s19  }
  0x35   :  { %s3729_s15 = smov [#allocation12]   ;;  %s3730_s17 = smov [#allocation15]  }
  0x36   :  { %s51_s16 = sshll.u32 %s3729_s15, 4  ;;  %s79_s18 = sshll.u32 %s3730_s17, 4  ;;  %s52_s16 = int_to_ptr.vmem [resolvable:$true] %s51_s16  ;;  %s80_s18 = int_to_ptr.vmem [resolvable:$true] %s79_s18 }
  0x37   :  { %s3648_s21 = scalar_lea.hbm %s4041_s4, 8192 }
  0x38   :  { %p3649_p10 = scmp.ne.s32.totalorder %s4041_s4, %s3648_s21  ;;  %p3652_p11 = scmp.lt.u32.totalorder %s3648_s21, %s4041_s4 }
  0x3a   :  { %p3654_p12 = pnand %p3652_p11, %p3649_p10 }
  0x3c   :  { %3657 = shalt.err (!%p3654_p12)
}
  0x3d   :  { %s3658_s2 = scalar_lea.vmem %s52_s16, 8192  ;;  %p3663_p0 = scmp.lt.s32.totalorder %s52_s16, %s52_s16 }
  0x3e   :  { %p3659_p13 = scmp.ne.s32.totalorder %s52_s16, %s3658_s2  ;;  %p3664_p1 = scmp.lt.s32.totalorder %s3658_s2, %s3658_s2 }
  0x40   :  { %p3665_p2 = por %p3664_p1, %p3663_p0 }
  0x42   :  { %p3666_p3 = pnand %p3665_p2, %p3659_p13 }
  0x44   :  { %3669 = shalt.err (!%p3666_p3)
}
  0x45   :  { %57 = dma.hbm_to_vmem [thread:$0]  %s4041_s4, 8192, %s52_s16, [#allocation11], %s3723_s23, %s3723_s23, %s3724_s24  }
  0x46   :  { %s3670_s13 = scalar_lea.hbm %s4045_s8, 2048 }
  0x47   :  { %p3671_p4 = scmp.ne.s32.totalorder %s4045_s8, %s3670_s13  ;;  %p3674_p5 = scmp.lt.u32.totalorder %s3670_s13, %s4045_s8 }
  0x49   :  { %p3676_p6 = pnand %p3674_p5, %p3671_p4 }
  0x4b   :  { %3679 = shalt.err (!%p3676_p6)
}
  0x4c   :  { %s3680_s3 = scalar_lea.vmem %s80_s18, 2048  ;;  %p3685_p8 = scmp.lt.s32.totalorder %s80_s18, %s80_s18 }
  0x4d   :  { %p3681_p7 = scmp.ne.s32.totalorder %s80_s18, %s3680_s3  ;;  %p3686_p9 = scmp.lt.s32.totalorder %s3680_s3, %s3680_s3 }
  0x4f   :  { %p3687_p10 = por %p3686_p9, %p3685_p8 }
  0x51   :  { %p3688_p11 = pnand %p3687_p10, %p3681_p7 }
  0x53   :  { %3691 = shalt.err (!%p3688_p11)
}
  0x54   :  { %85 = dma.hbm_to_vmem [thread:$0]  %s4045_s8, 2048, %s80_s18, [#allocation14], %s3727_s14, %s3727_s14, %s3728_s19  }
  0x55   :  { %3714 = dma.done.wait [#allocation8], 1024  }
  0x56   :  { %3715 = vsyncadd [#allocation8], 4294966272 }
  0x57   :  { %3716 = dma.done.wait [#allocation11], 9216  }
  0x58   :  { %3717 = vsyncadd [#allocation11], 4294958080 }
  0x59   :  { %3718 = dma.done.wait [#allocation14], 4096  }
  0x5a   :  { %3719 = vsyncadd [#allocation14], 4294963200  ;;  %v3731_v0 = vmov 0.0   ;;  %p2673_p12 = scmp.le.s32.totalorder %s4037_s0, 0 }
  0x5b   :  { %107 = vst [vmem:[#allocation2] sm:$0xff] %v3731_v0  ;;  %108 = vst [vmem:[#allocation3] sm:$0xff] %v3731_v0  ;;  %v124_v1 = vld [vmem:[#allocation10 + $0x8] sm:$0xff] (!%p2673_p12)  ;;  %v126_v3 = vld [vmem:[#allocation10 + $0x18] sm:$0xff] (!%p2673_p12)  ;;  %v3732_v8 = vmov (!%p2673_p12), 0.0   ;;  %v3733_v14 = vmov (!%p2673_p12), 0  }
  0x5c   :  { %114 = sbr.rel (%p2673_p12) target bundleno = 2461 (0x99d), region = 65  ;;  %v128_v2 = vld [vmem:[#allocation10 + $0x28] sm:$0xff] (!%p2673_p12)  ;;  %v130_v5 = vld [vmem:[#allocation10 + $0x38] sm:$0xff] (!%p2673_p12)  ;;  %v123_v6 = vld [vmem:[#allocation10] sm:$0xff] (!%p2673_p12)  ;;  %242 = vmatprep.mubr.f32.mxu0 (!%p2673_p12), %v3732_v8  ;;  %355 = vmatprep.mubr.f32.mxu1 (!%p2673_p12), %v3732_v8  ;;  %vm153_vm0 = vcmask (!%p2673_p12), 130048   ;;  %p2695_p13 = scmp.le.s32.totalorder (!%p2673_p12), %s4037_s0, 1 }
  0x5d   :  { %v2843_v4 = vpack.c.bf16 (!%p2673_p12), %v128_v2, %v124_v1  ;;  %v127_v7 = vld [vmem:[#allocation10 + $0x20] sm:$0xff] (!%p2673_p12)  ;;  %v2847_v9 = vpack.c.bf16 (!%p2673_p12), %v130_v5, %v126_v3  ;;  %v125_v11 = vld [vmem:[#allocation10 + $0x10] sm:$0xff] (!%p2673_p12)  ;;  %3449 = vset.pattern.permute.xlu0 (!%p2673_p12), %v3733_v14  ;;  %v446_v16 = vld [vmem:[#allocation12 + $0x8] sm:$0xff] (!%p2673_p12) }
  0x5e   :  { %v2845_v10 = vpack.c.bf16 (!%p2673_p12), %v127_v7, %v123_v6  ;;  %v129_v12 = vld [vmem:[#allocation10 + $0x30] sm:$0xff] (!%p2673_p12)  ;;  %v115_v13 = vld [vmem:[#allocation7] sm:$0xff] (!%p2673_p12)  ;;  %v450_v17 = vld [vmem:[#allocation12 + $0x28] sm:$0xff] (!%p2673_p12)  ;;  %v133_v7 = vlaneseq (!%p2673_p12) }
  0x5f   :  { %2844 = vmatprep.subr.bf16.mxu0 (!%p2673_p12), %v2843_v4  ;;  %v2849_v15 = vpack.c.bf16 (!%p2673_p12), %v129_v12, %v125_v11  ;;  %v448_v18 = vld [vmem:[#allocation12 + $0x18] sm:$0xff] (!%p2673_p12)  ;;  %2848 = vmatprep.subr.bf16.mxu1 (!%p2673_p12), %v2847_v9  ;;  %v2851_v19 = vpack.c.bf16 (!%p2673_p12), %v450_v17, %v446_v16  ;;  %v445_v21 = vld [vmem:[#allocation12] sm:$0xff] (!%p2673_p12)  ;;  %v447_v25 = vld [vmem:[#allocation12 + $0x10] sm:$0xff] (!%p2673_p12) }
  0x60   :  { %2846 = vmatpush1.bf16.msra.mxu0 (!%p2673_p12), %v2845_v10  ;;  %v452_v20 = vld [vmem:[#allocation12 + $0x38] sm:$0xff] (!%p2673_p12)  ;;  %v449_v22 = vld [vmem:[#allocation12 + $0x20] sm:$0xff] (!%p2673_p12)  ;;  %v451_v26 = vld [vmem:[#allocation12 + $0x30] sm:$0xff] (!%p2673_p12) }
  0x61   :  { %2850 = vmatpush1.bf16.msra.mxu1 (!%p2673_p12), %v2849_v15  ;;  %v2883_v23 = vpack.c.bf16 (!%p2673_p12), %v452_v20, %v448_v18  ;;  %v2853_v24 = vpack.c.bf16 (!%p2673_p12), %v449_v22, %v445_v21  ;;  %2852 = vmatprep.subr.bf16.mxu0 (!%p2673_p12), %v2851_v19  ;;  %v2885_v27 = vpack.c.bf16 (!%p2673_p12), %v451_v26, %v447_v25  ;;  %v454_v28 = vld [vmem:[#allocation12 + $0x48] sm:$0xff] (!%p2673_p12)  ;;  %v456_v30 = vld [vmem:[#allocation12 + $0x58] sm:$0xff] (!%p2673_p12)  ;;  %v453_v33 = vld [vmem:[#allocation12 + $0x40] sm:$0xff] (!%p2673_p12)  ;;  %v3895_v22 = vshrl.u32 (!%p2673_p12), %v133_v7, 7 }
  0x62   :  { %v458_v29 = vld [vmem:[#allocation12 + $0x68] sm:$0xff] (!%p2673_p12)  ;;  %v460_v32 = vld [vmem:[#allocation12 + $0x78] sm:$0xff] (!%p2673_p12)  ;;  %v457_v34 = vld [vmem:[#allocation12 + $0x60] sm:$0xff] (!%p2673_p12) }
  0x63   :  { %2674 = vmatmul.mubr.msk.f32.vlgmr.msra.gmra.mrb[0].mxu0 %vm153_vm0, %v115_v13  ;;  %2884 = vmatprep.subr.bf16.mxu1 %v2883_v23  ;;  %v2855_v31 = vpack.c.bf16 %v458_v29, %v454_v28  ;;  %v116_v35 = vld [vmem:[#allocation7 + $0x8] sm:$0xff]  ;;  %v2887_v36 = vpack.c.bf16 %v460_v32, %v456_v30  ;;  %v2857_v37 = vpack.c.bf16 %v457_v34, %v453_v33  ;;  %v455_v38 = vld [vmem:[#allocation12 + $0x50] sm:$0xff]  ;;  %v464_v43 = vld [vmem:[#allocation12 + $0x98] sm:$0xff] }
  0x64   :  { %2682 = vmatmul.mubr.msk.f32.vlgmr.msra.gmra.mrb[0].mxu1 %vm153_vm0, %v115_v13  ;;  %2854 = vmatpush1.bf16.msra.mxu0 %v2853_v24  ;;  %v459_v39 = vld [vmem:[#allocation12 + $0x70] sm:$0xff]  ;;  %v462_v41 = vld [vmem:[#allocation12 + $0x88] sm:$0xff]  ;;  %v468_v45 = vld [vmem:[#allocation12 + $0xb8] sm:$0xff] }
  0x65   :  { %2886 = vmatpush1.bf16.msra.mxu1 %v2885_v27  ;;  %248 = vmatprep.mubr.f32.mxu0 %v3732_v8  ;;  %v2889_v40 = vpack.c.bf16 %v459_v39, %v455_v38  ;;  %v466_v42 = vld [vmem:[#allocation12 + $0xa8] sm:$0xff]  ;;  %v461_v46 = vld [vmem:[#allocation12 + $0x80] sm:$0xff]  ;;  %v117_v48 = vld [vmem:[#allocation7 + $0x10] sm:$0xff]  ;;  %v2891_v49 = vpack.c.bf16 %v468_v45, %v464_v43 }
  0x66   :  { %361 = vmatprep.mubr.f32.mxu1 %v3732_v8  ;;  %2856 = vmatprep.subr.bf16.mxu0 %v2855_v31  ;;  %v2859_v44 = vpack.c.bf16 %v466_v42, %v462_v41  ;;  %v465_v47 = vld [vmem:[#allocation12 + $0xa0] sm:$0xff]  ;;  %v463_v50 = vld [vmem:[#allocation12 + $0x90] sm:$0xff]  ;;  %v470_v53 = vld [vmem:[#allocation12 + $0xc8] sm:$0xff] }
  0x67   :  { %2675 = vmatmul.mubr.msk.f32.gmra.mrb[2].mxu0 %vm153_vm0, %v116_v35  ;;  %2888 = vmatprep.subr.bf16.mxu1 %v2887_v36  ;;  %v467_v51 = vld [vmem:[#allocation12 + $0xb0] sm:$0xff]  ;;  %v2861_v52 = vpack.c.bf16 %v465_v47, %v461_v46  ;;  %v474_v54 = vld [vmem:[#allocation12 + $0xe8] sm:$0xff]  ;;  %v472_v55 = vld [vmem:[#allocation12 + $0xd8] sm:$0xff]  ;;  %v135_v36 = vsub.s32 0, %v3895_v22 }
  0x68   :  { %2683 = vmatmul.mubr.msk.f32.gmra.mrb[2].mxu1 %vm153_vm0, %v116_v35  ;;  %2858 = vmatpush1.bf16.msra.mxu0 %v2857_v37  ;;  %v2893_v56 = vpack.c.bf16 %v467_v51, %v463_v50  ;;  %v476_v57 = vld [vmem:[#allocation12 + $0xf8] sm:$0xff]  ;;  %v469_v58 = vld [vmem:[#allocation12 + $0xc0] sm:$0xff]  ;;  %v2863_v60 = vpack.c.bf16 %v474_v54, %v470_v53  ;;  %v471_v61 = vld [vmem:[#allocation12 + $0xd0] sm:$0xff] }
  0x69   :  { %2890 = vmatpush1.bf16.msra.mxu1 %v2889_v40  ;;  %254 = vmatprep.mubr.f32.mxu0 %v3732_v8  ;;  %v473_v59 = vld [vmem:[#allocation12 + $0xe0] sm:$0xff]  ;;  %v475_v62 = vld [vmem:[#allocation12 + $0xf0] sm:$0xff]  ;;  %v2895_v63 = vpack.c.bf16 %v476_v57, %v472_v55  ;;  %v478_v1 = vld [vmem:[#allocation12 + $0x108] sm:$0xff] }
  0x6a   :  { %367 = vmatprep.mubr.f32.mxu1 %v3732_v8  ;;  %2860 = vmatprep.subr.bf16.mxu0 %v2859_v44  ;;  %v482_v2 = vld [vmem:[#allocation12 + $0x128] sm:$0xff]  ;;  %v118_v3 = vld [vmem:[#allocation7 + $0x18] sm:$0xff]  ;;  %v2865_v4 = vpack.c.bf16 %v473_v59, %v469_v58  ;;  %v2897_v9 = vpack.c.bf16 %v475_v62, %v471_v61  ;;  %v477_v10 = vld [vmem:[#allocation12 + $0x100] sm:$0xff] }
  0x6b   :  { %2676 = vmatmul.mubr.msk.f32.gmra.mrb[4].mxu0 %vm153_vm0, %v117_v48  ;;  %2892 = vmatprep.subr.bf16.mxu1 %v2891_v49  ;;  %v480_v5 = vld [vmem:[#allocation12 + $0x118] sm:$0xff]  ;;  %v481_v11 = vld [vmem:[#allocation12 + $0x120] sm:$0xff]  ;;  %v2867_v12 = vpack.c.bf16 %v482_v2, %v478_v1  ;;  %v479_v13 = vld [vmem:[#allocation12 + $0x110] sm:$0xff]  ;;  %v139_v1 = vsub.s32 1, %v3895_v22 }
  0x6c   :  { %2684 = vmatmul.mubr.msk.f32.gmra.mrb[4].mxu1 %vm153_vm0, %v117_v48  ;;  %2862 = vmatpush1.bf16.msra.mxu0 %v2861_v52  ;;  %v484_v6 = vld [vmem:[#allocation12 + $0x138] sm:$0xff]  ;;  %v483_v14 = vld [vmem:[#allocation12 + $0x130] sm:$0xff]  ;;  %v486_v16 = vld [vmem:[#allocation12 + $0x148] sm:$0xff]  ;;  %v2869_v19 = vpack.c.bf16 %v481_v11, %v477_v10 }
  0x6d   :  { %2894 = vmatpush1.bf16.msra.mxu1 %v2893_v56  ;;  %260 = vmatprep.mubr.f32.mxu0 %v3732_v8  ;;  %v2899_v15 = vpack.c.bf16 %v484_v6, %v480_v5  ;;  %v490_v17 = vld [vmem:[#allocation12 + $0x168] sm:$0xff]  ;;  %v119_v18 = vld [vmem:[#allocation7 + $0x20] sm:$0xff]  ;;  %v488_v20 = vld [vmem:[#allocation12 + $0x158] sm:$0xff]  ;;  %v2901_v23 = vpack.c.bf16 %v483_v14, %v479_v13 }
  0x6e   :  { %373 = vmatprep.mubr.f32.mxu1 %v3732_v8  ;;  %2864 = vmatprep.subr.bf16.mxu0 %v2863_v60  ;;  %v492_v21 = vld [vmem:[#allocation12 + $0x178] sm:$0xff]  ;;  %v485_v24 = vld [vmem:[#allocation12 + $0x140] sm:$0xff]  ;;  %v2871_v26 = vpack.c.bf16 %v490_v17, %v486_v16  ;;  %v487_v27 = vld [vmem:[#allocation12 + $0x150] sm:$0xff] }
  0x6f   :  { %2677 = vmatmul.mubr.msk.f32.gmra.mrb[6].mxu0 %vm153_vm0, %v118_v3  ;;  %2896 = vmatprep.subr.bf16.mxu1 %v2895_v63  ;;  %v489_v25 = vld [vmem:[#allocation12 + $0x160] sm:$0xff]  ;;  %v491_v28 = vld [vmem:[#allocation12 + $0x170] sm:$0xff]  ;;  %v2903_v29 = vpack.c.bf16 %v492_v21, %v488_v20  ;;  %v494_v30 = vld [vmem:[#allocation12 + $0x188] sm:$0xff] }
  0x70   :  { %2685 = vmatmul.mubr.msk.f32.gmra.mrb[6].mxu1 %vm153_vm0, %v118_v3  ;;  %2866 = vmatpush1.bf16.msra.mxu0 %v2865_v4  ;;  %v498_v31 = vld [vmem:[#allocation12 + $0x1a8] sm:$0xff]  ;;  %v2873_v33 = vpack.c.bf16 %v489_v25, %v485_v24  ;;  %v496_v34 = vld [vmem:[#allocation12 + $0x198] sm:$0xff]  ;;  %v2905_v37 = vpack.c.bf16 %v491_v28, %v487_v27  ;;  %v493_v38 = vld [vmem:[#allocation12 + $0x180] sm:$0xff]  ;;  %v143_v3 = vsub.s32 2, %v3895_v22  ;;  %v147_v4 = vsub.s32 3, %v3895_v22 }
  0x71   :  { %2898 = vmatpush1.bf16.msra.mxu1 %v2897_v9  ;;  %266 = vmatprep.mubr.f32.mxu0 %v3732_v8  ;;  %v120_v32 = vld [vmem:[#allocation7 + $0x28] sm:$0xff]  ;;  %v500_v35 = vld [vmem:[#allocation12 + $0x1b8] sm:$0xff]  ;;  %v497_v39 = vld [vmem:[#allocation12 + $0x1a0] sm:$0xff]  ;;  %v2875_v40 = vpack.c.bf16 %v498_v31, %v494_v30 }
  0x72   :  { %379 = vmatprep.mubr.f32.mxu1 %v3732_v8  ;;  %2868 = vmatprep.subr.bf16.mxu0 %v2867_v12  ;;  %v495_v41 = vld [vmem:[#allocation12 + $0x190] sm:$0xff]  ;;  %v2907_v43 = vpack.c.bf16 %v500_v35, %v496_v34  ;;  %v502_v44 = vld [vmem:[#allocation12 + $0x1c8] sm:$0xff]  ;;  %v2877_v48 = vpack.c.bf16 %v497_v39, %v493_v38  ;;  %v504_v49 = vld [vmem:[#allocation12 + $0x1d8] sm:$0xff] }
  0x73   :  { %2678 = vmatmul.mubr.msk.f32.gmra.mrb[8].mxu0 %vm153_vm0, %v119_v18  ;;  %2900 = vmatprep.subr.bf16.mxu1 %v2899_v15  ;;  %v499_v42 = vld [vmem:[#allocation12 + $0x1b0] sm:$0xff]  ;;  %v506_v45 = vld [vmem:[#allocation12 + $0x1e8] sm:$0xff]  ;;  %v508_v50 = vld [vmem:[#allocation12 + $0x1f8] sm:$0xff] }
  0x74   :  { %2686 = vmatmul.mubr.msk.f32.gmra.mrb[8].mxu1 %vm153_vm0, %v119_v18  ;;  %2870 = vmatpush1.bf16.msra.mxu0 %v2869_v19  ;;  %v131_v46 = vld [vmem:[%s4042_s5] sm:$0xf]  ;;  %v2909_v52 = vpack.c.bf16 %v499_v42, %v495_v41  ;;  %v501_v53 = vld [vmem:[#allocation12 + $0x1c0] sm:$0xff]  ;;  %v2879_v55 = vpack.c.bf16 %v506_v45, %v502_v44  ;;  %v2911_v58 = vpack.c.bf16 %v508_v50, %v504_v49  ;;  %v122_v59 = vld [vmem:[#allocation7 + $0x38] sm:$0xff] }
  0x75   :  { %2902 = vmatpush1.bf16.msra.mxu1 %v2901_v23  ;;  %272 = vmatprep.mubr.f32.mxu0 %v3732_v8  ;;  %v121_v47 = vld [vmem:[#allocation7 + $0x30] sm:$0xff]  ;;  %v3909_v51 = vrot.slane %v131_v46, %v135_v36  ;;  %v505_v54 = vld [vmem:[#allocation12 + $0x1e0] sm:$0xff]  ;;  %v3929_v2 = vrot.slane %v131_v46, %v139_v1  ;;  %v3933_v5 = vrot.slane %v131_v46, %v143_v3 }
  0x76   :  { %385 = vmatprep.mubr.f32.mxu1 %v3732_v8  ;;  %2872 = vmatprep.subr.bf16.mxu0 %v2871_v26  ;;  %v503_v56 = vld [vmem:[#allocation12 + $0x1d0] sm:$0xff]  ;;  %v2881_v60 = vpack.c.bf16 %v505_v54, %v501_v53  ;;  %v3935_v6 = vrot.slane %v131_v46, %v147_v4 }
  0x77   :  { %2679 = vmatmul.mubr.msk.f32.gmra.mrb[10].mxu0 %vm153_vm0, %v120_v32  ;;  %2904 = vmatprep.subr.bf16.mxu1 %v2903_v29  ;;  %v507_v57 = vld [vmem:[#allocation12 + $0x1f0] sm:$0xff] }
  0x78   :  { %2687 = vmatmul.mubr.msk.f32.gmra.mrb[10].mxu1 %vm153_vm0, %v120_v32  ;;  %2874 = vmatpush1.bf16.msra.mxu0 %v2873_v33  ;;  %v2913_v61 = vpack.c.bf16 %v507_v57, %v503_v56  ;;  %v436_v62 = vld [vmem:[%s4038_s1] sm:$0xff] }
  0x79   :  { %2906 = vmatpush1.bf16.msra.mxu1 %v2905_v37  ;;  %278 = vmatprep.mubr.f32.mxu0 %v3732_v8  ;;  %v3922_v63 = vld [vmem:[#allocation2] sm:$0xff] }
  0x7a   :  { %391 = vmatprep.mubr.f32.mxu1 %v3732_v8  ;;  %2876 = vmatprep.subr.bf16.mxu0 %v2875_v40 }
  0x7b   :  { %2680 = vmatmul.mubr.msk.f32.gmra.mrb[12].mxu0 %vm153_vm0, %v121_v47  ;;  %2908 = vmatprep.subr.bf16.mxu1 %v2907_v43 }
  0x7c   :  { %2688 = vmatmul.mubr.msk.f32.gmra.mrb[12].mxu1 %vm153_vm0, %v121_v47  ;;  %2878 = vmatpush1.bf16.msra.mxu0 %v2877_v48 }
  0x7d   :  { %2910 = vmatpush1.bf16.msra.mxu1 %v2909_v52  ;;  %284 = vmatprep.mubr.f32.mxu0 %v3732_v8 }
  0x7e   :  { %397 = vmatprep.mubr.f32.mxu1 %v3732_v8  ;;  %2880 = vmatprep.subr.bf16.mxu0 %v2879_v55 }
  0x7f   :  { %2681 = vmatmul.mubr.msk.f32.gmra.mrb[14].mxu0 %vm153_vm0, %v122_v59  ;;  %2912 = vmatprep.subr.bf16.mxu1 %v2911_v58 }
  0x80   :  { %2689 = vmatmul.mubr.msk.f32.gmra.mrb[14].mxu1 %vm153_vm0, %v122_v59  ;;  %2882 = vmatpush1.bf16.msra.mxu0 %v2881_v60 }
  0x81   :  { %2914 = vmatpush1.bf16.msra.mxu1 %v2913_v61  ;;  %573 = vmatprep.mubr.f32.mxu0 %v3732_v8 }
  0x82   :  { %644 = vmatprep.mubr.f32.mxu1 %v3732_v8  ;;  %438 = vperm.xlu0 %3449, %v436_v62  }
  0x83   :  { %574 = vmatmul.mubr.f32.vlgmr.msra.gmra.mrb[0].mxu0 %v3922_v63 }
  0x84   :  { %645 = vmatmul.mubr.f32.vlgmr.msra.gmra.mrb[0].mxu1 %v3922_v63 }
 0x13a   :  { %v250_v7 = vpop.f32.mrb[2].mxu0 }
 0x13b   :  { %v251_v8 = vadd.f32 %v250_v7, %v3909_v51  ;;  %v252_v9 = vpop.f32.mrb[3].mxu0  ;;  %v363_v10 = vpop.f32.mrb[2].mxu1 }
 0x13c   :  { %v253_v11 = vadd.f32 %v252_v9, %v3929_v2  ;;  %v364_v12 = vadd.f32 %v363_v10, %v3933_v5  ;;  %v365_v13 = vpop.f32.mrb[3].mxu1 }
 0x13d   :  { %408 = vst [vmem:[#allocation4 + $0x20] sm:$0xff] %v251_v8  ;;  %v366_v14 = vadd.f32 %v365_v13, %v3935_v6 }
 0x13e   :  { %409 = vst [vmem:[#allocation4 + $0x28] sm:$0xff] %v253_v11  ;;  %v256_v15 = vpop.f32.mrb[4].mxu0  ;;  %410 = vst [vmem:[#allocation4 + $0x30] sm:$0xff] %v364_v12 }
 0x13f   :  { %v257_v16 = vadd.f32 %v256_v15, %v3909_v51  ;;  %v258_v17 = vpop.f32.mrb[5].mxu0  ;;  %411 = vst [vmem:[#allocation4 + $0x38] sm:$0xff] %v366_v14  ;;  %v369_v18 = vpop.f32.mrb[4].mxu1 }
 0x140   :  { %v259_v19 = vadd.f32 %v258_v17, %v3929_v2  ;;  %v370_v20 = vadd.f32 %v369_v18, %v3933_v5  ;;  %v371_v21 = vpop.f32.mrb[5].mxu1 }
 0x141   :  { %412 = vst [vmem:[#allocation4 + $0x40] sm:$0xff] %v257_v16  ;;  %v372_v22 = vadd.f32 %v371_v21, %v3935_v6 }
 0x142   :  { %413 = vst [vmem:[#allocation4 + $0x48] sm:$0xff] %v259_v19  ;;  %v262_v23 = vpop.f32.mrb[6].mxu0  ;;  %414 = vst [vmem:[#allocation4 + $0x50] sm:$0xff] %v370_v20  ;;  %v674_v20 = vld [vmem:[#allocation3] sm:$0xff] }
 0x143   :  { %v263_v24 = vadd.f32 %v262_v23, %v3909_v51  ;;  %v264_v25 = vpop.f32.mrb[7].mxu0  ;;  %415 = vst [vmem:[#allocation4 + $0x58] sm:$0xff] %v372_v22  ;;  %v375_v26 = vpop.f32.mrb[6].mxu1 }
 0x144   :  { %v265_v27 = vadd.f32 %v264_v25, %v3929_v2  ;;  %v376_v28 = vadd.f32 %v375_v26, %v3933_v5  ;;  %v377_v29 = vpop.f32.mrb[7].mxu1  ;;  %v3969_v22 = vpop.permute.xlu0 %438 }
 0x145   :  { %416 = vst [vmem:[#allocation4 + $0x60] sm:$0xff] %v263_v24  ;;  %v378_v30 = vadd.f32 %v377_v29, %v3935_v6  ;;  %vm2693_vm1 = vcmp.gt.s32.totalorder %v3969_v22, 0  ;;  %vm2699_vm2 = vcmp.gt.s32.totalorder (!%p2695_p13), %v3969_v22, 1 }
 0x146   :  { %417 = vst [vmem:[#allocation4 + $0x68] sm:$0xff] %v265_v27  ;;  %v268_v31 = vpop.f32.mrb[8].mxu0  ;;  %418 = vst [vmem:[#allocation4 + $0x70] sm:$0xff] %v376_v28 }
 0x147   :  { %v269_v32 = vadd.f32 %v268_v31, %v3909_v51  ;;  %v270_v33 = vpop.f32.mrb[9].mxu0  ;;  %419 = vst [vmem:[#allocation4 + $0x78] sm:$0xff] %v378_v30  ;;  %v381_v34 = vpop.f32.mrb[8].mxu1  ;;  %v699_v31 = vld [vmem:[#allocation12 + $0x8] sm:$0xff] (!%p2695_p13) }
 0x148   :  { %v271_v35 = vadd.f32 %v270_v33, %v3929_v2  ;;  %v382_v36 = vadd.f32 %v381_v34, %v3933_v5  ;;  %v383_v37 = vpop.f32.mrb[9].mxu1  ;;  %v698_v33 = vld [vmem:[#allocation12] sm:$0xff] (!%p2695_p13) }
 0x149   :  { %420 = vst [vmem:[#allocation4 + $0x80] sm:$0xff] %v269_v32  ;;  %v384_v38 = vadd.f32 %v383_v37, %v3935_v6  ;;  %v703_v32 = vld [vmem:[#allocation12 + $0x28] sm:$0xff] (!%p2695_p13) }
 0x14a   :  { %421 = vst [vmem:[#allocation4 + $0x88] sm:$0xff] %v271_v35  ;;  %v274_v39 = vpop.f32.mrb[10].mxu0  ;;  %422 = vst [vmem:[#allocation4 + $0x90] sm:$0xff] %v382_v36  ;;  %v2915_v34 = vpack.c.bf16 (!%p2695_p13), %v703_v32, %v699_v31  ;;  %v702_v35 = vld [vmem:[#allocation12 + $0x20] sm:$0xff] (!%p2695_p13)  ;;  %v707_v36 = vld [vmem:[#allocation12 + $0x48] sm:$0xff] (!%p2695_p13) }
 0x14b   :  { %v275_v40 = vadd.f32 %v274_v39, %v3909_v51  ;;  %v276_v41 = vpop.f32.mrb[11].mxu0  ;;  %423 = vst [vmem:[#allocation4 + $0x98] sm:$0xff] %v384_v38  ;;  %v387_v42 = vpop.f32.mrb[10].mxu1  ;;  %v711_v37 = vld [vmem:[#allocation12 + $0x68] sm:$0xff] (!%p2695_p13)  ;;  %v3734_v38 = vmov (!%p2695_p13), 0.0   ;;  %v2917_v39 = vpack.c.bf16 (!%p2695_p13), %v702_v35, %v698_v33  ;;  %v736_v35 = vld [vmem:[#allocation12 + $0x130] sm:$0xff] (!%p2695_p13) }
 0x14c   :  { %v277_v43 = vadd.f32 %v276_v41, %v3929_v2  ;;  %v388_v44 = vadd.f32 %v387_v42, %v3933_v5  ;;  %v389_v45 = vpop.f32.mrb[11].mxu1  ;;  %826 = vmatprep.mubr.f32.mxu0 (!%p2695_p13), %v3734_v38  ;;  %897 = vmatprep.mubr.f32.mxu1 (!%p2695_p13), %v3734_v38  ;;  %v706_v41 = vld [vmem:[#allocation12 + $0x40] sm:$0xff] (!%p2695_p13)  ;;  %v715_v42 = vld [vmem:[#allocation12 + $0x88] sm:$0xff] (!%p2695_p13) }
 0x14d   :  { %424 = vst [vmem:[#allocation4 + $0xa0] sm:$0xff] %v275_v40  ;;  %v390_v46 = vadd.f32 %v389_v45, %v3935_v6  ;;  %v2919_v40 = vpack.c.bf16 (!%p2695_p13), %v711_v37, %v707_v36  ;;  %2916 = vmatprep.subr.bf16.mxu0 (!%p2695_p13), %v2915_v34  ;;  %v714_v45 = vld [vmem:[#allocation12 + $0x80] sm:$0xff] (!%p2695_p13)  ;;  %v751_v32 = vld [vmem:[#allocation12 + $0x1a8] sm:$0xff] (!%p2695_p13)  ;;  %v732_v34 = vld [vmem:[#allocation12 + $0x110] sm:$0xff] (!%p2695_p13) }
 0x14e   :  { %425 = vst [vmem:[#allocation4 + $0xa8] sm:$0xff] %v277_v43  ;;  %v280_v47 = vpop.f32.mrb[12].mxu0  ;;  %426 = vst [vmem:[#allocation4 + $0xb0] sm:$0xff] %v388_v44  ;;  %v719_v43 = vld [vmem:[#allocation12 + $0xa8] sm:$0xff] (!%p2695_p13)  ;;  %2918 = vmatpush1.bf16.msra.mxu0 (!%p2695_p13), %v2917_v39  ;;  %v741_v36 = vld [vmem:[#allocation12 + $0x158] sm:$0xff] (!%p2695_p13) }
 0x14f   :  { %v281_v48 = vadd.f32 %v280_v47, %v3909_v51  ;;  %v282_v49 = vpop.f32.mrb[13].mxu0  ;;  %427 = vst [vmem:[#allocation4 + $0xb8] sm:$0xff] %v390_v46  ;;  %v393_v50 = vpop.f32.mrb[12].mxu1  ;;  %v718_v46 = vld [vmem:[#allocation12 + $0xa0] sm:$0xff] (!%p2695_p13)  ;;  %2920 = vmatprep.subr.bf16.mxu0 (!%p2695_p13), %v2919_v40  ;;  %v2923_v47 = vpack.c.bf16 (!%p2695_p13), %v719_v43, %v715_v42  ;;  %v745_v37 = vld [vmem:[#allocation12 + $0x178] sm:$0xff] (!%p2695_p13)  ;;  %v2965_v42 = vpack.c.bf16 (!%p2695_p13), %v736_v35, %v732_v34  ;;  %v759_v43 = vld [vmem:[#allocation12 + $0x1e8] sm:$0xff] (!%p2695_p13) }
 0x150   :  { %v283_v52 = vadd.f32 %v282_v49, %v3929_v2  ;;  %v394_v53 = vadd.f32 %v393_v50, %v3933_v5  ;;  %v395_v54 = vpop.f32.mrb[13].mxu1  ;;  %v701_v49 = vld [vmem:[#allocation12 + $0x18] sm:$0xff] (!%p2695_p13)  ;;  %v746_v40 = vld [vmem:[#allocation12 + $0x180] sm:$0xff] (!%p2695_p13) }
 0x151   :  { %428 = vst [vmem:[#allocation4 + $0xc0] sm:$0xff] %v281_v48  ;;  %v396_v55 = vadd.f32 %v395_v54, %v3935_v6  ;;  %v723_v48 = vld [vmem:[#allocation12 + $0xc8] sm:$0xff] (!%p2695_p13)  ;;  %v705_v50 = vld [vmem:[#allocation12 + $0x38] sm:$0xff] (!%p2695_p13)  ;;  %v700_v54 = vld [vmem:[#allocation12 + $0x10] sm:$0xff] (!%p2695_p13) }
 0x152   :  { %429 = vst [vmem:[#allocation4 + $0xc8] sm:$0xff] %v283_v52  ;;  %v286_v56 = vpop.f32.mrb[14].mxu0  ;;  %430 = vst [vmem:[#allocation4 + $0xd0] sm:$0xff] %v394_v53  ;;  %v727_v52 = vld [vmem:[#allocation12 + $0xe8] sm:$0xff] (!%p2695_p13)  ;;  %v2947_v53 = vpack.c.bf16 (!%p2695_p13), %v705_v50, %v701_v49 }
 0x153   :  { %v287_v57 = vadd.f32 %v286_v56, %v3909_v51  ;;  %v288_v58 = vpop.f32.mrb[15].mxu0  ;;  %431 = vst [vmem:[#allocation4 + $0xd8] sm:$0xff] %v396_v55  ;;  %v399_v59 = vpop.f32.mrb[14].mxu1  ;;  %v704_v55 = vld [vmem:[#allocation12 + $0x30] sm:$0xff] (!%p2695_p13) }
 0x154   :  { %v289_v60 = vadd.f32 %v288_v58, %v3929_v2  ;;  %v400_v61 = vadd.f32 %v399_v59, %v3933_v5  ;;  %v401_v62 = vpop.f32.mrb[15].mxu1  ;;  %v2949_v56 = vpack.c.bf16 (!%p2695_p13), %v704_v55, %v700_v54  ;;  %2948 = vmatprep.subr.bf16.mxu1 (!%p2695_p13), %v2947_v53  ;;  %v709_v58 = vld [vmem:[#allocation12 + $0x58] sm:$0xff] (!%p2695_p13)  ;;  %v758_v53 = vld [vmem:[#allocation12 + $0x1e0] sm:$0xff] (!%p2695_p13) }
 0x155   :  { %432 = vst [vmem:[#allocation4 + $0xe0] sm:$0xff] %v287_v57  ;;  %v402_v1 = vadd.f32 %v401_v62, %v3935_v6  ;;  %v2925_v57 = vpack.c.bf16 (!%p2695_p13), %v718_v46, %v714_v45  ;;  %v713_v59 = vld [vmem:[#allocation12 + $0x78] sm:$0xff] (!%p2695_p13)  ;;  %v722_v62 = vld [vmem:[#allocation12 + $0xc0] sm:$0xff] (!%p2695_p13)  ;;  %v740_v45 = vld [vmem:[#allocation12 + $0x150] sm:$0xff] (!%p2695_p13) }
 0x156   :  { %433 = vst [vmem:[#allocation4 + $0xe8] sm:$0xff] %v289_v60  ;;  %434 = vst [vmem:[#allocation4 + $0xf0] sm:$0xff] %v400_v61  ;;  %v575_v3 = vpop.f32.mrb[0].mxu0  ;;  %v708_v60 = vld [vmem:[#allocation12 + $0x50] sm:$0xff] (!%p2695_p13)  ;;  %v2927_v61 = vpack.c.bf16 (!%p2695_p13), %v727_v52, %v723_v48  ;;  %2950 = vmatpush1.bf16.msra.mxu1 (!%p2695_p13), %v2949_v56  ;;  %v753_v48 = vld [vmem:[#allocation12 + $0x1b8] sm:$0xff] (!%p2695_p13) }
 0x157   :  { %435 = vst [vmem:[#allocation4 + $0xf8] sm:$0xff] %v402_v1  ;;  %v3413_v4 = vadd.f32 %v575_v3, %v3909_v51  ;;  %v646_v7 = vpop.f32.mrb[0].mxu1  ;;  %v577_v8 = vpop.f32.mrb[1].mxu0  ;;  %v726_v1 = vld [vmem:[#allocation12 + $0xe0] sm:$0xff] (!%p2695_p13)  ;;  %v2951_v3 = vpack.c.bf16 (!%p2695_p13), %v713_v59, %v709_v58  ;;  %v744_v46 = vld [vmem:[#allocation12 + $0x170] sm:$0xff] (!%p2695_p13)  ;;  %v757_v58 = vld [vmem:[#allocation12 + $0x1d8] sm:$0xff] (!%p2695_p13) }
 0x158   :  { %v3416_v9 = vadd.f32 %v577_v8, %v3929_v2  ;;  %v648_v10 = vpop.f32.mrb[1].mxu1  ;;  %v3419_v15 = vadd.f32 %v646_v7, %v3933_v5  ;;  %v731_v7 = vld [vmem:[#allocation12 + $0x108] sm:$0xff] (!%p2695_p13)  ;;  %v754_v52 = vld [vmem:[#allocation12 + $0x1c0] sm:$0xff] (!%p2695_p13)  ;;  %v2969_v54 = vpack.c.bf16 (!%p2695_p13), %v744_v46, %v740_v45  ;;  %v748_v56 = vld [vmem:[#allocation12 + $0x190] sm:$0xff] (!%p2695_p13) }
 0x159   :  { %v2690_v11 = vmul.f32 -1.442695, %v3413_v4  ;;  %v3422_v13 = vadd.f32 %v648_v10, %v3935_v6  ;;  %v712_v4 = vld [vmem:[#allocation12 + $0x70] sm:$0xff] (!%p2695_p13)  ;;  %v735_v8 = vld [vmem:[#allocation12 + $0x128] sm:$0xff] (!%p2695_p13)  ;;  %v717_v10 = vld [vmem:[#allocation12 + $0x98] sm:$0xff] (!%p2695_p13)  ;;  %2952 = vmatprep.subr.bf16.mxu1 (!%p2695_p13), %v2951_v3 }
 0x15a   :  { %v2691_v12 = vmul.f32 -1.442695, %v3416_v9  ;;  %v2953_v9 = vpack.c.bf16 (!%p2695_p13), %v712_v4, %v708_v60  ;;  %v761_v59 = vld [vmem:[#allocation12 + $0x1f8] sm:$0xff] (!%p2695_p13)  ;;  %v2945_v60 = vpack.c.bf16 (!%p2695_p13), %v758_v53, %v754_v52  ;;  %v760_v3 = vld [vmem:[#allocation12 + $0x1f0] sm:$0xff] (!%p2695_p13) }
 0x15b   :  { %3450 = vpow2.f32 %v2690_v11  ;;  %v2692_v14 = vmul.f32 -1.442695, %v3422_v13  ;;  %v721_v11 = vld [vmem:[#allocation12 + $0xb8] sm:$0xff] (!%p2695_p13)  ;;  %v720_v13 = vld [vmem:[#allocation12 + $0xb0] sm:$0xff] (!%p2695_p13) }
 0x15c   :  { %3452 = vpow2.f32 %v2691_v12  ;;  %v716_v12 = vld [vmem:[#allocation12 + $0x90] sm:$0xff] (!%p2695_p13)  ;;  %2954 = vmatpush1.bf16.msra.mxu1 (!%p2695_p13), %v2953_v9  ;;  %v694_v9 = vld [vmem:[#allocation4 + $0x28] sm:$0xff] (!%p2695_p13) }
 0x15d   :  { %3454 = vpow2.f32 %v2692_v14  ;;  %v2929_v14 = vpack.c.bf16 (!%p2695_p13), %v726_v1, %v722_v62  ;;  %v2975_v62 = vpack.c.bf16 (!%p2695_p13), %v761_v59, %v757_v58  ;;  %v756_v1 = vld [vmem:[#allocation12 + $0x1d0] sm:$0xff] (!%p2695_p13) }
 0x15e   :  { %3456 = vtanh.f32 %v3419_v15  ;;  %v730_v15 = vld [vmem:[#allocation12 + $0x100] sm:$0xff] (!%p2695_p13) }
 0x165   :  { %v3451_v16 = vpop.eup %3450 }
 0x166   :  { %v3453_v17 = vpop.eup %3452  ;;  %v658_v18 = vadd.f32 1.0, %v3451_v16  ;;  %v734_v16 = vld [vmem:[#allocation12 + $0x120] sm:$0xff] (!%p2695_p13) }
 0x167   :  { %v664_v51 = vadd.f32 1.0, %v3453_v17  ;;  %v3455_v19 = vpop.eup %3454  ;;  %v2955_v17 = vpack.c.bf16 (!%p2695_p13), %v721_v11, %v717_v10 }
 0x168   :  { %3458 = vrcp.f32 %v658_v18  ;;  %v3457_v2 = vpop.eup %3456  ;;  %v671_v24 = vadd.f32 1.0, %v3455_v19  ;;  %v2931_v18 = vpack.c.bf16 (!%p2695_p13), %v735_v8, %v731_v7  ;;  %v2957_v19 = vpack.c.bf16 (!%p2695_p13), %v720_v13, %v716_v12  ;;  %v693_v8 = vld [vmem:[#allocation4 + $0x20] sm:$0xff] (!%p2695_p13) }
 0x169   :  { %3460 = vrcp.f32 %v664_v51  ;;  %v739_v51 = vld [vmem:[#allocation12 + $0x148] sm:$0xff] (!%p2695_p13)  ;;  %2956 = vmatprep.subr.bf16.mxu1 (!%p2695_p13), %v2955_v17  ;;  %v2977_v7 = vpack.c.bf16 (!%p2695_p13), %v760_v3, %v756_v1 }
 0x16a   :  { %3462 = vrcp.f32 %v671_v24  ;;  %v724_v24 = vld [vmem:[#allocation12 + $0xd0] sm:$0xff] (!%p2695_p13)  ;;  %2958 = vmatpush1.bf16.msra.mxu1 (!%p2695_p13), %v2957_v19 }
 0x16b   :  { %v695_v19 = vld [vmem:[#allocation4 + $0x30] sm:$0xff] (!%p2695_p13) }
 0x172   :  { %v3459_v21 = vpop.eup %3458 }
 0x173   :  { %v3461_v23 = vpop.eup %3460  ;;  %v676_v6 = vmul.f32 %v3459_v21, %v3457_v2  ;;  %v725_v2 = vld [vmem:[#allocation12 + $0xd8] sm:$0xff] (!%p2695_p13)  ;;  %v743_v21 = vld [vmem:[#allocation12 + $0x168] sm:$0xff] (!%p2695_p13) }
 0x174   :  { %v675_v25 = vmul.f32 %v3461_v23, %v674_v20  ;;  %v3463_v27 = vpop.eup %3462 }
 0x176   :  { %v677_v5 = vadd.f32 %v676_v6, %v675_v25  ;;  %v728_v6 = vld [vmem:[#allocation12 + $0xf0] sm:$0xff] (!%p2695_p13)  ;;  %v2933_v25 = vpack.c.bf16 (!%p2695_p13), %v734_v16, %v730_v15  ;;  %v696_v16 = vld [vmem:[#allocation4 + $0x38] sm:$0xff] (!%p2695_p13) }
 0x177   :  { %v2961_v31 = vpack.c.bf16 (!%p2695_p13), %v728_v6, %v724_v24 }
 0x178   :  { %3464 = vtanh.f32 %v677_v5  ;;  %v685_v26 = vsel %vm2693_vm1, %v677_v5, %v674_v20  ;;  %v729_v20 = vld [vmem:[#allocation12 + $0xf8] sm:$0xff] (!%p2695_p13) }
 0x179   :  { %686 = vst [vmem:[#allocation3] sm:$0xff] %v685_v26  ;;  %v2959_v23 = vpack.c.bf16 (!%p2695_p13), %v729_v20, %v725_v2  ;;  %v733_v5 = vld [vmem:[#allocation12 + $0x118] sm:$0xff] (!%p2695_p13) }
 0x17a   :  { %v737_v26 = vld [vmem:[#allocation12 + $0x138] sm:$0xff] (!%p2695_p13) }
 0x17b   :  { %2960 = vmatprep.subr.bf16.mxu1 (!%p2695_p13), %v2959_v23  ;;  %v2963_v33 = vpack.c.bf16 (!%p2695_p13), %v737_v26, %v733_v5 }
 0x17c   :  { %2962 = vmatpush1.bf16.msra.mxu1 (!%p2695_p13), %v2961_v31 }
 0x17d   :  { %2964 = vmatprep.subr.bf16.mxu1 (!%p2695_p13), %v2963_v33 }
 0x180   :  { %691 = sbr.rel (%p2695_p13) target bundleno = 679 (0x2a7), region = 69  ;;  %2966 = vmatpush1.bf16.msra.mxu1 (!%p2695_p13), %v2965_v42  ;;  %v927_v26 = vld [vmem:[#allocation3] sm:$0xff] (!%p2695_p13) }
 0x182   :  { %v3465_v28 = vpop.eup %3464 }
 0x183   :  { %v679_v29 = vmul.f32 %v3465_v28, %v3463_v27  ;;  %v2935_v27 = vpack.c.bf16 (!%p2695_p13), %v743_v21, %v739_v51  ;;  %v738_v28 = vld [vmem:[#allocation12 + $0x140] sm:$0xff] (!%p2695_p13) }
 0x185   :  { %v682_v30 = vsel %vm2693_vm1, %v679_v29, %v3922_v63  ;;  %v710_v63 = vld [vmem:[#allocation12 + $0x60] sm:$0xff] (!%p2695_p13) }
 0x186   :  { %683 = vst [vmem:[#allocation2] sm:$0xff] %v682_v30  ;;  %v2921_v44 = vpack.c.bf16 (!%p2695_p13), %v710_v63, %v706_v41  ;;  %v742_v29 = vld [vmem:[#allocation12 + $0x160] sm:$0xff] (!%p2695_p13)  ;;  %v747_v30 = vld [vmem:[#allocation12 + $0x188] sm:$0xff] (!%p2695_p13) }
 0x187   :  { %v2937_v38 = vpack.c.bf16 %v742_v29, %v738_v28  ;;  %v2939_v39 = vpack.c.bf16 %v751_v32, %v747_v30  ;;  %v750_v41 = vld [vmem:[#allocation12 + $0x1a0] sm:$0xff]  ;;  %v755_v63 = vld [vmem:[#allocation12 + $0x1c8] sm:$0xff] }
 0x188   :  { %2922 = vmatpush1.bf16.msra.mxu0 %v2921_v44  ;;  %v2967_v44 = vpack.c.bf16 %v745_v37, %v741_v36  ;;  %v2941_v49 = vpack.c.bf16 %v750_v41, %v746_v40  ;;  %v2943_v50 = vpack.c.bf16 %v759_v43, %v755_v63 }
 0x189   :  { %2924 = vmatprep.subr.bf16.mxu0 %v2923_v47  ;;  %v749_v47 = vld [vmem:[#allocation12 + $0x198] sm:$0xff] }
 0x18a   :  { %2968 = vmatprep.subr.bf16.mxu1 %v2967_v44  ;;  %v2971_v55 = vpack.c.bf16 %v753_v48, %v749_v47 }
 0x18b   :  { %2970 = vmatpush1.bf16.msra.mxu1 %v2969_v54 }
 0x18c   :  { %2926 = vmatpush1.bf16.msra.mxu0 %v2925_v57  ;;  %v752_v57 = vld [vmem:[#allocation12 + $0x1b0] sm:$0xff]  ;;  %2972 = vmatprep.subr.bf16.mxu1 %v2971_v55 }
 0x18d   :  { %2928 = vmatprep.subr.bf16.mxu0 %v2927_v61  ;;  %v2973_v61 = vpack.c.bf16 %v752_v57, %v748_v56  ;;  %v697_v4 = vld [vmem:[#allocation2] sm:$0xff] }
 0x18f   :  { %2974 = vmatpush1.bf16.msra.mxu1 %v2973_v61 }
 0x190   :  { %2930 = vmatpush1.bf16.msra.mxu0 %v2929_v14  ;;  %2976 = vmatprep.subr.bf16.mxu1 %v2975_v62 }
 0x191   :  { %2932 = vmatprep.subr.bf16.mxu0 %v2931_v18 }
 0x193   :  { %2978 = vmatpush1.bf16.msra.mxu1 %v2977_v7 }
 0x194   :  { %2934 = vmatpush1.bf16.msra.mxu0 %v2933_v25 }
 0x195   :  { %2936 = vmatprep.subr.bf16.mxu0 %v2935_v27 }
 0x196   :  { %898 = vmatmul.mubr.f32.vlgmr.msra.gmra.mrb[0].mxu1 %v697_v4 }
 0x198   :  { %2938 = vmatpush1.bf16.msra.mxu0 %v2937_v38 }
 0x199   :  { %2940 = vmatprep.subr.bf16.mxu0 %v2939_v39 }
 0x19c   :  { %2942 = vmatpush1.bf16.msra.mxu0 %v2941_v49 }
 0x19d   :  { %2944 = vmatprep.subr.bf16.mxu0 %v2943_v50 }
 0x1a0   :  { %2946 = vmatpush1.bf16.msra.mxu0 %v2945_v60 }
 0x1a3   :  { %827 = vmatmul.mubr.f32.vlgmr.msra.gmra.mrb[0].mxu0 %v697_v4 }
 0x269   :  { %v899_v17 = vpop.f32.mrb[0].mxu1 }
 0x26a   :  { %v901_v18 = vpop.f32.mrb[1].mxu1  ;;  %v906_v20 = vadd.f32 %v899_v17, %v695_v19 }
 0x26b   :  { %v907_v51 = vadd.f32 %v901_v18, %v696_v16 }
 0x26d   :  { %v2698_v2 = vmul.f32 -1.442695, %v907_v51 }
 0x276   :  { %v828_v10 = vpop.f32.mrb[0].mxu0 }
 0x277   :  { %v904_v11 = vadd.f32 %v828_v10, %v693_v8  ;;  %v830_v12 = vpop.f32.mrb[1].mxu0 }
 0x278   :  { %v905_v13 = vadd.f32 %v830_v12, %v694_v9 }
 0x279   :  { %v2696_v14 = vmul.f32 -1.442695, %v904_v11 }
 0x27a   :  { %v2697_v15 = vmul.f32 -1.442695, %v905_v13 }
 0x27b   :  { %3466 = vpow2.f32 %v2696_v14 }
 0x27c   :  { %3468 = vpow2.f32 %v2697_v15 }
 0x27d   :  { %3470 = vpow2.f32 %v2698_v2 }
 0x27e   :  { %3472 = vtanh.f32 %v906_v20 }
 0x285   :  { %v3467_v21 = vpop.eup %3466 }
 0x286   :  { %v3469_v23 = vpop.eup %3468  ;;  %v911_v24 = vadd.f32 1.0, %v3467_v21 }
 0x287   :  { %v917_v6 = vadd.f32 1.0, %v3469_v23  ;;  %v3471_v25 = vpop.eup %3470 }
 0x288   :  { %3474 = vrcp.f32 %v911_v24  ;;  %v3473_v5 = vpop.eup %3472  ;;  %v924_v28 = vadd.f32 1.0, %v3471_v25 }
 0x289   :  { %3476 = vrcp.f32 %v917_v6 }
 0x28a   :  { %3478 = vrcp.f32 %v924_v28 }
 0x292   :  { %v3475_v27 = vpop.eup %3474 }
 0x293   :  { %v3477_v29 = vpop.eup %3476  ;;  %v929_v30 = vmul.f32 %v3475_v27, %v3473_v5 }
 0x294   :  { %v928_v31 = vmul.f32 %v3477_v29, %v927_v26  ;;  %v3479_v34 = vpop.eup %3478 }
 0x296   :  { %v930_v32 = vadd.f32 %v929_v30, %v928_v31 }
 0x298   :  { %3480 = vtanh.f32 %v930_v32  ;;  %v938_v33 = vsel %vm2699_vm2, %v930_v32, %v927_v26 }
 0x299   :  { %939 = vst [vmem:[#allocation3] sm:$0xff] %v938_v33 }
 0x2a2   :  { %v3481_v35 = vpop.eup %3480 }
 0x2a3   :  { %v932_v36 = vmul.f32 %v3481_v35, %v3479_v34 }
 0x2a5   :  { %v935_v37 = vsel %vm2699_vm2, %v932_v36, %v697_v4 }
 0x2a6   :  { %936 = vst [vmem:[#allocation2] sm:$0xff] %v935_v37 }
 0x2a7 PF:  { %p2701_p0 = scmp.le.s32.totalorder %s4037_s0, 2 }
 0x2a8   :  { %v952_v38 = vld [vmem:[#allocation12 + $0x8] sm:$0xff] (!%p2701_p0)  ;;  %v951_v40 = vld [vmem:[#allocation12] sm:$0xff] (!%p2701_p0)  ;;  %v3735_v44 = vmov (!%p2701_p0), 0.0   ;;  %v954_v57 = vld [vmem:[#allocation12 + $0x18] sm:$0xff] (!%p2701_p0)  ;;  %vm2705_vm3 = vcmp.gt.s32.totalorder (!%p2701_p0), %v3969_v22, 2 }
 0x2a9   :  { %944 = sbr.rel (%p2701_p0) target bundleno = 976 (0x3d0), region = 73  ;;  %v956_v39 = vld [vmem:[#allocation12 + $0x28] sm:$0xff] (!%p2701_p0)  ;;  %v955_v63 = vld [vmem:[#allocation12 + $0x20] sm:$0xff] (!%p2701_p0)  ;;  %1079 = vmatprep.mubr.f32.mxu0 (!%p2701_p0), %v3735_v44  ;;  %1150 = vmatprep.mubr.f32.mxu1 (!%p2701_p0), %v3735_v44  ;;  %v958_v58 = vld [vmem:[#allocation12 + $0x38] sm:$0xff] (!%p2701_p0) }
 0x2aa   :  { %v2979_v41 = vpack.c.bf16 (!%p2701_p0), %v956_v39, %v952_v38  ;;  %v960_v42 = vld [vmem:[#allocation12 + $0x48] sm:$0xff] (!%p2701_p0)  ;;  %v2981_v45 = vpack.c.bf16 (!%p2701_p0), %v955_v63, %v951_v40  ;;  %v959_v47 = vld [vmem:[#allocation12 + $0x40] sm:$0xff] (!%p2701_p0)  ;;  %v3011_v60 = vpack.c.bf16 (!%p2701_p0), %v958_v58, %v954_v57  ;;  %v953_v61 = vld [vmem:[#allocation12 + $0x10] sm:$0xff] (!%p2701_p0) }
 0x2ab   :  { %v964_v43 = vld [vmem:[#allocation12 + $0x68] sm:$0xff] (!%p2701_p0)  ;;  %v963_v48 = vld [vmem:[#allocation12 + $0x60] sm:$0xff] (!%p2701_p0)  ;;  %v957_v62 = vld [vmem:[#allocation12 + $0x30] sm:$0xff] (!%p2701_p0) }
 0x2ac   :  { %v2983_v46 = vpack.c.bf16 (!%p2701_p0), %v964_v43, %v960_v42  ;;  %v968_v49 = vld [vmem:[#allocation12 + $0x88] sm:$0xff] (!%p2701_p0)  ;;  %2980 = vmatprep.subr.bf16.mxu0 (!%p2701_p0), %v2979_v41  ;;  %v2985_v52 = vpack.c.bf16 (!%p2701_p0), %v963_v48, %v959_v47  ;;  %v967_v53 = vld [vmem:[#allocation12 + $0x80] sm:$0xff] (!%p2701_p0)  ;;  %v3013_v1 = vpack.c.bf16 (!%p2701_p0), %v957_v62, %v953_v61  ;;  %3012 = vmatprep.subr.bf16.mxu1 (!%p2701_p0), %v3011_v60  ;;  %v962_v4 = vld [vmem:[#allocation12 + $0x58] sm:$0xff] (!%p2701_p0) }
 0x2ad   :  { %v972_v50 = vld [vmem:[#allocation12 + $0xa8] sm:$0xff] (!%p2701_p0)  ;;  %2982 = vmatpush1.bf16.msra.mxu0 (!%p2701_p0), %v2981_v45  ;;  %v971_v54 = vld [vmem:[#allocation12 + $0xa0] sm:$0xff] (!%p2701_p0)  ;;  %v966_v7 = vld [vmem:[#allocation12 + $0x78] sm:$0xff] (!%p2701_p0) }
 0x2ae   :  { %2984 = vmatprep.subr.bf16.mxu0 (!%p2701_p0), %v2983_v46  ;;  %v2987_v55 = vpack.c.bf16 (!%p2701_p0), %v972_v50, %v968_v49  ;;  %v976_v56 = vld [vmem:[#allocation12 + $0xc8] sm:$0xff] (!%p2701_p0)  ;;  %v2989_v3 = vpack.c.bf16 (!%p2701_p0), %v971_v54, %v967_v53  ;;  %v961_v8 = vld [vmem:[#allocation12 + $0x50] sm:$0xff] (!%p2701_p0)  ;;  %v975_v10 = vld [vmem:[#allocation12 + $0xc0] sm:$0xff] (!%p2701_p0)  ;;  %3014 = vmatpush1.bf16.msra.mxu1 (!%p2701_p0), %v3013_v1  ;;  %v3015_v12 = vpack.c.bf16 (!%p2701_p0), %v966_v7, %v962_v4 }
 0x2af   :  { %v980_v59 = vld [vmem:[#allocation12 + $0xe8] sm:$0xff] (!%p2701_p0)  ;;  %v979_v11 = vld [vmem:[#allocation12 + $0xe0] sm:$0xff] (!%p2701_p0)  ;;  %v965_v13 = vld [vmem:[#allocation12 + $0x70] sm:$0xff] (!%p2701_p0) }
 0x2b0   :  { %v2991_v9 = vpack.c.bf16 %v980_v59, %v976_v56  ;;  %v984_v14 = vld [vmem:[#allocation12 + $0x108] sm:$0xff]  ;;  %v3017_v16 = vpack.c.bf16 %v965_v13, %v961_v8  ;;  %v970_v17 = vld [vmem:[#allocation12 + $0x98] sm:$0xff]  ;;  %3016 = vmatprep.subr.bf16.mxu1 %v3015_v12  ;;  %v969_v51 = vld [vmem:[#allocation12 + $0x90] sm:$0xff]  ;;  %v2993_v2 = vpack.c.bf16 %v979_v11, %v975_v10 }
 0x2b1   :  { %2986 = vmatpush1.bf16.msra.mxu0 %v2985_v52  ;;  %v988_v15 = vld [vmem:[#allocation12 + $0x128] sm:$0xff]  ;;  %v974_v18 = vld [vmem:[#allocation12 + $0xb8] sm:$0xff]  ;;  %v973_v19 = vld [vmem:[#allocation12 + $0xb0] sm:$0xff] }
 0x2b2   :  { %2988 = vmatprep.subr.bf16.mxu0 %v2987_v55  ;;  %v983_v20 = vld [vmem:[#allocation12 + $0x100] sm:$0xff]  ;;  %v3019_v23 = vpack.c.bf16 %v974_v18, %v970_v17  ;;  %v2995_v24 = vpack.c.bf16 %v988_v15, %v984_v14  ;;  %3018 = vmatpush1.bf16.msra.mxu1 %v3017_v16  ;;  %v992_v6 = vld [vmem:[#allocation12 + $0x148] sm:$0xff]  ;;  %v3021_v25 = vpack.c.bf16 %v973_v19, %v969_v51  ;;  %v978_v5 = vld [vmem:[#allocation12 + $0xd8] sm:$0xff] }
 0x2b3   :  { %v987_v21 = vld [vmem:[#allocation12 + $0x120] sm:$0xff]  ;;  %v982_v26 = vld [vmem:[#allocation12 + $0xf8] sm:$0xff]  ;;  %v996_v27 = vld [vmem:[#allocation12 + $0x168] sm:$0xff] }
 0x2b4   :  { %3020 = vmatprep.subr.bf16.mxu1 %v3019_v23  ;;  %v3023_v28 = vpack.c.bf16 %v982_v26, %v978_v5  ;;  %v977_v29 = vld [vmem:[#allocation12 + $0xd0] sm:$0xff]  ;;  %v2997_v31 = vpack.c.bf16 %v987_v21, %v983_v20  ;;  %v986_v32 = vld [vmem:[#allocation12 + $0x118] sm:$0xff]  ;;  %v2999_v34 = vpack.c.bf16 %v996_v27, %v992_v6  ;;  %v991_v35 = vld [vmem:[#allocation12 + $0x140] sm:$0xff] }
 0x2b5   :  { %2990 = vmatpush1.bf16.msra.mxu0 %v2989_v3  ;;  %v981_v30 = vld [vmem:[#allocation12 + $0xf0] sm:$0xff]  ;;  %v990_v33 = vld [vmem:[#allocation12 + $0x138] sm:$0xff]  ;;  %v995_v36 = vld [vmem:[#allocation12 + $0x160] sm:$0xff] }
 0x2b6   :  { %2992 = vmatprep.subr.bf16.mxu0 %v2991_v9  ;;  %3022 = vmatpush1.bf16.msra.mxu1 %v3021_v25  ;;  %v1000_v37 = vld [vmem:[#allocation12 + $0x188] sm:$0xff]  ;;  %v3025_v38 = vpack.c.bf16 %v981_v30, %v977_v29  ;;  %v3027_v40 = vpack.c.bf16 %v990_v33, %v986_v32  ;;  %v985_v41 = vld [vmem:[#allocation12 + $0x110] sm:$0xff]  ;;  %v994_v42 = vld [vmem:[#allocation12 + $0x158] sm:$0xff]  ;;  %v3001_v44 = vpack.c.bf16 %v995_v36, %v991_v35 }
 0x2b7   :  { %v1004_v39 = vld [vmem:[#allocation12 + $0x1a8] sm:$0xff]  ;;  %3024 = vmatprep.subr.bf16.mxu1 %v3023_v28  ;;  %v989_v63 = vld [vmem:[#allocation12 + $0x130] sm:$0xff]  ;;  %v998_v43 = vld [vmem:[#allocation12 + $0x178] sm:$0xff] }
 0x2b8   :  { %v3003_v45 = vpack.c.bf16 %v1004_v39, %v1000_v37  ;;  %v999_v46 = vld [vmem:[#allocation12 + $0x180] sm:$0xff]  ;;  %v1008_v48 = vld [vmem:[#allocation12 + $0x1c8] sm:$0xff]  ;;  %v3029_v49 = vpack.c.bf16 %v989_v63, %v985_v41  ;;  %v3031_v52 = vpack.c.bf16 %v998_v43, %v994_v42  ;;  %v993_v53 = vld [vmem:[#allocation12 + $0x150] sm:$0xff] }
 0x2b9   :  { %2994 = vmatpush1.bf16.msra.mxu0 %v2993_v2  ;;  %v1003_v47 = vld [vmem:[#allocation12 + $0x1a0] sm:$0xff]  ;;  %v1012_v50 = vld [vmem:[#allocation12 + $0x1e8] sm:$0xff]  ;;  %v997_v54 = vld [vmem:[#allocation12 + $0x170] sm:$0xff] }
 0x2ba   :  { %2996 = vmatprep.subr.bf16.mxu0 %v2995_v24  ;;  %3026 = vmatpush1.bf16.msra.mxu1 %v3025_v38  ;;  %v1002_v55 = vld [vmem:[#allocation12 + $0x198] sm:$0xff]  ;;  %v3005_v57 = vpack.c.bf16 %v1003_v47, %v999_v46  ;;  %v3007_v58 = vpack.c.bf16 %v1012_v50, %v1008_v48  ;;  %v1007_v59 = vld [vmem:[#allocation12 + $0x1c0] sm:$0xff]  ;;  %v3033_v61 = vpack.c.bf16 %v997_v54, %v993_v53  ;;  %v1001_v1 = vld [vmem:[#allocation12 + $0x190] sm:$0xff] }
 0x2bb   :  { %3028 = vmatprep.subr.bf16.mxu1 %v3027_v40  ;;  %v1006_v56 = vld [vmem:[#allocation12 + $0x1b8] sm:$0xff]  ;;  %v1011_v60 = vld [vmem:[#allocation12 + $0x1e0] sm:$0xff]  ;;  %v1005_v3 = vld [vmem:[#allocation12 + $0x1b0] sm:$0xff] }
 0x2bc   :  { %v3035_v62 = vpack.c.bf16 %v1006_v56, %v1002_v55  ;;  %v1010_v4 = vld [vmem:[#allocation12 + $0x1d8] sm:$0xff]  ;;  %v3009_v8 = vpack.c.bf16 %v1011_v60, %v1007_v59  ;;  %v3037_v9 = vpack.c.bf16 %v1005_v3, %v1001_v1  ;;  %v1009_v11 = vld [vmem:[#allocation12 + $0x1d0] sm:$0xff]  ;;  %v946_v15 = vld [vmem:[#allocation4 + $0x40] sm:$0xff] }
 0x2bd   :  { %2998 = vmatpush1.bf16.msra.mxu0 %v2997_v31  ;;  %v1014_v7 = vld [vmem:[#allocation12 + $0x1f8] sm:$0xff]  ;;  %v1013_v12 = vld [vmem:[#allocation12 + $0x1f0] sm:$0xff]  ;;  %v947_v16 = vld [vmem:[#allocation4 + $0x48] sm:$0xff] }
 0x2be   :  { %3000 = vmatprep.subr.bf16.mxu0 %v2999_v34  ;;  %3030 = vmatpush1.bf16.msra.mxu1 %v3029_v49  ;;  %v3039_v10 = vpack.c.bf16 %v1014_v7, %v1010_v4  ;;  %v950_v13 = vld [vmem:[#allocation2] sm:$0xff]  ;;  %v3041_v14 = vpack.c.bf16 %v1013_v12, %v1009_v11  ;;  %v949_v21 = vld [vmem:[#allocation4 + $0x58] sm:$0xff] }
 0x2bf   :  { %3032 = vmatprep.subr.bf16.mxu1 %v3031_v52  ;;  %v948_v25 = vld [vmem:[#allocation4 + $0x50] sm:$0xff]  ;;  %v1180_v33 = vld [vmem:[#allocation3] sm:$0xff] }
 0x2c1   :  { %3002 = vmatpush1.bf16.msra.mxu0 %v3001_v44 }
 0x2c2   :  { %3004 = vmatprep.subr.bf16.mxu0 %v3003_v45  ;;  %3034 = vmatpush1.bf16.msra.mxu1 %v3033_v61 }
 0x2c3   :  { %3036 = vmatprep.subr.bf16.mxu1 %v3035_v62 }
 0x2c5   :  { %3006 = vmatpush1.bf16.msra.mxu0 %v3005_v57 }
 0x2c6   :  { %3008 = vmatprep.subr.bf16.mxu0 %v3007_v58  ;;  %3038 = vmatpush1.bf16.msra.mxu1 %v3037_v9 }
 0x2c7   :  { %3040 = vmatprep.subr.bf16.mxu1 %v3039_v10 }
 0x2c9   :  { %3010 = vmatpush1.bf16.msra.mxu0 %v3009_v8 }
 0x2ca   :  { %3042 = vmatpush1.bf16.msra.mxu1 %v3041_v14 }
 0x2cc   :  { %1080 = vmatmul.mubr.f32.vlgmr.msra.gmra.mrb[0].mxu0 %v950_v13 }
 0x2cd   :  { %1151 = vmatmul.mubr.f32.vlgmr.msra.gmra.mrb[0].mxu1 %v950_v13 }
 0x39f   :  { %v1081_v17 = vpop.f32.mrb[0].mxu0 }
 0x3a0   :  { %v1157_v18 = vadd.f32 %v1081_v17, %v946_v15  ;;  %v1083_v51 = vpop.f32.mrb[1].mxu0  ;;  %v1152_v23 = vpop.f32.mrb[0].mxu1 }
 0x3a1   :  { %v1158_v19 = vadd.f32 %v1083_v51, %v947_v16  ;;  %v1154_v24 = vpop.f32.mrb[1].mxu1  ;;  %v1159_v26 = vadd.f32 %v1152_v23, %v948_v25 }
 0x3a2   :  { %v2702_v2 = vmul.f32 -1.442695, %v1157_v18  ;;  %v1160_v6 = vadd.f32 %v1154_v24, %v949_v21 }
 0x3a3   :  { %v2703_v20 = vmul.f32 -1.442695, %v1158_v19 }
 0x3a4   :  { %3482 = vpow2.f32 %v2702_v2  ;;  %v2704_v5 = vmul.f32 -1.442695, %v1160_v6 }
 0x3a5   :  { %3484 = vpow2.f32 %v2703_v20 }
 0x3a6   :  { %3486 = vpow2.f32 %v2704_v5 }
 0x3a7   :  { %3488 = vtanh.f32 %v1159_v26 }
 0x3ae   :  { %v3483_v27 = vpop.eup %3482 }
 0x3af   :  { %v3485_v28 = vpop.eup %3484  ;;  %v1164_v29 = vadd.f32 1.0, %v3483_v27 }
 0x3b0   :  { %v1170_v30 = vadd.f32 1.0, %v3485_v28  ;;  %v3487_v31 = vpop.eup %3486 }
 0x3b1   :  { %3490 = vrcp.f32 %v1164_v29  ;;  %v3489_v32 = vpop.eup %3488  ;;  %v1177_v35 = vadd.f32 1.0, %v3487_v31 }
 0x3b2   :  { %3492 = vrcp.f32 %v1170_v30 }
 0x3b3   :  { %3494 = vrcp.f32 %v1177_v35 }
 0x3bb   :  { %v3491_v34 = vpop.eup %3490 }
 0x3bc   :  { %v3493_v36 = vpop.eup %3492  ;;  %v1182_v37 = vmul.f32 %v3491_v34, %v3489_v32 }
 0x3bd   :  { %v1181_v38 = vmul.f32 %v3493_v36, %v1180_v33  ;;  %v3495_v41 = vpop.eup %3494 }
 0x3bf   :  { %v1183_v39 = vadd.f32 %v1182_v37, %v1181_v38 }
 0x3c1   :  { %3496 = vtanh.f32 %v1183_v39  ;;  %v1191_v40 = vsel %vm2705_vm3, %v1183_v39, %v1180_v33 }
 0x3c2   :  { %1192 = vst [vmem:[#allocation3] sm:$0xff] %v1191_v40 }
 0x3cb   :  { %v3497_v63 = vpop.eup %3496 }
 0x3cc   :  { %v1185_v42 = vmul.f32 %v3497_v63, %v3495_v41 }
 0x3ce   :  { %v1188_v43 = vsel %vm2705_vm3, %v1185_v42, %v950_v13 }
 0x3cf   :  { %1189 = vst [vmem:[#allocation2] sm:$0xff] %v1188_v43 }
 0x3d0 PF:  { %p2707_p1 = scmp.le.s32.totalorder %s4037_s0, 3 }
 0x3d1   :  { %v1205_v44 = vld [vmem:[#allocation12 + $0x8] sm:$0xff] (!%p2707_p1)  ;;  %v1204_v46 = vld [vmem:[#allocation12] sm:$0xff] (!%p2707_p1)  ;;  %v3736_v52 = vmov (!%p2707_p1), 0.0   ;;  %v1207_v3 = vld [vmem:[#allocation12 + $0x18] sm:$0xff] (!%p2707_p1)  ;;  %vm2711_vm4 = vcmp.gt.s32.totalorder (!%p2707_p1), %v3969_v22, 3 }
 0x3d2   :  { %1197 = sbr.rel (%p2707_p1) target bundleno = 1273 (0x4f9), region = 77  ;;  %v1209_v45 = vld [vmem:[#allocation12 + $0x28] sm:$0xff] (!%p2707_p1)  ;;  %v1208_v48 = vld [vmem:[#allocation12 + $0x20] sm:$0xff] (!%p2707_p1)  ;;  %1332 = vmatprep.mubr.f32.mxu0 (!%p2707_p1), %v3736_v52  ;;  %1403 = vmatprep.mubr.f32.mxu1 (!%p2707_p1), %v3736_v52  ;;  %v1211_v4 = vld [vmem:[#allocation12 + $0x38] sm:$0xff] (!%p2707_p1) }
 0x3d3   :  { %v3043_v47 = vpack.c.bf16 (!%p2707_p1), %v1209_v45, %v1205_v44  ;;  %v1213_v49 = vld [vmem:[#allocation12 + $0x48] sm:$0xff] (!%p2707_p1)  ;;  %v3045_v53 = vpack.c.bf16 (!%p2707_p1), %v1208_v48, %v1204_v46  ;;  %v1212_v55 = vld [vmem:[#allocation12 + $0x40] sm:$0xff] (!%p2707_p1)  ;;  %v3075_v8 = vpack.c.bf16 (!%p2707_p1), %v1211_v4, %v1207_v3  ;;  %v1206_v9 = vld [vmem:[#allocation12 + $0x10] sm:$0xff] (!%p2707_p1) }
 0x3d4   :  { %v1217_v50 = vld [vmem:[#allocation12 + $0x68] sm:$0xff] (!%p2707_p1)  ;;  %v1216_v56 = vld [vmem:[#allocation12 + $0x60] sm:$0xff] (!%p2707_p1)  ;;  %v1210_v10 = vld [vmem:[#allocation12 + $0x30] sm:$0xff] (!%p2707_p1) }
 0x3d5   :  { %v3047_v54 = vpack.c.bf16 (!%p2707_p1), %v1217_v50, %v1213_v49  ;;  %v1221_v57 = vld [vmem:[#allocation12 + $0x88] sm:$0xff] (!%p2707_p1)  ;;  %3044 = vmatprep.subr.bf16.mxu0 (!%p2707_p1), %v3043_v47  ;;  %v3049_v59 = vpack.c.bf16 (!%p2707_p1), %v1216_v56, %v1212_v55  ;;  %v1220_v60 = vld [vmem:[#allocation12 + $0x80] sm:$0xff] (!%p2707_p1)  ;;  %v3077_v11 = vpack.c.bf16 (!%p2707_p1), %v1210_v10, %v1206_v9  ;;  %3076 = vmatprep.subr.bf16.mxu1 (!%p2707_p1), %v3075_v8  ;;  %v1215_v13 = vld [vmem:[#allocation12 + $0x58] sm:$0xff] (!%p2707_p1) }
 0x3d6   :  { %v1225_v58 = vld [vmem:[#allocation12 + $0xa8] sm:$0xff] (!%p2707_p1)  ;;  %3046 = vmatpush1.bf16.msra.mxu0 (!%p2707_p1), %v3045_v53  ;;  %v1224_v61 = vld [vmem:[#allocation12 + $0xa0] sm:$0xff] (!%p2707_p1)  ;;  %v1219_v14 = vld [vmem:[#allocation12 + $0x78] sm:$0xff] (!%p2707_p1) }
 0x3d7   :  { %3048 = vmatprep.subr.bf16.mxu0 (!%p2707_p1), %v3047_v54  ;;  %v3051_v62 = vpack.c.bf16 (!%p2707_p1), %v1225_v58, %v1221_v57  ;;  %v1229_v1 = vld [vmem:[#allocation12 + $0xc8] sm:$0xff] (!%p2707_p1)  ;;  %v3053_v12 = vpack.c.bf16 (!%p2707_p1), %v1224_v61, %v1220_v60  ;;  %v1214_v15 = vld [vmem:[#allocation12 + $0x50] sm:$0xff] (!%p2707_p1)  ;;  %v1228_v17 = vld [vmem:[#allocation12 + $0xc0] sm:$0xff] (!%p2707_p1)  ;;  %3078 = vmatpush1.bf16.msra.mxu1 (!%p2707_p1), %v3077_v11  ;;  %v3079_v51 = vpack.c.bf16 (!%p2707_p1), %v1219_v14, %v1215_v13 }
 0x3d8   :  { %v1233_v7 = vld [vmem:[#allocation12 + $0xe8] sm:$0xff] (!%p2707_p1)  ;;  %v1232_v18 = vld [vmem:[#allocation12 + $0xe0] sm:$0xff] (!%p2707_p1)  ;;  %v1218_v19 = vld [vmem:[#allocation12 + $0x70] sm:$0xff] (!%p2707_p1) }
 0x3d9   :  { %v3055_v16 = vpack.c.bf16 %v1233_v7, %v1229_v1  ;;  %v1237_v2 = vld [vmem:[#allocation12 + $0x108] sm:$0xff]  ;;  %v3081_v21 = vpack.c.bf16 %v1218_v19, %v1214_v15  ;;  %v1223_v23 = vld [vmem:[#allocation12 + $0x98] sm:$0xff]  ;;  %3080 = vmatprep.subr.bf16.mxu1 %v3079_v51  ;;  %v1222_v6 = vld [vmem:[#allocation12 + $0x90] sm:$0xff]  ;;  %v3057_v5 = vpack.c.bf16 %v1232_v18, %v1228_v17 }
 0x3da   :  { %3050 = vmatpush1.bf16.msra.mxu0 %v3049_v59  ;;  %v1241_v20 = vld [vmem:[#allocation12 + $0x128] sm:$0xff]  ;;  %v1227_v24 = vld [vmem:[#allocation12 + $0xb8] sm:$0xff]  ;;  %v1226_v25 = vld [vmem:[#allocation12 + $0xb0] sm:$0xff] }
 0x3db   :  { %3052 = vmatprep.subr.bf16.mxu0 %v3051_v62  ;;  %v1236_v26 = vld [vmem:[#allocation12 + $0x100] sm:$0xff]  ;;  %v3083_v28 = vpack.c.bf16 %v1227_v24, %v1223_v23  ;;  %v3059_v29 = vpack.c.bf16 %v1241_v20, %v1237_v2  ;;  %3082 = vmatpush1.bf16.msra.mxu1 %v3081_v21  ;;  %v1245_v30 = vld [vmem:[#allocation12 + $0x148] sm:$0xff]  ;;  %v3085_v31 = vpack.c.bf16 %v1226_v25, %v1222_v6  ;;  %v1231_v32 = vld [vmem:[#allocation12 + $0xd8] sm:$0xff] }
 0x3dc   :  { %v1240_v27 = vld [vmem:[#allocation12 + $0x120] sm:$0xff]  ;;  %v1235_v33 = vld [vmem:[#allocation12 + $0xf8] sm:$0xff]  ;;  %v1249_v34 = vld [vmem:[#allocation12 + $0x168] sm:$0xff] }
 0x3dd   :  { %3084 = vmatprep.subr.bf16.mxu1 %v3083_v28  ;;  %v3087_v35 = vpack.c.bf16 %v1235_v33, %v1231_v32  ;;  %v1230_v36 = vld [vmem:[#allocation12 + $0xd0] sm:$0xff]  ;;  %v3061_v38 = vpack.c.bf16 %v1240_v27, %v1236_v26  ;;  %v1239_v39 = vld [vmem:[#allocation12 + $0x118] sm:$0xff]  ;;  %v3063_v41 = vpack.c.bf16 %v1249_v34, %v1245_v30  ;;  %v1244_v63 = vld [vmem:[#allocation12 + $0x140] sm:$0xff] }
 0x3de   :  { %3054 = vmatpush1.bf16.msra.mxu0 %v3053_v12  ;;  %v1234_v37 = vld [vmem:[#allocation12 + $0xf0] sm:$0xff]  ;;  %v1243_v40 = vld [vmem:[#allocation12 + $0x138] sm:$0xff]  ;;  %v1248_v42 = vld [vmem:[#allocation12 + $0x160] sm:$0xff] }
 0x3df   :  { %3056 = vmatprep.subr.bf16.mxu0 %v3055_v16  ;;  %3086 = vmatpush1.bf16.msra.mxu1 %v3085_v31  ;;  %v1253_v43 = vld [vmem:[#allocation12 + $0x188] sm:$0xff]  ;;  %v3089_v44 = vpack.c.bf16 %v1234_v37, %v1230_v36  ;;  %v3091_v46 = vpack.c.bf16 %v1243_v40, %v1239_v39  ;;  %v1238_v47 = vld [vmem:[#allocation12 + $0x110] sm:$0xff]  ;;  %v1247_v49 = vld [vmem:[#allocation12 + $0x158] sm:$0xff]  ;;  %v3065_v52 = vpack.c.bf16 %v1248_v42, %v1244_v63 }
 0x3e0   :  { %v1257_v45 = vld [vmem:[#allocation12 + $0x1a8] sm:$0xff]  ;;  %3088 = vmatprep.subr.bf16.mxu1 %v3087_v35  ;;  %v1242_v48 = vld [vmem:[#allocation12 + $0x130] sm:$0xff]  ;;  %v1251_v50 = vld [vmem:[#allocation12 + $0x178] sm:$0xff] }
 0x3e1   :  { %v3067_v53 = vpack.c.bf16 %v1257_v45, %v1253_v43  ;;  %v1252_v54 = vld [vmem:[#allocation12 + $0x180] sm:$0xff]  ;;  %v1261_v56 = vld [vmem:[#allocation12 + $0x1c8] sm:$0xff]  ;;  %v3093_v57 = vpack.c.bf16 %v1242_v48, %v1238_v47  ;;  %v3095_v59 = vpack.c.bf16 %v1251_v50, %v1247_v49  ;;  %v1246_v60 = vld [vmem:[#allocation12 + $0x150] sm:$0xff] }
 0x3e2   :  { %3058 = vmatpush1.bf16.msra.mxu0 %v3057_v5  ;;  %v1256_v55 = vld [vmem:[#allocation12 + $0x1a0] sm:$0xff]  ;;  %v1265_v58 = vld [vmem:[#allocation12 + $0x1e8] sm:$0xff]  ;;  %v1250_v61 = vld [vmem:[#allocation12 + $0x170] sm:$0xff] }
 0x3e3   :  { %3060 = vmatprep.subr.bf16.mxu0 %v3059_v29  ;;  %3090 = vmatpush1.bf16.msra.mxu1 %v3089_v44  ;;  %v1255_v62 = vld [vmem:[#allocation12 + $0x198] sm:$0xff]  ;;  %v3069_v3 = vpack.c.bf16 %v1256_v55, %v1252_v54  ;;  %v3071_v4 = vpack.c.bf16 %v1265_v58, %v1261_v56  ;;  %v1260_v7 = vld [vmem:[#allocation12 + $0x1c0] sm:$0xff]  ;;  %v3097_v9 = vpack.c.bf16 %v1250_v61, %v1246_v60  ;;  %v1254_v11 = vld [vmem:[#allocation12 + $0x190] sm:$0xff] }
 0x3e4   :  { %3092 = vmatprep.subr.bf16.mxu1 %v3091_v46  ;;  %v1259_v1 = vld [vmem:[#allocation12 + $0x1b8] sm:$0xff]  ;;  %v1264_v8 = vld [vmem:[#allocation12 + $0x1e0] sm:$0xff]  ;;  %v1258_v12 = vld [vmem:[#allocation12 + $0x1b0] sm:$0xff] }
 0x3e5   :  { %v3099_v10 = vpack.c.bf16 %v1259_v1, %v1255_v62  ;;  %v1263_v13 = vld [vmem:[#allocation12 + $0x1d8] sm:$0xff]  ;;  %v3073_v15 = vpack.c.bf16 %v1264_v8, %v1260_v7  ;;  %v3101_v16 = vpack.c.bf16 %v1258_v12, %v1254_v11  ;;  %v1262_v18 = vld [vmem:[#allocation12 + $0x1d0] sm:$0xff]  ;;  %v1199_v20 = vld [vmem:[#allocation4 + $0x60] sm:$0xff] }
 0x3e6   :  { %3062 = vmatpush1.bf16.msra.mxu0 %v3061_v38  ;;  %v1267_v14 = vld [vmem:[#allocation12 + $0x1f8] sm:$0xff]  ;;  %v1266_v51 = vld [vmem:[#allocation12 + $0x1f0] sm:$0xff]  ;;  %v1200_v21 = vld [vmem:[#allocation4 + $0x68] sm:$0xff] }
 0x3e7   :  { %3064 = vmatprep.subr.bf16.mxu0 %v3063_v41  ;;  %3094 = vmatpush1.bf16.msra.mxu1 %v3093_v57  ;;  %v3103_v17 = vpack.c.bf16 %v1267_v14, %v1263_v13  ;;  %v1203_v19 = vld [vmem:[#allocation2] sm:$0xff]  ;;  %v3105_v2 = vpack.c.bf16 %v1266_v51, %v1262_v18  ;;  %v1202_v27 = vld [vmem:[#allocation4 + $0x78] sm:$0xff] }
 0x3e8   :  { %3096 = vmatprep.subr.bf16.mxu1 %v3095_v59  ;;  %v1201_v31 = vld [vmem:[#allocation4 + $0x70] sm:$0xff]  ;;  %v1433_v40 = vld [vmem:[#allocation3] sm:$0xff] }
 0x3ea   :  { %3066 = vmatpush1.bf16.msra.mxu0 %v3065_v52 }
 0x3eb   :  { %3068 = vmatprep.subr.bf16.mxu0 %v3067_v53  ;;  %3098 = vmatpush1.bf16.msra.mxu1 %v3097_v9 }
 0x3ec   :  { %3100 = vmatprep.subr.bf16.mxu1 %v3099_v10 }
 0x3ee   :  { %3070 = vmatpush1.bf16.msra.mxu0 %v3069_v3 }
 0x3ef   :  { %3072 = vmatprep.subr.bf16.mxu0 %v3071_v4  ;;  %3102 = vmatpush1.bf16.msra.mxu1 %v3101_v16 }
 0x3f0   :  { %3104 = vmatprep.subr.bf16.mxu1 %v3103_v17 }
 0x3f2   :  { %3074 = vmatpush1.bf16.msra.mxu0 %v3073_v15 }
 0x3f3   :  { %3106 = vmatpush1.bf16.msra.mxu1 %v3105_v2 }
 0x3f5   :  { %1333 = vmatmul.mubr.f32.vlgmr.msra.gmra.mrb[0].mxu0 %v1203_v19 }
 0x3f6   :  { %1404 = vmatmul.mubr.f32.vlgmr.msra.gmra.mrb[0].mxu1 %v1203_v19 }
 0x4c8   :  { %v1334_v23 = vpop.f32.mrb[0].mxu0 }
 0x4c9   :  { %v1410_v24 = vadd.f32 %v1334_v23, %v1199_v20  ;;  %v1336_v6 = vpop.f32.mrb[1].mxu0  ;;  %v1405_v28 = vpop.f32.mrb[0].mxu1 }
 0x4ca   :  { %v1411_v25 = vadd.f32 %v1336_v6, %v1200_v21  ;;  %v1407_v29 = vpop.f32.mrb[1].mxu1  ;;  %v1412_v33 = vadd.f32 %v1405_v28, %v1201_v31 }
 0x4cb   :  { %v2708_v5 = vmul.f32 -1.442695, %v1410_v24  ;;  %v1413_v30 = vadd.f32 %v1407_v29, %v1202_v27 }
 0x4cc   :  { %v2709_v26 = vmul.f32 -1.442695, %v1411_v25 }
 0x4cd   :  { %3498 = vpow2.f32 %v2708_v5  ;;  %v2710_v32 = vmul.f32 -1.442695, %v1413_v30 }
 0x4ce   :  { %3500 = vpow2.f32 %v2709_v26 }
 0x4cf   :  { %3502 = vpow2.f32 %v2710_v32 }
 0x4d0   :  { %3504 = vtanh.f32 %v1412_v33 }
 0x4d7   :  { %v3499_v34 = vpop.eup %3498 }
 0x4d8   :  { %v3501_v35 = vpop.eup %3500  ;;  %v1417_v36 = vadd.f32 1.0, %v3499_v34 }
 0x4d9   :  { %v1423_v37 = vadd.f32 1.0, %v3501_v35  ;;  %v3503_v38 = vpop.eup %3502 }
 0x4da   :  { %3506 = vrcp.f32 %v1417_v36  ;;  %v3505_v39 = vpop.eup %3504  ;;  %v1430_v63 = vadd.f32 1.0, %v3503_v38 }
 0x4db   :  { %3508 = vrcp.f32 %v1423_v37 }
 0x4dc   :  { %3510 = vrcp.f32 %v1430_v63 }
 0x4e4   :  { %v3507_v41 = vpop.eup %3506 }
 0x4e5   :  { %v3509_v42 = vpop.eup %3508  ;;  %v1435_v43 = vmul.f32 %v3507_v41, %v3505_v39 }
 0x4e6   :  { %v1434_v44 = vmul.f32 %v3509_v42, %v1433_v40  ;;  %v3511_v47 = vpop.eup %3510 }
 0x4e8   :  { %v1436_v45 = vadd.f32 %v1435_v43, %v1434_v44 }
 0x4ea   :  { %3512 = vtanh.f32 %v1436_v45  ;;  %v1444_v46 = vsel %vm2711_vm4, %v1436_v45, %v1433_v40 }
 0x4eb   :  { %1445 = vst [vmem:[#allocation3] sm:$0xff] %v1444_v46 }
 0x4f4   :  { %v3513_v48 = vpop.eup %3512 }
 0x4f5   :  { %v1438_v49 = vmul.f32 %v3513_v48, %v3511_v47 }
 0x4f7   :  { %v1441_v50 = vsel %vm2711_vm4, %v1438_v49, %v1203_v19 }
 0x4f8   :  { %1442 = vst [vmem:[#allocation2] sm:$0xff] %v1441_v50 }
 0x4f9 PF:  { %p2713_p2 = scmp.le.s32.totalorder %s4037_s0, 4 }
 0x4fa   :  { %v1458_v52 = vld [vmem:[#allocation12 + $0x8] sm:$0xff] (!%p2713_p2)  ;;  %v1457_v54 = vld [vmem:[#allocation12] sm:$0xff] (!%p2713_p2)  ;;  %v3737_v59 = vmov (!%p2713_p2), 0.0   ;;  %v1460_v12 = vld [vmem:[#allocation12 + $0x18] sm:$0xff] (!%p2713_p2)  ;;  %vm2717_vm5 = vcmp.gt.s32.totalorder (!%p2713_p2), %v3969_v22, 4 }
 0x4fb   :  { %1450 = sbr.rel (%p2713_p2) target bundleno = 1570 (0x622), region = 81  ;;  %v1462_v53 = vld [vmem:[#allocation12 + $0x28] sm:$0xff] (!%p2713_p2)  ;;  %v1461_v56 = vld [vmem:[#allocation12 + $0x20] sm:$0xff] (!%p2713_p2)  ;;  %1585 = vmatprep.mubr.f32.mxu0 (!%p2713_p2), %v3737_v59  ;;  %1656 = vmatprep.mubr.f32.mxu1 (!%p2713_p2), %v3737_v59  ;;  %v1464_v13 = vld [vmem:[#allocation12 + $0x38] sm:$0xff] (!%p2713_p2) }
 0x4fc   :  { %v3107_v55 = vpack.c.bf16 (!%p2713_p2), %v1462_v53, %v1458_v52  ;;  %v1466_v57 = vld [vmem:[#allocation12 + $0x48] sm:$0xff] (!%p2713_p2)  ;;  %v3109_v60 = vpack.c.bf16 (!%p2713_p2), %v1461_v56, %v1457_v54  ;;  %v1465_v62 = vld [vmem:[#allocation12 + $0x40] sm:$0xff] (!%p2713_p2)  ;;  %v3139_v15 = vpack.c.bf16 (!%p2713_p2), %v1464_v13, %v1460_v12  ;;  %v1459_v16 = vld [vmem:[#allocation12 + $0x10] sm:$0xff] (!%p2713_p2) }
 0x4fd   :  { %v1470_v58 = vld [vmem:[#allocation12 + $0x68] sm:$0xff] (!%p2713_p2)  ;;  %v1469_v1 = vld [vmem:[#allocation12 + $0x60] sm:$0xff] (!%p2713_p2)  ;;  %v1463_v17 = vld [vmem:[#allocation12 + $0x30] sm:$0xff] (!%p2713_p2) }
 0x4fe   :  { %v3111_v61 = vpack.c.bf16 (!%p2713_p2), %v1470_v58, %v1466_v57  ;;  %v1474_v3 = vld [vmem:[#allocation12 + $0x88] sm:$0xff] (!%p2713_p2)  ;;  %3108 = vmatprep.subr.bf16.mxu0 (!%p2713_p2), %v3107_v55  ;;  %v3113_v7 = vpack.c.bf16 (!%p2713_p2), %v1469_v1, %v1465_v62  ;;  %v1473_v8 = vld [vmem:[#allocation12 + $0x80] sm:$0xff] (!%p2713_p2)  ;;  %v3141_v18 = vpack.c.bf16 (!%p2713_p2), %v1463_v17, %v1459_v16  ;;  %3140 = vmatprep.subr.bf16.mxu1 (!%p2713_p2), %v3139_v15  ;;  %v1468_v19 = vld [vmem:[#allocation12 + $0x58] sm:$0xff] (!%p2713_p2) }
 0x4ff   :  { %v1478_v4 = vld [vmem:[#allocation12 + $0xa8] sm:$0xff] (!%p2713_p2)  ;;  %3110 = vmatpush1.bf16.msra.mxu0 (!%p2713_p2), %v3109_v60  ;;  %v1477_v9 = vld [vmem:[#allocation12 + $0xa0] sm:$0xff] (!%p2713_p2)  ;;  %v1472_v2 = vld [vmem:[#allocation12 + $0x78] sm:$0xff] (!%p2713_p2) }
 0x500   :  { %3112 = vmatprep.subr.bf16.mxu0 (!%p2713_p2), %v3111_v61  ;;  %v3115_v10 = vpack.c.bf16 (!%p2713_p2), %v1478_v4, %v1474_v3  ;;  %v1482_v11 = vld [vmem:[#allocation12 + $0xc8] sm:$0xff] (!%p2713_p2)  ;;  %v3117_v51 = vpack.c.bf16 (!%p2713_p2), %v1477_v9, %v1473_v8  ;;  %v1467_v20 = vld [vmem:[#allocation12 + $0x50] sm:$0xff] (!%p2713_p2)  ;;  %v1481_v23 = vld [vmem:[#allocation12 + $0xc0] sm:$0xff] (!%p2713_p2)  ;;  %3142 = vmatpush1.bf16.msra.mxu1 (!%p2713_p2), %v3141_v18  ;;  %v3143_v6 = vpack.c.bf16 (!%p2713_p2), %v1472_v2, %v1468_v19 }
 0x501   :  { %v1486_v14 = vld [vmem:[#allocation12 + $0xe8] sm:$0xff] (!%p2713_p2)  ;;  %v1485_v24 = vld [vmem:[#allocation12 + $0xe0] sm:$0xff] (!%p2713_p2)  ;;  %v1471_v25 = vld [vmem:[#allocation12 + $0x70] sm:$0xff] (!%p2713_p2) }
 0x502   :  { %v3119_v21 = vpack.c.bf16 %v1486_v14, %v1482_v11  ;;  %v1490_v5 = vld [vmem:[#allocation12 + $0x108] sm:$0xff]  ;;  %v3145_v27 = vpack.c.bf16 %v1471_v25, %v1467_v20  ;;  %v1476_v28 = vld [vmem:[#allocation12 + $0x98] sm:$0xff]  ;;  %3144 = vmatprep.subr.bf16.mxu1 %v3143_v6  ;;  %v1475_v30 = vld [vmem:[#allocation12 + $0x90] sm:$0xff]  ;;  %v3121_v32 = vpack.c.bf16 %v1485_v24, %v1481_v23 }
 0x503   :  { %3114 = vmatpush1.bf16.msra.mxu0 %v3113_v7  ;;  %v1494_v26 = vld [vmem:[#allocation12 + $0x128] sm:$0xff]  ;;  %v1480_v29 = vld [vmem:[#allocation12 + $0xb8] sm:$0xff]  ;;  %v1479_v31 = vld [vmem:[#allocation12 + $0xb0] sm:$0xff] }
 0x504   :  { %3116 = vmatprep.subr.bf16.mxu0 %v3115_v10  ;;  %v1489_v33 = vld [vmem:[#allocation12 + $0x100] sm:$0xff]  ;;  %v3147_v35 = vpack.c.bf16 %v1480_v29, %v1476_v28  ;;  %v3123_v36 = vpack.c.bf16 %v1494_v26, %v1490_v5  ;;  %3146 = vmatpush1.bf16.msra.mxu1 %v3145_v27  ;;  %v1498_v37 = vld [vmem:[#allocation12 + $0x148] sm:$0xff]  ;;  %v3149_v38 = vpack.c.bf16 %v1479_v31, %v1475_v30  ;;  %v1484_v39 = vld [vmem:[#allocation12 + $0xd8] sm:$0xff] }
 0x505   :  { %v1493_v34 = vld [vmem:[#allocation12 + $0x120] sm:$0xff]  ;;  %v1488_v40 = vld [vmem:[#allocation12 + $0xf8] sm:$0xff]  ;;  %v1502_v41 = vld [vmem:[#allocation12 + $0x168] sm:$0xff] }
 0x506   :  { %3148 = vmatprep.subr.bf16.mxu1 %v3147_v35  ;;  %v3151_v63 = vpack.c.bf16 %v1488_v40, %v1484_v39  ;;  %v1483_v42 = vld [vmem:[#allocation12 + $0xd0] sm:$0xff]  ;;  %v3125_v44 = vpack.c.bf16 %v1493_v34, %v1489_v33  ;;  %v1492_v45 = vld [vmem:[#allocation12 + $0x118] sm:$0xff]  ;;  %v3127_v47 = vpack.c.bf16 %v1502_v41, %v1498_v37  ;;  %v1497_v48 = vld [vmem:[#allocation12 + $0x140] sm:$0xff] }
 0x507   :  { %3118 = vmatpush1.bf16.msra.mxu0 %v3117_v51  ;;  %v1487_v43 = vld [vmem:[#allocation12 + $0xf0] sm:$0xff]  ;;  %v1496_v46 = vld [vmem:[#allocation12 + $0x138] sm:$0xff]  ;;  %v1501_v49 = vld [vmem:[#allocation12 + $0x160] sm:$0xff] }
 0x508   :  { %3120 = vmatprep.subr.bf16.mxu0 %v3119_v21  ;;  %3150 = vmatpush1.bf16.msra.mxu1 %v3149_v38  ;;  %v1506_v50 = vld [vmem:[#allocation12 + $0x188] sm:$0xff]  ;;  %v3153_v52 = vpack.c.bf16 %v1487_v43, %v1483_v42  ;;  %v3155_v54 = vpack.c.bf16 %v1496_v46, %v1492_v45  ;;  %v1491_v55 = vld [vmem:[#allocation12 + $0x110] sm:$0xff]  ;;  %v1500_v57 = vld [vmem:[#allocation12 + $0x158] sm:$0xff]  ;;  %v3129_v59 = vpack.c.bf16 %v1501_v49, %v1497_v48 }
 0x509   :  { %v1510_v53 = vld [vmem:[#allocation12 + $0x1a8] sm:$0xff]  ;;  %3152 = vmatprep.subr.bf16.mxu1 %v3151_v63  ;;  %v1495_v56 = vld [vmem:[#allocation12 + $0x130] sm:$0xff]  ;;  %v1504_v58 = vld [vmem:[#allocation12 + $0x178] sm:$0xff] }
 0x50a   :  { %v3131_v60 = vpack.c.bf16 %v1510_v53, %v1506_v50  ;;  %v1505_v61 = vld [vmem:[#allocation12 + $0x180] sm:$0xff]  ;;  %v1514_v1 = vld [vmem:[#allocation12 + $0x1c8] sm:$0xff]  ;;  %v3157_v3 = vpack.c.bf16 %v1495_v56, %v1491_v55  ;;  %v3159_v7 = vpack.c.bf16 %v1504_v58, %v1500_v57  ;;  %v1499_v8 = vld [vmem:[#allocation12 + $0x150] sm:$0xff] }
 0x50b   :  { %3122 = vmatpush1.bf16.msra.mxu0 %v3121_v32  ;;  %v1509_v62 = vld [vmem:[#allocation12 + $0x1a0] sm:$0xff]  ;;  %v1518_v4 = vld [vmem:[#allocation12 + $0x1e8] sm:$0xff]  ;;  %v1503_v9 = vld [vmem:[#allocation12 + $0x170] sm:$0xff] }
 0x50c   :  { %3124 = vmatprep.subr.bf16.mxu0 %v3123_v36  ;;  %3154 = vmatpush1.bf16.msra.mxu1 %v3153_v52  ;;  %v1508_v10 = vld [vmem:[#allocation12 + $0x198] sm:$0xff]  ;;  %v3133_v12 = vpack.c.bf16 %v1509_v62, %v1505_v61  ;;  %v3135_v13 = vpack.c.bf16 %v1518_v4, %v1514_v1  ;;  %v1513_v14 = vld [vmem:[#allocation12 + $0x1c0] sm:$0xff]  ;;  %v3161_v16 = vpack.c.bf16 %v1503_v9, %v1499_v8  ;;  %v1507_v18 = vld [vmem:[#allocation12 + $0x190] sm:$0xff] }
 0x50d   :  { %3156 = vmatprep.subr.bf16.mxu1 %v3155_v54  ;;  %v1512_v11 = vld [vmem:[#allocation12 + $0x1b8] sm:$0xff]  ;;  %v1517_v15 = vld [vmem:[#allocation12 + $0x1e0] sm:$0xff]  ;;  %v1511_v51 = vld [vmem:[#allocation12 + $0x1b0] sm:$0xff] }
 0x50e   :  { %v3163_v17 = vpack.c.bf16 %v1512_v11, %v1508_v10  ;;  %v1516_v19 = vld [vmem:[#allocation12 + $0x1d8] sm:$0xff]  ;;  %v3137_v20 = vpack.c.bf16 %v1517_v15, %v1513_v14  ;;  %v3165_v21 = vpack.c.bf16 %v1511_v51, %v1507_v18  ;;  %v1515_v24 = vld [vmem:[#allocation12 + $0x1d0] sm:$0xff]  ;;  %v1452_v26 = vld [vmem:[#allocation4 + $0x80] sm:$0xff] }
 0x50f   :  { %3126 = vmatpush1.bf16.msra.mxu0 %v3125_v44  ;;  %v1520_v2 = vld [vmem:[#allocation12 + $0x1f8] sm:$0xff]  ;;  %v1519_v6 = vld [vmem:[#allocation12 + $0x1f0] sm:$0xff]  ;;  %v1453_v27 = vld [vmem:[#allocation4 + $0x88] sm:$0xff] }
 0x510   :  { %3128 = vmatprep.subr.bf16.mxu0 %v3127_v47  ;;  %3158 = vmatpush1.bf16.msra.mxu1 %v3157_v3  ;;  %v3167_v23 = vpack.c.bf16 %v1520_v2, %v1516_v19  ;;  %v1456_v25 = vld [vmem:[#allocation2] sm:$0xff]  ;;  %v3169_v5 = vpack.c.bf16 %v1519_v6, %v1515_v24  ;;  %v1455_v34 = vld [vmem:[#allocation4 + $0x98] sm:$0xff] }
 0x511   :  { %3160 = vmatprep.subr.bf16.mxu1 %v3159_v7  ;;  %v1454_v38 = vld [vmem:[#allocation4 + $0x90] sm:$0xff]  ;;  %v1686_v46 = vld [vmem:[#allocation3] sm:$0xff] }
 0x513   :  { %3130 = vmatpush1.bf16.msra.mxu0 %v3129_v59 }
 0x514   :  { %3132 = vmatprep.subr.bf16.mxu0 %v3131_v60  ;;  %3162 = vmatpush1.bf16.msra.mxu1 %v3161_v16 }
 0x515   :  { %3164 = vmatprep.subr.bf16.mxu1 %v3163_v17 }
 0x517   :  { %3134 = vmatpush1.bf16.msra.mxu0 %v3133_v12 }
 0x518   :  { %3136 = vmatprep.subr.bf16.mxu0 %v3135_v13  ;;  %3166 = vmatpush1.bf16.msra.mxu1 %v3165_v21 }
 0x519   :  { %3168 = vmatprep.subr.bf16.mxu1 %v3167_v23 }
 0x51b   :  { %3138 = vmatpush1.bf16.msra.mxu0 %v3137_v20 }
 0x51c   :  { %3170 = vmatpush1.bf16.msra.mxu1 %v3169_v5 }
 0x51e   :  { %1586 = vmatmul.mubr.f32.vlgmr.msra.gmra.mrb[0].mxu0 %v1456_v25 }
 0x51f   :  { %1657 = vmatmul.mubr.f32.vlgmr.msra.gmra.mrb[0].mxu1 %v1456_v25 }
 0x5f1   :  { %v1587_v28 = vpop.f32.mrb[0].mxu0 }
 0x5f2   :  { %v1663_v29 = vadd.f32 %v1587_v28, %v1452_v26  ;;  %v1589_v30 = vpop.f32.mrb[1].mxu0  ;;  %v1658_v35 = vpop.f32.mrb[0].mxu1 }
 0x5f3   :  { %v1664_v31 = vadd.f32 %v1589_v30, %v1453_v27  ;;  %v1660_v36 = vpop.f32.mrb[1].mxu1  ;;  %v1665_v40 = vadd.f32 %v1658_v35, %v1454_v38 }
 0x5f4   :  { %v2714_v32 = vmul.f32 -1.442695, %v1663_v29  ;;  %v1666_v37 = vadd.f32 %v1660_v36, %v1455_v34 }
 0x5f5   :  { %v2715_v33 = vmul.f32 -1.442695, %v1664_v31 }
 0x5f6   :  { %3514 = vpow2.f32 %v2714_v32  ;;  %v2716_v39 = vmul.f32 -1.442695, %v1666_v37 }
 0x5f7   :  { %3516 = vpow2.f32 %v2715_v33 }
 0x5f8   :  { %3518 = vpow2.f32 %v2716_v39 }
 0x5f9   :  { %3520 = vtanh.f32 %v1665_v40 }
 0x600   :  { %v3515_v41 = vpop.eup %3514 }
 0x601   :  { %v3517_v63 = vpop.eup %3516  ;;  %v1670_v42 = vadd.f32 1.0, %v3515_v41 }
 0x602   :  { %v1676_v43 = vadd.f32 1.0, %v3517_v63  ;;  %v3519_v44 = vpop.eup %3518 }
 0x603   :  { %3522 = vrcp.f32 %v1670_v42  ;;  %v3521_v45 = vpop.eup %3520  ;;  %v1683_v48 = vadd.f32 1.0, %v3519_v44 }
 0x604   :  { %3524 = vrcp.f32 %v1676_v43 }
 0x605   :  { %3526 = vrcp.f32 %v1683_v48 }
 0x60d   :  { %v3523_v47 = vpop.eup %3522 }
 0x60e   :  { %v3525_v49 = vpop.eup %3524  ;;  %v1688_v50 = vmul.f32 %v3523_v47, %v3521_v45 }
 0x60f   :  { %v1687_v52 = vmul.f32 %v3525_v49, %v1686_v46  ;;  %v3527_v55 = vpop.eup %3526 }
 0x611   :  { %v1689_v53 = vadd.f32 %v1688_v50, %v1687_v52 }
 0x613   :  { %3528 = vtanh.f32 %v1689_v53  ;;  %v1697_v54 = vsel %vm2717_vm5, %v1689_v53, %v1686_v46 }
 0x614   :  { %1698 = vst [vmem:[#allocation3] sm:$0xff] %v1697_v54 }
 0x61d   :  { %v3529_v56 = vpop.eup %3528 }
 0x61e   :  { %v1691_v57 = vmul.f32 %v3529_v56, %v3527_v55 }
 0x620   :  { %v1694_v58 = vsel %vm2717_vm5, %v1691_v57, %v1456_v25 }
 0x621   :  { %1695 = vst [vmem:[#allocation2] sm:$0xff] %v1694_v58 }
 0x622 PF:  { %p2719_p3 = scmp.le.s32.totalorder %s4037_s0, 5 }
 0x623   :  { %v1711_v59 = vld [vmem:[#allocation12 + $0x8] sm:$0xff] (!%p2719_p3)  ;;  %v1710_v61 = vld [vmem:[#allocation12] sm:$0xff] (!%p2719_p3)  ;;  %v3738_v7 = vmov (!%p2719_p3), 0.0   ;;  %v1713_v51 = vld [vmem:[#allocation12 + $0x18] sm:$0xff] (!%p2719_p3)  ;;  %vm2723_vm6 = vcmp.gt.s32.totalorder (!%p2719_p3), %v3969_v22, 5 }
 0x624   :  { %1703 = sbr.rel (%p2719_p3) target bundleno = 1867 (0x74b), region = 85  ;;  %v1715_v60 = vld [vmem:[#allocation12 + $0x28] sm:$0xff] (!%p2719_p3)  ;;  %v1714_v1 = vld [vmem:[#allocation12 + $0x20] sm:$0xff] (!%p2719_p3)  ;;  %1838 = vmatprep.mubr.f32.mxu0 (!%p2719_p3), %v3738_v7  ;;  %1909 = vmatprep.mubr.f32.mxu1 (!%p2719_p3), %v3738_v7  ;;  %v1717_v19 = vld [vmem:[#allocation12 + $0x38] sm:$0xff] (!%p2719_p3) }
 0x625   :  { %v3171_v62 = vpack.c.bf16 (!%p2719_p3), %v1715_v60, %v1711_v59  ;;  %v1719_v3 = vld [vmem:[#allocation12 + $0x48] sm:$0xff] (!%p2719_p3)  ;;  %v3173_v8 = vpack.c.bf16 (!%p2719_p3), %v1714_v1, %v1710_v61  ;;  %v1718_v10 = vld [vmem:[#allocation12 + $0x40] sm:$0xff] (!%p2719_p3)  ;;  %v3203_v20 = vpack.c.bf16 (!%p2719_p3), %v1717_v19, %v1713_v51  ;;  %v1712_v21 = vld [vmem:[#allocation12 + $0x10] sm:$0xff] (!%p2719_p3) }
 0x626   :  { %v1723_v4 = vld [vmem:[#allocation12 + $0x68] sm:$0xff] (!%p2719_p3)  ;;  %v1722_v11 = vld [vmem:[#allocation12 + $0x60] sm:$0xff] (!%p2719_p3)  ;;  %v1716_v23 = vld [vmem:[#allocation12 + $0x30] sm:$0xff] (!%p2719_p3) }
 0x627   :  { %v3175_v9 = vpack.c.bf16 (!%p2719_p3), %v1723_v4, %v1719_v3  ;;  %v1727_v12 = vld [vmem:[#allocation12 + $0x88] sm:$0xff] (!%p2719_p3)  ;;  %3172 = vmatprep.subr.bf16.mxu0 (!%p2719_p3), %v3171_v62  ;;  %v3177_v14 = vpack.c.bf16 (!%p2719_p3), %v1722_v11, %v1718_v10  ;;  %v1726_v15 = vld [vmem:[#allocation12 + $0x80] sm:$0xff] (!%p2719_p3)  ;;  %v3205_v24 = vpack.c.bf16 (!%p2719_p3), %v1716_v23, %v1712_v21  ;;  %3204 = vmatprep.subr.bf16.mxu1 (!%p2719_p3), %v3203_v20  ;;  %v1721_v25 = vld [vmem:[#allocation12 + $0x58] sm:$0xff] (!%p2719_p3) }
 0x628   :  { %v1731_v13 = vld [vmem:[#allocation12 + $0xa8] sm:$0xff] (!%p2719_p3)  ;;  %3174 = vmatpush1.bf16.msra.mxu0 (!%p2719_p3), %v3173_v8  ;;  %v1730_v16 = vld [vmem:[#allocation12 + $0xa0] sm:$0xff] (!%p2719_p3)  ;;  %v1725_v5 = vld [vmem:[#allocation12 + $0x78] sm:$0xff] (!%p2719_p3) }
 0x629   :  { %3176 = vmatprep.subr.bf16.mxu0 (!%p2719_p3), %v3175_v9  ;;  %v3179_v17 = vpack.c.bf16 (!%p2719_p3), %v1731_v13, %v1727_v12  ;;  %v1735_v18 = vld [vmem:[#allocation12 + $0xc8] sm:$0xff] (!%p2719_p3)  ;;  %v3181_v6 = vpack.c.bf16 (!%p2719_p3), %v1730_v16, %v1726_v15  ;;  %v1720_v26 = vld [vmem:[#allocation12 + $0x50] sm:$0xff] (!%p2719_p3)  ;;  %v1734_v28 = vld [vmem:[#allocation12 + $0xc0] sm:$0xff] (!%p2719_p3)  ;;  %3206 = vmatpush1.bf16.msra.mxu1 (!%p2719_p3), %v3205_v24  ;;  %v3207_v30 = vpack.c.bf16 (!%p2719_p3), %v1725_v5, %v1721_v25 }
 0x62a   :  { %v1739_v2 = vld [vmem:[#allocation12 + $0xe8] sm:$0xff] (!%p2719_p3)  ;;  %v1738_v29 = vld [vmem:[#allocation12 + $0xe0] sm:$0xff] (!%p2719_p3)  ;;  %v1724_v31 = vld [vmem:[#allocation12 + $0x70] sm:$0xff] (!%p2719_p3) }
 0x62b   :  { %v3183_v27 = vpack.c.bf16 %v1739_v2, %v1735_v18  ;;  %v1743_v32 = vld [vmem:[#allocation12 + $0x108] sm:$0xff]  ;;  %v3209_v34 = vpack.c.bf16 %v1724_v31, %v1720_v26  ;;  %v1729_v35 = vld [vmem:[#allocation12 + $0x98] sm:$0xff]  ;;  %3208 = vmatprep.subr.bf16.mxu1 %v3207_v30  ;;  %v1728_v37 = vld [vmem:[#allocation12 + $0x90] sm:$0xff]  ;;  %v3185_v39 = vpack.c.bf16 %v1738_v29, %v1734_v28 }
 0x62c   :  { %3178 = vmatpush1.bf16.msra.mxu0 %v3177_v14  ;;  %v1747_v33 = vld [vmem:[#allocation12 + $0x128] sm:$0xff]  ;;  %v1733_v36 = vld [vmem:[#allocation12 + $0xb8] sm:$0xff]  ;;  %v1732_v38 = vld [vmem:[#allocation12 + $0xb0] sm:$0xff] }
 0x62d   :  { %3180 = vmatprep.subr.bf16.mxu0 %v3179_v17  ;;  %v1742_v40 = vld [vmem:[#allocation12 + $0x100] sm:$0xff]  ;;  %v3211_v63 = vpack.c.bf16 %v1733_v36, %v1729_v35  ;;  %v3187_v42 = vpack.c.bf16 %v1747_v33, %v1743_v32  ;;  %3210 = vmatpush1.bf16.msra.mxu1 %v3209_v34  ;;  %v1751_v43 = vld [vmem:[#allocation12 + $0x148] sm:$0xff]  ;;  %v3213_v44 = vpack.c.bf16 %v1732_v38, %v1728_v37  ;;  %v1737_v45 = vld [vmem:[#allocation12 + $0xd8] sm:$0xff] }
 0x62e   :  { %v1746_v41 = vld [vmem:[#allocation12 + $0x120] sm:$0xff]  ;;  %v1741_v46 = vld [vmem:[#allocation12 + $0xf8] sm:$0xff]  ;;  %v1755_v47 = vld [vmem:[#allocation12 + $0x168] sm:$0xff] }
 0x62f   :  { %3212 = vmatprep.subr.bf16.mxu1 %v3211_v63  ;;  %v3215_v48 = vpack.c.bf16 %v1741_v46, %v1737_v45  ;;  %v1736_v49 = vld [vmem:[#allocation12 + $0xd0] sm:$0xff]  ;;  %v3189_v52 = vpack.c.bf16 %v1746_v41, %v1742_v40  ;;  %v1745_v53 = vld [vmem:[#allocation12 + $0x118] sm:$0xff]  ;;  %v3191_v55 = vpack.c.bf16 %v1755_v47, %v1751_v43  ;;  %v1750_v56 = vld [vmem:[#allocation12 + $0x140] sm:$0xff] }
 0x630   :  { %3182 = vmatpush1.bf16.msra.mxu0 %v3181_v6  ;;  %v1740_v50 = vld [vmem:[#allocation12 + $0xf0] sm:$0xff]  ;;  %v1749_v54 = vld [vmem:[#allocation12 + $0x138] sm:$0xff]  ;;  %v1754_v57 = vld [vmem:[#allocation12 + $0x160] sm:$0xff] }
 0x631   :  { %3184 = vmatprep.subr.bf16.mxu0 %v3183_v27  ;;  %3214 = vmatpush1.bf16.msra.mxu1 %v3213_v44  ;;  %v1759_v58 = vld [vmem:[#allocation12 + $0x188] sm:$0xff]  ;;  %v3217_v59 = vpack.c.bf16 %v1740_v50, %v1736_v49  ;;  %v3219_v61 = vpack.c.bf16 %v1749_v54, %v1745_v53  ;;  %v1744_v62 = vld [vmem:[#allocation12 + $0x110] sm:$0xff]  ;;  %v1753_v3 = vld [vmem:[#allocation12 + $0x158] sm:$0xff]  ;;  %v3193_v7 = vpack.c.bf16 %v1754_v57, %v1750_v56 }
 0x632   :  { %v1763_v60 = vld [vmem:[#allocation12 + $0x1a8] sm:$0xff]  ;;  %3216 = vmatprep.subr.bf16.mxu1 %v3215_v48  ;;  %v1748_v1 = vld [vmem:[#allocation12 + $0x130] sm:$0xff]  ;;  %v1757_v4 = vld [vmem:[#allocation12 + $0x178] sm:$0xff] }
 0x633   :  { %v3195_v8 = vpack.c.bf16 %v1763_v60, %v1759_v58  ;;  %v1758_v9 = vld [vmem:[#allocation12 + $0x180] sm:$0xff]  ;;  %v1767_v11 = vld [vmem:[#allocation12 + $0x1c8] sm:$0xff]  ;;  %v3221_v12 = vpack.c.bf16 %v1748_v1, %v1744_v62  ;;  %v3223_v14 = vpack.c.bf16 %v1757_v4, %v1753_v3  ;;  %v1752_v15 = vld [vmem:[#allocation12 + $0x150] sm:$0xff] }
 0x634   :  { %3186 = vmatpush1.bf16.msra.mxu0 %v3185_v39  ;;  %v1762_v10 = vld [vmem:[#allocation12 + $0x1a0] sm:$0xff]  ;;  %v1771_v13 = vld [vmem:[#allocation12 + $0x1e8] sm:$0xff]  ;;  %v1756_v16 = vld [vmem:[#allocation12 + $0x170] sm:$0xff] }
 0x635   :  { %3188 = vmatprep.subr.bf16.mxu0 %v3187_v42  ;;  %3218 = vmatpush1.bf16.msra.mxu1 %v3217_v59  ;;  %v1761_v17 = vld [vmem:[#allocation12 + $0x198] sm:$0xff]  ;;  %v3197_v51 = vpack.c.bf16 %v1762_v10, %v1758_v9  ;;  %v3199_v19 = vpack.c.bf16 %v1771_v13, %v1767_v11  ;;  %v1766_v2 = vld [vmem:[#allocation12 + $0x1c0] sm:$0xff]  ;;  %v3225_v21 = vpack.c.bf16 %v1756_v16, %v1752_v15  ;;  %v1760_v24 = vld [vmem:[#allocation12 + $0x190] sm:$0xff] }
 0x636   :  { %3220 = vmatprep.subr.bf16.mxu1 %v3219_v61  ;;  %v1765_v18 = vld [vmem:[#allocation12 + $0x1b8] sm:$0xff]  ;;  %v1770_v20 = vld [vmem:[#allocation12 + $0x1e0] sm:$0xff]  ;;  %v1764_v6 = vld [vmem:[#allocation12 + $0x1b0] sm:$0xff] }
 0x637   :  { %v3227_v23 = vpack.c.bf16 %v1765_v18, %v1761_v17  ;;  %v1769_v25 = vld [vmem:[#allocation12 + $0x1d8] sm:$0xff]  ;;  %v3201_v26 = vpack.c.bf16 %v1770_v20, %v1766_v2  ;;  %v3229_v27 = vpack.c.bf16 %v1764_v6, %v1760_v24  ;;  %v1768_v29 = vld [vmem:[#allocation12 + $0x1d0] sm:$0xff]  ;;  %v1705_v33 = vld [vmem:[#allocation4 + $0xa0] sm:$0xff] }
 0x638   :  { %3190 = vmatpush1.bf16.msra.mxu0 %v3189_v52  ;;  %v1773_v5 = vld [vmem:[#allocation12 + $0x1f8] sm:$0xff]  ;;  %v1772_v30 = vld [vmem:[#allocation12 + $0x1f0] sm:$0xff]  ;;  %v1706_v34 = vld [vmem:[#allocation4 + $0xa8] sm:$0xff] }
 0x639   :  { %3192 = vmatprep.subr.bf16.mxu0 %v3191_v55  ;;  %3222 = vmatpush1.bf16.msra.mxu1 %v3221_v12  ;;  %v3231_v28 = vpack.c.bf16 %v1773_v5, %v1769_v25  ;;  %v1709_v31 = vld [vmem:[#allocation2] sm:$0xff]  ;;  %v3233_v32 = vpack.c.bf16 %v1772_v30, %v1768_v29  ;;  %v1708_v41 = vld [vmem:[#allocation4 + $0xb8] sm:$0xff] }
 0x63a   :  { %3224 = vmatprep.subr.bf16.mxu1 %v3223_v14  ;;  %v1707_v44 = vld [vmem:[#allocation4 + $0xb0] sm:$0xff]  ;;  %v1939_v54 = vld [vmem:[#allocation3] sm:$0xff] }
 0x63c   :  { %3194 = vmatpush1.bf16.msra.mxu0 %v3193_v7 }
 0x63d   :  { %3196 = vmatprep.subr.bf16.mxu0 %v3195_v8  ;;  %3226 = vmatpush1.bf16.msra.mxu1 %v3225_v21 }
 0x63e   :  { %3228 = vmatprep.subr.bf16.mxu1 %v3227_v23 }
 0x640   :  { %3198 = vmatpush1.bf16.msra.mxu0 %v3197_v51 }
 0x641   :  { %3200 = vmatprep.subr.bf16.mxu0 %v3199_v19  ;;  %3230 = vmatpush1.bf16.msra.mxu1 %v3229_v27 }
 0x642   :  { %3232 = vmatprep.subr.bf16.mxu1 %v3231_v28 }
 0x644   :  { %3202 = vmatpush1.bf16.msra.mxu0 %v3201_v26 }
 0x645   :  { %3234 = vmatpush1.bf16.msra.mxu1 %v3233_v32 }
 0x647   :  { %1839 = vmatmul.mubr.f32.vlgmr.msra.gmra.mrb[0].mxu0 %v1709_v31 }
 0x648   :  { %1910 = vmatmul.mubr.f32.vlgmr.msra.gmra.mrb[0].mxu1 %v1709_v31 }
 0x71a   :  { %v1840_v35 = vpop.f32.mrb[0].mxu0 }
 0x71b   :  { %v1916_v36 = vadd.f32 %v1840_v35, %v1705_v33  ;;  %v1842_v37 = vpop.f32.mrb[1].mxu0  ;;  %v1911_v63 = vpop.f32.mrb[0].mxu1 }
 0x71c   :  { %v1917_v38 = vadd.f32 %v1842_v37, %v1706_v34  ;;  %v1913_v42 = vpop.f32.mrb[1].mxu1  ;;  %v1918_v46 = vadd.f32 %v1911_v63, %v1707_v44 }
 0x71d   :  { %v2720_v39 = vmul.f32 -1.442695, %v1916_v36  ;;  %v1919_v43 = vadd.f32 %v1913_v42, %v1708_v41 }
 0x71e   :  { %v2721_v40 = vmul.f32 -1.442695, %v1917_v38 }
 0x71f   :  { %3530 = vpow2.f32 %v2720_v39  ;;  %v2722_v45 = vmul.f32 -1.442695, %v1919_v43 }
 0x720   :  { %3532 = vpow2.f32 %v2721_v40 }
 0x721   :  { %3534 = vpow2.f32 %v2722_v45 }
 0x722   :  { %3536 = vtanh.f32 %v1918_v46 }
 0x729   :  { %v3531_v47 = vpop.eup %3530 }
 0x72a   :  { %v3533_v48 = vpop.eup %3532  ;;  %v1923_v49 = vadd.f32 1.0, %v3531_v47 }
 0x72b   :  { %v1929_v50 = vadd.f32 1.0, %v3533_v48  ;;  %v3535_v52 = vpop.eup %3534 }
 0x72c   :  { %3538 = vrcp.f32 %v1923_v49  ;;  %v3537_v53 = vpop.eup %3536  ;;  %v1936_v56 = vadd.f32 1.0, %v3535_v52 }
 0x72d   :  { %3540 = vrcp.f32 %v1929_v50 }
 0x72e   :  { %3542 = vrcp.f32 %v1936_v56 }
 0x736   :  { %v3539_v55 = vpop.eup %3538 }
 0x737   :  { %v3541_v57 = vpop.eup %3540  ;;  %v1941_v58 = vmul.f32 %v3539_v55, %v3537_v53 }
 0x738   :  { %v1940_v59 = vmul.f32 %v3541_v57, %v1939_v54  ;;  %v3543_v62 = vpop.eup %3542 }
 0x73a   :  { %v1942_v60 = vadd.f32 %v1941_v58, %v1940_v59 }
 0x73c   :  { %3544 = vtanh.f32 %v1942_v60  ;;  %v1950_v61 = vsel %vm2723_vm6, %v1942_v60, %v1939_v54 }
 0x73d   :  { %1951 = vst [vmem:[#allocation3] sm:$0xff] %v1950_v61 }
 0x746   :  { %v3545_v1 = vpop.eup %3544 }
 0x747   :  { %v1944_v3 = vmul.f32 %v3545_v1, %v3543_v62 }
 0x749   :  { %v1947_v4 = vsel %vm2723_vm6, %v1944_v3, %v1709_v31 }
 0x74a   :  { %1948 = vst [vmem:[#allocation2] sm:$0xff] %v1947_v4 }
 0x74b PF:  { %p2725_p4 = scmp.le.s32.totalorder %s4037_s0, 6 }
 0x74c   :  { %v1964_v7 = vld [vmem:[#allocation12 + $0x8] sm:$0xff] (!%p2725_p4)  ;;  %v1963_v9 = vld [vmem:[#allocation12] sm:$0xff] (!%p2725_p4)  ;;  %v3739_v14 = vmov (!%p2725_p4), 0.0   ;;  %v1966_v6 = vld [vmem:[#allocation12 + $0x18] sm:$0xff] (!%p2725_p4)  ;;  %vm2729_vm7 = vcmp.gt.s32.totalorder (!%p2725_p4), %v3969_v22, 6 }
 0x74d   :  { %1956 = sbr.rel (%p2725_p4) target bundleno = 2164 (0x874), region = 89  ;;  %v1968_v8 = vld [vmem:[#allocation12 + $0x28] sm:$0xff] (!%p2725_p4)  ;;  %v1967_v11 = vld [vmem:[#allocation12 + $0x20] sm:$0xff] (!%p2725_p4)  ;;  %2091 = vmatprep.mubr.f32.mxu0 (!%p2725_p4), %v3739_v14  ;;  %2162 = vmatprep.mubr.f32.mxu1 (!%p2725_p4), %v3739_v14  ;;  %v1970_v25 = vld [vmem:[#allocation12 + $0x38] sm:$0xff] (!%p2725_p4) }
 0x74e   :  { %v3235_v10 = vpack.c.bf16 (!%p2725_p4), %v1968_v8, %v1964_v7  ;;  %v1972_v12 = vld [vmem:[#allocation12 + $0x48] sm:$0xff] (!%p2725_p4)  ;;  %v3237_v15 = vpack.c.bf16 (!%p2725_p4), %v1967_v11, %v1963_v9  ;;  %v1971_v17 = vld [vmem:[#allocation12 + $0x40] sm:$0xff] (!%p2725_p4)  ;;  %v3267_v26 = vpack.c.bf16 (!%p2725_p4), %v1970_v25, %v1966_v6  ;;  %v1965_v27 = vld [vmem:[#allocation12 + $0x10] sm:$0xff] (!%p2725_p4) }
 0x74f   :  { %v1976_v13 = vld [vmem:[#allocation12 + $0x68] sm:$0xff] (!%p2725_p4)  ;;  %v1975_v18 = vld [vmem:[#allocation12 + $0x60] sm:$0xff] (!%p2725_p4)  ;;  %v1969_v28 = vld [vmem:[#allocation12 + $0x30] sm:$0xff] (!%p2725_p4) }
 0x750   :  { %v3239_v16 = vpack.c.bf16 (!%p2725_p4), %v1976_v13, %v1972_v12  ;;  %v1980_v51 = vld [vmem:[#allocation12 + $0x88] sm:$0xff] (!%p2725_p4)  ;;  %3236 = vmatprep.subr.bf16.mxu0 (!%p2725_p4), %v3235_v10  ;;  %v3241_v2 = vpack.c.bf16 (!%p2725_p4), %v1975_v18, %v1971_v17  ;;  %v1979_v20 = vld [vmem:[#allocation12 + $0x80] sm:$0xff] (!%p2725_p4)  ;;  %v3269_v29 = vpack.c.bf16 (!%p2725_p4), %v1969_v28, %v1965_v27  ;;  %3268 = vmatprep.subr.bf16.mxu1 (!%p2725_p4), %v3267_v26  ;;  %v1974_v31 = vld [vmem:[#allocation12 + $0x58] sm:$0xff] (!%p2725_p4) }
 0x751   :  { %v1984_v19 = vld [vmem:[#allocation12 + $0xa8] sm:$0xff] (!%p2725_p4)  ;;  %3238 = vmatpush1.bf16.msra.mxu0 (!%p2725_p4), %v3237_v15  ;;  %v1983_v21 = vld [vmem:[#allocation12 + $0xa0] sm:$0xff] (!%p2725_p4)  ;;  %v1978_v32 = vld [vmem:[#allocation12 + $0x78] sm:$0xff] (!%p2725_p4) }
 0x752   :  { %3240 = vmatprep.subr.bf16.mxu0 (!%p2725_p4), %v3239_v16  ;;  %v3243_v23 = vpack.c.bf16 (!%p2725_p4), %v1984_v19, %v1980_v51  ;;  %v1988_v24 = vld [vmem:[#allocation12 + $0xc8] sm:$0xff] (!%p2725_p4)  ;;  %v3245_v30 = vpack.c.bf16 (!%p2725_p4), %v1983_v21, %v1979_v20  ;;  %v1973_v33 = vld [vmem:[#allocation12 + $0x50] sm:$0xff] (!%p2725_p4)  ;;  %v1987_v35 = vld [vmem:[#allocation12 + $0xc0] sm:$0xff] (!%p2725_p4)  ;;  %3270 = vmatpush1.bf16.msra.mxu1 (!%p2725_p4), %v3269_v29  ;;  %v3271_v37 = vpack.c.bf16 (!%p2725_p4), %v1978_v32, %v1974_v31 }
 0x753   :  { %v1992_v5 = vld [vmem:[#allocation12 + $0xe8] sm:$0xff] (!%p2725_p4)  ;;  %v1991_v36 = vld [vmem:[#allocation12 + $0xe0] sm:$0xff] (!%p2725_p4)  ;;  %v1977_v38 = vld [vmem:[#allocation12 + $0x70] sm:$0xff] (!%p2725_p4) }
 0x754   :  { %v3247_v34 = vpack.c.bf16 %v1992_v5, %v1988_v24  ;;  %v1996_v39 = vld [vmem:[#allocation12 + $0x108] sm:$0xff]  ;;  %v3273_v41 = vpack.c.bf16 %v1977_v38, %v1973_v33  ;;  %v1982_v63 = vld [vmem:[#allocation12 + $0x98] sm:$0xff]  ;;  %3272 = vmatprep.subr.bf16.mxu1 %v3271_v37  ;;  %v1981_v43 = vld [vmem:[#allocation12 + $0x90] sm:$0xff]  ;;  %v3249_v45 = vpack.c.bf16 %v1991_v36, %v1987_v35 }
 0x755   :  { %3242 = vmatpush1.bf16.msra.mxu0 %v3241_v2  ;;  %v2000_v40 = vld [vmem:[#allocation12 + $0x128] sm:$0xff]  ;;  %v1986_v42 = vld [vmem:[#allocation12 + $0xb8] sm:$0xff]  ;;  %v1985_v44 = vld [vmem:[#allocation12 + $0xb0] sm:$0xff] }
 0x756   :  { %3244 = vmatprep.subr.bf16.mxu0 %v3243_v23  ;;  %v1995_v46 = vld [vmem:[#allocation12 + $0x100] sm:$0xff]  ;;  %v3275_v48 = vpack.c.bf16 %v1986_v42, %v1982_v63  ;;  %v3251_v49 = vpack.c.bf16 %v2000_v40, %v1996_v39  ;;  %3274 = vmatpush1.bf16.msra.mxu1 %v3273_v41  ;;  %v2004_v50 = vld [vmem:[#allocation12 + $0x148] sm:$0xff]  ;;  %v3277_v52 = vpack.c.bf16 %v1985_v44, %v1981_v43  ;;  %v1990_v53 = vld [vmem:[#allocation12 + $0xd8] sm:$0xff] }
 0x757   :  { %v1999_v47 = vld [vmem:[#allocation12 + $0x120] sm:$0xff]  ;;  %v1994_v54 = vld [vmem:[#allocation12 + $0xf8] sm:$0xff]  ;;  %v2008_v55 = vld [vmem:[#allocation12 + $0x168] sm:$0xff] }
 0x758   :  { %3276 = vmatprep.subr.bf16.mxu1 %v3275_v48  ;;  %v3279_v56 = vpack.c.bf16 %v1994_v54, %v1990_v53  ;;  %v1989_v57 = vld [vmem:[#allocation12 + $0xd0] sm:$0xff]  ;;  %v3253_v59 = vpack.c.bf16 %v1999_v47, %v1995_v46  ;;  %v1998_v60 = vld [vmem:[#allocation12 + $0x118] sm:$0xff]  ;;  %v3255_v62 = vpack.c.bf16 %v2008_v55, %v2004_v50  ;;  %v2003_v1 = vld [vmem:[#allocation12 + $0x140] sm:$0xff] }
 0x759   :  { %3246 = vmatpush1.bf16.msra.mxu0 %v3245_v30  ;;  %v1993_v58 = vld [vmem:[#allocation12 + $0xf0] sm:$0xff]  ;;  %v2002_v61 = vld [vmem:[#allocation12 + $0x138] sm:$0xff]  ;;  %v2007_v3 = vld [vmem:[#allocation12 + $0x160] sm:$0xff] }
 0x75a   :  { %3248 = vmatprep.subr.bf16.mxu0 %v3247_v34  ;;  %3278 = vmatpush1.bf16.msra.mxu1 %v3277_v52  ;;  %v2012_v4 = vld [vmem:[#allocation12 + $0x188] sm:$0xff]  ;;  %v3281_v7 = vpack.c.bf16 %v1993_v58, %v1989_v57  ;;  %v3283_v9 = vpack.c.bf16 %v2002_v61, %v1998_v60  ;;  %v1997_v10 = vld [vmem:[#allocation12 + $0x110] sm:$0xff]  ;;  %v2006_v12 = vld [vmem:[#allocation12 + $0x158] sm:$0xff]  ;;  %v3257_v14 = vpack.c.bf16 %v2007_v3, %v2003_v1 }
 0x75b   :  { %v2016_v8 = vld [vmem:[#allocation12 + $0x1a8] sm:$0xff]  ;;  %3280 = vmatprep.subr.bf16.mxu1 %v3279_v56  ;;  %v2001_v11 = vld [vmem:[#allocation12 + $0x130] sm:$0xff]  ;;  %v2010_v13 = vld [vmem:[#allocation12 + $0x178] sm:$0xff] }
 0x75c   :  { %v3259_v15 = vpack.c.bf16 %v2016_v8, %v2012_v4  ;;  %v2011_v16 = vld [vmem:[#allocation12 + $0x180] sm:$0xff]  ;;  %v2020_v18 = vld [vmem:[#allocation12 + $0x1c8] sm:$0xff]  ;;  %v3285_v51 = vpack.c.bf16 %v2001_v11, %v1997_v10  ;;  %v3287_v2 = vpack.c.bf16 %v2010_v13, %v2006_v12  ;;  %v2005_v20 = vld [vmem:[#allocation12 + $0x150] sm:$0xff] }
 0x75d   :  { %3250 = vmatpush1.bf16.msra.mxu0 %v3249_v45  ;;  %v2015_v17 = vld [vmem:[#allocation12 + $0x1a0] sm:$0xff]  ;;  %v2024_v19 = vld [vmem:[#allocation12 + $0x1e8] sm:$0xff]  ;;  %v2009_v21 = vld [vmem:[#allocation12 + $0x170] sm:$0xff] }
 0x75e   :  { %3252 = vmatprep.subr.bf16.mxu0 %v3251_v49  ;;  %3282 = vmatpush1.bf16.msra.mxu1 %v3281_v7  ;;  %v2014_v23 = vld [vmem:[#allocation12 + $0x198] sm:$0xff]  ;;  %v3261_v6 = vpack.c.bf16 %v2015_v17, %v2011_v16  ;;  %v3263_v25 = vpack.c.bf16 %v2024_v19, %v2020_v18  ;;  %v2019_v5 = vld [vmem:[#allocation12 + $0x1c0] sm:$0xff]  ;;  %v3289_v27 = vpack.c.bf16 %v2009_v21, %v2005_v20  ;;  %v2013_v29 = vld [vmem:[#allocation12 + $0x190] sm:$0xff] }
 0x75f   :  { %3284 = vmatprep.subr.bf16.mxu1 %v3283_v9  ;;  %v2018_v24 = vld [vmem:[#allocation12 + $0x1b8] sm:$0xff]  ;;  %v2023_v26 = vld [vmem:[#allocation12 + $0x1e0] sm:$0xff]  ;;  %v2017_v30 = vld [vmem:[#allocation12 + $0x1b0] sm:$0xff] }
 0x760   :  { %v3291_v28 = vpack.c.bf16 %v2018_v24, %v2014_v23  ;;  %v2022_v31 = vld [vmem:[#allocation12 + $0x1d8] sm:$0xff]  ;;  %v3265_v33 = vpack.c.bf16 %v2023_v26, %v2019_v5  ;;  %v3293_v34 = vpack.c.bf16 %v2017_v30, %v2013_v29  ;;  %v2021_v36 = vld [vmem:[#allocation12 + $0x1d0] sm:$0xff]  ;;  %v1958_v40 = vld [vmem:[#allocation4 + $0xc0] sm:$0xff] }
 0x761   :  { %3254 = vmatpush1.bf16.msra.mxu0 %v3253_v59  ;;  %v2026_v32 = vld [vmem:[#allocation12 + $0x1f8] sm:$0xff]  ;;  %v2025_v37 = vld [vmem:[#allocation12 + $0x1f0] sm:$0xff]  ;;  %v1959_v41 = vld [vmem:[#allocation4 + $0xc8] sm:$0xff] }
 0x762   :  { %3256 = vmatprep.subr.bf16.mxu0 %v3255_v62  ;;  %3286 = vmatpush1.bf16.msra.mxu1 %v3285_v51  ;;  %v3295_v35 = vpack.c.bf16 %v2026_v32, %v2022_v31  ;;  %v1962_v38 = vld [vmem:[#allocation2] sm:$0xff]  ;;  %v3297_v39 = vpack.c.bf16 %v2025_v37, %v2021_v36  ;;  %v1961_v47 = vld [vmem:[#allocation4 + $0xd8] sm:$0xff] }
 0x763   :  { %3288 = vmatprep.subr.bf16.mxu1 %v3287_v2  ;;  %v1960_v52 = vld [vmem:[#allocation4 + $0xd0] sm:$0xff]  ;;  %v2192_v61 = vld [vmem:[#allocation3] sm:$0xff] }
 0x765   :  { %3258 = vmatpush1.bf16.msra.mxu0 %v3257_v14 }
 0x766   :  { %3260 = vmatprep.subr.bf16.mxu0 %v3259_v15  ;;  %3290 = vmatpush1.bf16.msra.mxu1 %v3289_v27 }
 0x767   :  { %3292 = vmatprep.subr.bf16.mxu1 %v3291_v28 }
 0x769   :  { %3262 = vmatpush1.bf16.msra.mxu0 %v3261_v6 }
 0x76a   :  { %3264 = vmatprep.subr.bf16.mxu0 %v3263_v25  ;;  %3294 = vmatpush1.bf16.msra.mxu1 %v3293_v34 }
 0x76b   :  { %3296 = vmatprep.subr.bf16.mxu1 %v3295_v35 }
 0x76d   :  { %3266 = vmatpush1.bf16.msra.mxu0 %v3265_v33 }
 0x76e   :  { %3298 = vmatpush1.bf16.msra.mxu1 %v3297_v39 }
 0x770   :  { %2092 = vmatmul.mubr.f32.vlgmr.msra.gmra.mrb[0].mxu0 %v1962_v38 }
 0x771   :  { %2163 = vmatmul.mubr.f32.vlgmr.msra.gmra.mrb[0].mxu1 %v1962_v38 }
 0x843   :  { %v2093_v63 = vpop.f32.mrb[0].mxu0 }
 0x844   :  { %v2169_v42 = vadd.f32 %v2093_v63, %v1958_v40  ;;  %v2095_v43 = vpop.f32.mrb[1].mxu0  ;;  %v2164_v48 = vpop.f32.mrb[0].mxu1 }
 0x845   :  { %v2170_v44 = vadd.f32 %v2095_v43, %v1959_v41  ;;  %v2166_v49 = vpop.f32.mrb[1].mxu1  ;;  %v2171_v54 = vadd.f32 %v2164_v48, %v1960_v52 }
 0x846   :  { %v2726_v45 = vmul.f32 -1.442695, %v2169_v42  ;;  %v2172_v50 = vadd.f32 %v2166_v49, %v1961_v47 }
 0x847   :  { %v2727_v46 = vmul.f32 -1.442695, %v2170_v44 }
 0x848   :  { %3546 = vpow2.f32 %v2726_v45  ;;  %v2728_v53 = vmul.f32 -1.442695, %v2172_v50 }
 0x849   :  { %3548 = vpow2.f32 %v2727_v46 }
 0x84a   :  { %3550 = vpow2.f32 %v2728_v53 }
 0x84b   :  { %3552 = vtanh.f32 %v2171_v54 }
 0x852   :  { %v3547_v55 = vpop.eup %3546 }
 0x853   :  { %v3549_v56 = vpop.eup %3548  ;;  %v2176_v57 = vadd.f32 1.0, %v3547_v55 }
 0x854   :  { %v2182_v58 = vadd.f32 1.0, %v3549_v56  ;;  %v3551_v59 = vpop.eup %3550 }
 0x855   :  { %3554 = vrcp.f32 %v2176_v57  ;;  %v3553_v60 = vpop.eup %3552  ;;  %v2189_v1 = vadd.f32 1.0, %v3551_v59 }
 0x856   :  { %3556 = vrcp.f32 %v2182_v58 }
 0x857   :  { %3558 = vrcp.f32 %v2189_v1 }
 0x85f   :  { %v3555_v62 = vpop.eup %3554 }
 0x860   :  { %v3557_v3 = vpop.eup %3556  ;;  %v2194_v4 = vmul.f32 %v3555_v62, %v3553_v60 }
 0x861   :  { %v2193_v7 = vmul.f32 %v3557_v3, %v2192_v61  ;;  %v3559_v10 = vpop.eup %3558 }
 0x863   :  { %v2195_v8 = vadd.f32 %v2194_v4, %v2193_v7 }
 0x865   :  { %3560 = vtanh.f32 %v2195_v8  ;;  %v2203_v9 = vsel %vm2729_vm7, %v2195_v8, %v2192_v61 }
 0x866   :  { %2204 = vst [vmem:[#allocation3] sm:$0xff] %v2203_v9 }
 0x86f   :  { %v3561_v11 = vpop.eup %3560 }
 0x870   :  { %v2197_v12 = vmul.f32 %v3561_v11, %v3559_v10 }
 0x872   :  { %v2200_v13 = vsel %vm2729_vm7, %v2197_v12, %v1962_v38 }
 0x873   :  { %2201 = vst [vmem:[#allocation2] sm:$0xff] %v2200_v13 }
 0x874 PF:  { %p2731_p5 = scmp.le.s32.totalorder %s4037_s0, 7 }
 0x875   :  { %v2217_v14 = vld [vmem:[#allocation12 + $0x8] sm:$0xff] (!%p2731_p5)  ;;  %v2216_v16 = vld [vmem:[#allocation12] sm:$0xff] (!%p2731_p5)  ;;  %v3740_v2 = vmov (!%p2731_p5), 0.0   ;;  %v2219_v30 = vld [vmem:[#allocation12 + $0x18] sm:$0xff] (!%p2731_p5)  ;;  %vm2735_vm8 = vcmp.gt.s32.totalorder (!%p2731_p5), %v3969_v22, 7 }
 0x876   :  { %2209 = sbr.rel (%p2731_p5) target bundleno = 2461 (0x99d), region = 93  ;;  %v2221_v15 = vld [vmem:[#allocation12 + $0x28] sm:$0xff] (!%p2731_p5)  ;;  %v2220_v18 = vld [vmem:[#allocation12 + $0x20] sm:$0xff] (!%p2731_p5)  ;;  %2344 = vmatprep.mubr.f32.mxu0 (!%p2731_p5), %v3740_v2  ;;  %2415 = vmatprep.mubr.f32.mxu1 (!%p2731_p5), %v3740_v2  ;;  %v2223_v31 = vld [vmem:[#allocation12 + $0x38] sm:$0xff] (!%p2731_p5) }
 0x877   :  { %v3299_v17 = vpack.c.bf16 (!%p2731_p5), %v2221_v15, %v2217_v14  ;;  %v2225_v51 = vld [vmem:[#allocation12 + $0x48] sm:$0xff] (!%p2731_p5)  ;;  %v3301_v20 = vpack.c.bf16 (!%p2731_p5), %v2220_v18, %v2216_v16  ;;  %v2224_v23 = vld [vmem:[#allocation12 + $0x40] sm:$0xff] (!%p2731_p5)  ;;  %v3331_v33 = vpack.c.bf16 (!%p2731_p5), %v2223_v31, %v2219_v30  ;;  %v2218_v34 = vld [vmem:[#allocation12 + $0x10] sm:$0xff] (!%p2731_p5) }
 0x878   :  { %v2229_v19 = vld [vmem:[#allocation12 + $0x68] sm:$0xff] (!%p2731_p5)  ;;  %v2228_v24 = vld [vmem:[#allocation12 + $0x60] sm:$0xff] (!%p2731_p5)  ;;  %v2222_v35 = vld [vmem:[#allocation12 + $0x30] sm:$0xff] (!%p2731_p5) }
 0x879   :  { %v3303_v21 = vpack.c.bf16 (!%p2731_p5), %v2229_v19, %v2225_v51  ;;  %v2233_v6 = vld [vmem:[#allocation12 + $0x88] sm:$0xff] (!%p2731_p5)  ;;  %3300 = vmatprep.subr.bf16.mxu0 (!%p2731_p5), %v3299_v17  ;;  %v3305_v5 = vpack.c.bf16 (!%p2731_p5), %v2228_v24, %v2224_v23  ;;  %v2232_v26 = vld [vmem:[#allocation12 + $0x80] sm:$0xff] (!%p2731_p5)  ;;  %v3333_v36 = vpack.c.bf16 (!%p2731_p5), %v2222_v35, %v2218_v34  ;;  %3332 = vmatprep.subr.bf16.mxu1 (!%p2731_p5), %v3331_v33  ;;  %v2227_v38 = vld [vmem:[#allocation12 + $0x58] sm:$0xff] (!%p2731_p5) }
 0x87a   :  { %v2237_v25 = vld [vmem:[#allocation12 + $0xa8] sm:$0xff] (!%p2731_p5)  ;;  %3302 = vmatpush1.bf16.msra.mxu0 (!%p2731_p5), %v3301_v20  ;;  %v2236_v27 = vld [vmem:[#allocation12 + $0xa0] sm:$0xff] (!%p2731_p5)  ;;  %v2231_v39 = vld [vmem:[#allocation12 + $0x78] sm:$0xff] (!%p2731_p5) }
 0x87b   :  { %3304 = vmatprep.subr.bf16.mxu0 (!%p2731_p5), %v3303_v21  ;;  %v3307_v28 = vpack.c.bf16 (!%p2731_p5), %v2237_v25, %v2233_v6  ;;  %v2241_v29 = vld [vmem:[#allocation12 + $0xc8] sm:$0xff] (!%p2731_p5)  ;;  %v3309_v37 = vpack.c.bf16 (!%p2731_p5), %v2236_v27, %v2232_v26  ;;  %v2226_v40 = vld [vmem:[#allocation12 + $0x50] sm:$0xff] (!%p2731_p5)  ;;  %v2240_v63 = vld [vmem:[#allocation12 + $0xc0] sm:$0xff] (!%p2731_p5)  ;;  %3334 = vmatpush1.bf16.msra.mxu1 (!%p2731_p5), %v3333_v36  ;;  %v3335_v43 = vpack.c.bf16 (!%p2731_p5), %v2231_v39, %v2227_v38 }
 0x87c   :  { %v2245_v32 = vld [vmem:[#allocation12 + $0xe8] sm:$0xff] (!%p2731_p5)  ;;  %v2244_v42 = vld [vmem:[#allocation12 + $0xe0] sm:$0xff] (!%p2731_p5)  ;;  %v2230_v44 = vld [vmem:[#allocation12 + $0x70] sm:$0xff] (!%p2731_p5) }
 0x87d   :  { %v3311_v41 = vpack.c.bf16 %v2245_v32, %v2241_v29  ;;  %v2249_v45 = vld [vmem:[#allocation12 + $0x108] sm:$0xff]  ;;  %v3337_v47 = vpack.c.bf16 %v2230_v44, %v2226_v40  ;;  %v2235_v48 = vld [vmem:[#allocation12 + $0x98] sm:$0xff]  ;;  %3336 = vmatprep.subr.bf16.mxu1 %v3335_v43  ;;  %v2234_v50 = vld [vmem:[#allocation12 + $0x90] sm:$0xff]  ;;  %v3313_v53 = vpack.c.bf16 %v2244_v42, %v2240_v63 }
 0x87e   :  { %3306 = vmatpush1.bf16.msra.mxu0 %v3305_v5  ;;  %v2253_v46 = vld [vmem:[#allocation12 + $0x128] sm:$0xff]  ;;  %v2239_v49 = vld [vmem:[#allocation12 + $0xb8] sm:$0xff]  ;;  %v2238_v52 = vld [vmem:[#allocation12 + $0xb0] sm:$0xff] }
 0x87f   :  { %3308 = vmatprep.subr.bf16.mxu0 %v3307_v28  ;;  %v2248_v54 = vld [vmem:[#allocation12 + $0x100] sm:$0xff]  ;;  %v3339_v56 = vpack.c.bf16 %v2239_v49, %v2235_v48  ;;  %v3315_v57 = vpack.c.bf16 %v2253_v46, %v2249_v45  ;;  %3338 = vmatpush1.bf16.msra.mxu1 %v3337_v47  ;;  %v2257_v58 = vld [vmem:[#allocation12 + $0x148] sm:$0xff]  ;;  %v3341_v59 = vpack.c.bf16 %v2238_v52, %v2234_v50  ;;  %v2243_v60 = vld [vmem:[#allocation12 + $0xd8] sm:$0xff] }
 0x880   :  { %v2252_v55 = vld [vmem:[#allocation12 + $0x120] sm:$0xff]  ;;  %v2247_v61 = vld [vmem:[#allocation12 + $0xf8] sm:$0xff]  ;;  %v2261_v62 = vld [vmem:[#allocation12 + $0x168] sm:$0xff] }
 0x881   :  { %3340 = vmatprep.subr.bf16.mxu1 %v3339_v56  ;;  %v3343_v1 = vpack.c.bf16 %v2247_v61, %v2243_v60  ;;  %v2242_v3 = vld [vmem:[#allocation12 + $0xd0] sm:$0xff]  ;;  %v3317_v7 = vpack.c.bf16 %v2252_v55, %v2248_v54  ;;  %v2251_v8 = vld [vmem:[#allocation12 + $0x118] sm:$0xff]  ;;  %v3319_v10 = vpack.c.bf16 %v2261_v62, %v2257_v58  ;;  %v2256_v11 = vld [vmem:[#allocation12 + $0x140] sm:$0xff] }
 0x882   :  { %3310 = vmatpush1.bf16.msra.mxu0 %v3309_v37  ;;  %v2246_v4 = vld [vmem:[#allocation12 + $0xf0] sm:$0xff]  ;;  %v2255_v9 = vld [vmem:[#allocation12 + $0x138] sm:$0xff]  ;;  %v2260_v12 = vld [vmem:[#allocation12 + $0x160] sm:$0xff] }
 0x883   :  { %3312 = vmatprep.subr.bf16.mxu0 %v3311_v41  ;;  %3342 = vmatpush1.bf16.msra.mxu1 %v3341_v59  ;;  %v2265_v13 = vld [vmem:[#allocation12 + $0x188] sm:$0xff]  ;;  %v3345_v14 = vpack.c.bf16 %v2246_v4, %v2242_v3  ;;  %v3347_v16 = vpack.c.bf16 %v2255_v9, %v2251_v8  ;;  %v2250_v17 = vld [vmem:[#allocation12 + $0x110] sm:$0xff]  ;;  %v2259_v51 = vld [vmem:[#allocation12 + $0x158] sm:$0xff]  ;;  %v3321_v2 = vpack.c.bf16 %v2260_v12, %v2256_v11 }
 0x884   :  { %v2269_v15 = vld [vmem:[#allocation12 + $0x1a8] sm:$0xff]  ;;  %3344 = vmatprep.subr.bf16.mxu1 %v3343_v1  ;;  %v2254_v18 = vld [vmem:[#allocation12 + $0x130] sm:$0xff]  ;;  %v2263_v19 = vld [vmem:[#allocation12 + $0x178] sm:$0xff] }
 0x885   :  { %v3323_v20 = vpack.c.bf16 %v2269_v15, %v2265_v13  ;;  %v2264_v21 = vld [vmem:[#allocation12 + $0x180] sm:$0xff]  ;;  %v2273_v24 = vld [vmem:[#allocation12 + $0x1c8] sm:$0xff]  ;;  %v3349_v6 = vpack.c.bf16 %v2254_v18, %v2250_v17  ;;  %v3351_v5 = vpack.c.bf16 %v2263_v19, %v2259_v51  ;;  %v2258_v26 = vld [vmem:[#allocation12 + $0x150] sm:$0xff] }
 0x886   :  { %3314 = vmatpush1.bf16.msra.mxu0 %v3313_v53  ;;  %v2268_v23 = vld [vmem:[#allocation12 + $0x1a0] sm:$0xff]  ;;  %v2277_v25 = vld [vmem:[#allocation12 + $0x1e8] sm:$0xff]  ;;  %v2262_v27 = vld [vmem:[#allocation12 + $0x170] sm:$0xff] }
 0x887   :  { %3316 = vmatprep.subr.bf16.mxu0 %v3315_v57  ;;  %3346 = vmatpush1.bf16.msra.mxu1 %v3345_v14  ;;  %v2267_v28 = vld [vmem:[#allocation12 + $0x198] sm:$0xff]  ;;  %v3325_v30 = vpack.c.bf16 %v2268_v23, %v2264_v21  ;;  %v3327_v31 = vpack.c.bf16 %v2277_v25, %v2273_v24  ;;  %v2272_v32 = vld [vmem:[#allocation12 + $0x1c0] sm:$0xff]  ;;  %v3353_v34 = vpack.c.bf16 %v2262_v27, %v2258_v26  ;;  %v2266_v36 = vld [vmem:[#allocation12 + $0x190] sm:$0xff] }
 0x888   :  { %3348 = vmatprep.subr.bf16.mxu1 %v3347_v16  ;;  %v2271_v29 = vld [vmem:[#allocation12 + $0x1b8] sm:$0xff]  ;;  %v2276_v33 = vld [vmem:[#allocation12 + $0x1e0] sm:$0xff]  ;;  %v2270_v37 = vld [vmem:[#allocation12 + $0x1b0] sm:$0xff] }
 0x889   :  { %v3355_v35 = vpack.c.bf16 %v2271_v29, %v2267_v28  ;;  %v2275_v38 = vld [vmem:[#allocation12 + $0x1d8] sm:$0xff]  ;;  %v3329_v40 = vpack.c.bf16 %v2276_v33, %v2272_v32  ;;  %v3357_v41 = vpack.c.bf16 %v2270_v37, %v2266_v36  ;;  %v2274_v42 = vld [vmem:[#allocation12 + $0x1d0] sm:$0xff]  ;;  %v2211_v46 = vld [vmem:[#allocation4 + $0xe0] sm:$0xff] }
 0x88a   :  { %3318 = vmatpush1.bf16.msra.mxu0 %v3317_v7  ;;  %v2279_v39 = vld [vmem:[#allocation12 + $0x1f8] sm:$0xff]  ;;  %v2278_v43 = vld [vmem:[#allocation12 + $0x1f0] sm:$0xff]  ;;  %v2212_v47 = vld [vmem:[#allocation4 + $0xe8] sm:$0xff] }
 0x88b   :  { %3320 = vmatprep.subr.bf16.mxu0 %v3319_v10  ;;  %3350 = vmatpush1.bf16.msra.mxu1 %v3349_v6  ;;  %v3359_v63 = vpack.c.bf16 %v2279_v39, %v2275_v38  ;;  %v2215_v44 = vld [vmem:[#allocation2] sm:$0xff]  ;;  %v3361_v45 = vpack.c.bf16 %v2278_v43, %v2274_v42  ;;  %v2214_v55 = vld [vmem:[#allocation4 + $0xf8] sm:$0xff] }
 0x88c   :  { %3352 = vmatprep.subr.bf16.mxu1 %v3351_v5  ;;  %v2213_v59 = vld [vmem:[#allocation4 + $0xf0] sm:$0xff]  ;;  %v2445_v9 = vld [vmem:[#allocation3] sm:$0xff] }
 0x88e   :  { %3322 = vmatpush1.bf16.msra.mxu0 %v3321_v2 }
 0x88f   :  { %3324 = vmatprep.subr.bf16.mxu0 %v3323_v20  ;;  %3354 = vmatpush1.bf16.msra.mxu1 %v3353_v34 }
 0x890   :  { %3356 = vmatprep.subr.bf16.mxu1 %v3355_v35 }
 0x892   :  { %3326 = vmatpush1.bf16.msra.mxu0 %v3325_v30 }
 0x893   :  { %3328 = vmatprep.subr.bf16.mxu0 %v3327_v31  ;;  %3358 = vmatpush1.bf16.msra.mxu1 %v3357_v41 }
 0x894   :  { %3360 = vmatprep.subr.bf16.mxu1 %v3359_v63 }
 0x896   :  { %3330 = vmatpush1.bf16.msra.mxu0 %v3329_v40 }
 0x897   :  { %3362 = vmatpush1.bf16.msra.mxu1 %v3361_v45 }
 0x899   :  { %2345 = vmatmul.mubr.f32.vlgmr.msra.gmra.mrb[0].mxu0 %v2215_v44 }
 0x89a   :  { %2416 = vmatmul.mubr.f32.vlgmr.msra.gmra.mrb[0].mxu1 %v2215_v44 }
 0x96c   :  { %v2346_v48 = vpop.f32.mrb[0].mxu0 }
 0x96d   :  { %v2422_v49 = vadd.f32 %v2346_v48, %v2211_v46  ;;  %v2348_v50 = vpop.f32.mrb[1].mxu0  ;;  %v2417_v56 = vpop.f32.mrb[0].mxu1 }
 0x96e   :  { %v2423_v52 = vadd.f32 %v2348_v50, %v2212_v47  ;;  %v2419_v57 = vpop.f32.mrb[1].mxu1  ;;  %v2424_v61 = vadd.f32 %v2417_v56, %v2213_v59 }
 0x96f   :  { %v2732_v53 = vmul.f32 -1.442695, %v2422_v49  ;;  %v2425_v58 = vadd.f32 %v2419_v57, %v2214_v55 }
 0x970   :  { %v2733_v54 = vmul.f32 -1.442695, %v2423_v52 }
 0x971   :  { %3562 = vpow2.f32 %v2732_v53  ;;  %v2734_v60 = vmul.f32 -1.442695, %v2425_v58 }
 0x972   :  { %3564 = vpow2.f32 %v2733_v54 }
 0x973   :  { %3566 = vpow2.f32 %v2734_v60 }
 0x974   :  { %3568 = vtanh.f32 %v2424_v61 }
 0x97b   :  { %v3563_v62 = vpop.eup %3562 }
 0x97c   :  { %v3565_v1 = vpop.eup %3564  ;;  %v2429_v3 = vadd.f32 1.0, %v3563_v62 }
 0x97d   :  { %v2435_v4 = vadd.f32 1.0, %v3565_v1  ;;  %v3567_v7 = vpop.eup %3566 }
 0x97e   :  { %3570 = vrcp.f32 %v2429_v3  ;;  %v3569_v8 = vpop.eup %3568  ;;  %v2442_v11 = vadd.f32 1.0, %v3567_v7 }
 0x97f   :  { %3572 = vrcp.f32 %v2435_v4 }
 0x980   :  { %3574 = vrcp.f32 %v2442_v11 }
 0x988   :  { %v3571_v10 = vpop.eup %3570 }
 0x989   :  { %v3573_v12 = vpop.eup %3572  ;;  %v2447_v13 = vmul.f32 %v3571_v10, %v3569_v8 }
 0x98a   :  { %v2446_v14 = vmul.f32 %v3573_v12, %v2445_v9  ;;  %v3575_v17 = vpop.eup %3574 }
 0x98c   :  { %v2448_v15 = vadd.f32 %v2447_v13, %v2446_v14 }
 0x98e   :  { %3576 = vtanh.f32 %v2448_v15  ;;  %v2456_v16 = vsel %vm2735_vm8, %v2448_v15, %v2445_v9 }
 0x98f   :  { %2457 = vst [vmem:[#allocation3] sm:$0xff] %v2456_v16 }
 0x998   :  { %v3577_v18 = vpop.eup %3576 }
 0x999   :  { %v2450_v51 = vmul.f32 %v3577_v18, %v3575_v17 }
 0x99b   :  { %v2453_v19 = vsel %vm2735_vm8, %v2450_v51, %v2215_v44 }
 0x99c   :  { %2454 = vst [vmem:[#allocation2] sm:$0xff] %v2453_v19 }
 0x99d PF:  { %v2462_v2 = vld [vmem:[#allocation13] sm:$0xff]  ;;  %v2463_v20 = vld [vmem:[#allocation13 + $0x8] sm:$0xff]  ;;  %v2464_v21 = vld [vmem:[#allocation13 + $0x10] sm:$0xff]  ;;  %v3741_v23 = vmov 0.0|0.0   ;;  %vm3742_vm9 = vmmov 0   ;;  %s3743_s17 = smov [#allocation16]  }
 0x99e   :  { %3363 = vmatprep.subr.bf16.mxu0 %v3741_v23  ;;  %v3364_v24 = vpack.c.bf16 %v2463_v20, %v2462_v2  ;;  %v2465_v22 = vld [vmem:[#allocation13 + $0x18] sm:$0xff]  ;;  %2805 = vmatprep.mubr.msk.f32.mxu0 %vm3742_vm9, %v3731_v0  ;;  %v2466_v25 = vld [vmem:[#allocation13 + $0x20] sm:$0xff]  ;;  %v2467_v5 = vld [vmem:[#allocation13 + $0x28] sm:$0xff]  ;;  %s2661_s3 = sshll.u32 %s3743_s17, 4  ;;  %s2662_s3 = int_to_ptr.vmem [resolvable:$true] %s2661_s3 }
 0x99f   :  { %3387 = vmatprep.subr.bf16.mxu1 %v3741_v23  ;;  %2840 = vmatprep.mubr.msk.f32.mxu1 %vm3742_vm9, %v3731_v0  ;;  %v3367_v6 = vpack.c.bf16 %v2465_v22, %v2464_v21  ;;  %v2555_v26 = vld [vmem:[#allocation15] sm:$0xff]  ;;  %v2556_v27 = vld [vmem:[#allocation15 + $0x8] sm:$0xff]  ;;  %v2557_v28 = vld [vmem:[#allocation15 + $0x10] sm:$0xff]  ;;  %v3370_v30 = vpack.c.bf16 %v2467_v5, %v2466_v25  ;;  %p3697_p7 = scmp.lt.s32.totalorder %s2662_s3, %s2662_s3 }
 0x9a0   :  { %3365 = vmatpush3.bf16.msra.mxu0 %v3364_v24  ;;  %v2558_v29 = vld [vmem:[#allocation15 + $0x18] sm:$0xff]  ;;  %v3388_v31 = vpack.c.bf16 %v2556_v27, %v2555_v26  ;;  %v2468_v32 = vld [vmem:[#allocation13 + $0x30] sm:$0xff]  ;;  %v2559_v0 = vld [vmem:[#allocation15 + $0x20] sm:$0xff] }
 0x9a1   :  { %3366 = vmatprep.subr.bf16.mxu0 %v3741_v23  ;;  %v2469_v33 = vld [vmem:[#allocation13 + $0x38] sm:$0xff]  ;;  %v3391_v34 = vpack.c.bf16 %v2558_v29, %v2557_v28  ;;  %v2560_v35 = vld [vmem:[#allocation15 + $0x28] sm:$0xff]  ;;  %v2470_v37 = vld [vmem:[#allocation13 + $0x40] sm:$0xff] }
 0x9a2   :  { %3389 = vmatpush3.bf16.msra.mxu1 %v3388_v31  ;;  %v3373_v36 = vpack.c.bf16 %v2469_v33, %v2468_v32  ;;  %v2471_v38 = vld [vmem:[#allocation13 + $0x48] sm:$0xff]  ;;  %v3394_v39 = vpack.c.bf16 %v2560_v35, %v2559_v0  ;;  %v2561_v40 = vld [vmem:[#allocation15 + $0x30] sm:$0xff]  ;;  %v2562_v41 = vld [vmem:[#allocation15 + $0x38] sm:$0xff] }
 0x9a3   :  { %3390 = vmatprep.subr.bf16.mxu1 %v3741_v23  ;;  %v3376_v63 = vpack.c.bf16 %v2471_v38, %v2470_v37  ;;  %v2472_v42 = vld [vmem:[#allocation13 + $0x50] sm:$0xff]  ;;  %v2473_v43 = vld [vmem:[#allocation13 + $0x58] sm:$0xff]  ;;  %v3397_v44 = vpack.c.bf16 %v2562_v41, %v2561_v40  ;;  %v2563_v45 = vld [vmem:[#allocation15 + $0x40] sm:$0xff] }
 0x9a4   :  { %3368 = vmatpush3.bf16.msra.mxu0 %v3367_v6  ;;  %v2564_v46 = vld [vmem:[#allocation15 + $0x48] sm:$0xff]  ;;  %v3379_v47 = vpack.c.bf16 %v2473_v43, %v2472_v42  ;;  %v2474_v48 = vld [vmem:[#allocation13 + $0x60] sm:$0xff]  ;;  %v2565_v52 = vld [vmem:[#allocation15 + $0x50] sm:$0xff] }
 0x9a5   :  { %3369 = vmatprep.subr.bf16.mxu0 %v3741_v23  ;;  %v2475_v49 = vld [vmem:[#allocation13 + $0x68] sm:$0xff]  ;;  %v3400_v50 = vpack.c.bf16 %v2564_v46, %v2563_v45  ;;  %v2566_v53 = vld [vmem:[#allocation15 + $0x58] sm:$0xff]  ;;  %v2476_v55 = vld [vmem:[#allocation13 + $0x70] sm:$0xff] }
 0x9a6   :  { %3392 = vmatpush3.bf16.msra.mxu1 %v3391_v34  ;;  %v3382_v54 = vpack.c.bf16 %v2475_v49, %v2474_v48  ;;  %v2477_v56 = vld [vmem:[#allocation13 + $0x78] sm:$0xff]  ;;  %v3403_v57 = vpack.c.bf16 %v2566_v53, %v2565_v52  ;;  %v2567_v58 = vld [vmem:[#allocation15 + $0x60] sm:$0xff]  ;;  %v2568_v59 = vld [vmem:[#allocation15 + $0x68] sm:$0xff] }
 0x9a7   :  { %3393 = vmatprep.subr.bf16.mxu1 %v3741_v23  ;;  %v3385_v60 = vpack.c.bf16 %v2477_v56, %v2476_v55  ;;  %v3406_v61 = vpack.c.bf16 %v2568_v59, %v2567_v58  ;;  %v2461_v62 = vld [vmem:[#allocation2] sm:$0xff]  ;;  %v2570_v3 = vld [vmem:[#allocation15 + $0x78] sm:$0xff] }
 0x9a8   :  { %3371 = vmatpush3.bf16.msra.mxu0 %v3370_v30  ;;  %v2569_v1 = vld [vmem:[#allocation15 + $0x70] sm:$0xff] }
 0x9a9   :  { %3372 = vmatprep.subr.bf16.mxu0 %v3741_v23  ;;  %v3409_v4 = vpack.c.bf16 %v2570_v3, %v2569_v1  ;;  %v2736_v7 = vld [vmem:[%s4044_s7] ss:$0 sm:$0xff]  ;;  %s3692_s7 = scalar_lea.vmem %s2662_s3, 128 }
 0x9aa   :  { %3395 = vmatpush3.bf16.msra.mxu1 %v3394_v39  ;;  %v2737_v11 = vld [vmem:[%s4046_s9] ss:$0 sm:$0xff]  ;;  %p3693_p6 = scmp.ne.s32.totalorder %s2662_s3, %s3692_s7  ;;  %p3698_p8 = scmp.lt.s32.totalorder %s3692_s7, %s3692_s7 }
 0x9ab   :  { %3396 = vmatprep.subr.bf16.mxu1 %v3741_v23 }
 0x9ac   :  { %3374 = vmatpush3.bf16.msra.mxu0 %v3373_v36  ;;  %p3699_p9 = por %p3698_p8, %p3697_p7 }
 0x9ad   :  { %3375 = vmatprep.subr.bf16.mxu0 %v3741_v23 }
 0x9ae   :  { %3398 = vmatpush3.bf16.msra.mxu1 %v3397_v44  ;;  %p3700_p10 = pnand %p3699_p9, %p3693_p6 }
 0x9af   :  { %3399 = vmatprep.subr.bf16.mxu1 %v3741_v23 }
 0x9b0   :  { %3377 = vmatpush3.bf16.msra.mxu0 %v3376_v63 }
 0x9b1   :  { %3378 = vmatprep.subr.bf16.mxu0 %v3741_v23 }
 0x9b2   :  { %3401 = vmatpush3.bf16.msra.mxu1 %v3400_v50 }
 0x9b3   :  { %3402 = vmatprep.subr.bf16.mxu1 %v3741_v23 }
 0x9b4   :  { %3380 = vmatpush3.bf16.msra.mxu0 %v3379_v47 }
 0x9b5   :  { %3381 = vmatprep.subr.bf16.mxu0 %v3741_v23 }
 0x9b6   :  { %3404 = vmatpush3.bf16.msra.mxu1 %v3403_v57 }
 0x9b7   :  { %3405 = vmatprep.subr.bf16.mxu1 %v3741_v23 }
 0x9b8   :  { %3383 = vmatpush3.bf16.msra.mxu0 %v3382_v54 }
 0x9b9   :  { %3384 = vmatprep.subr.bf16.mxu0 %v3741_v23 }
 0x9ba   :  { %3407 = vmatpush3.bf16.msra.mxu1 %v3406_v61 }
 0x9bb   :  { %3408 = vmatprep.subr.bf16.mxu1 %v3741_v23 }
 0x9bc   :  { %3386 = vmatpush3.bf16.msra.mxu0 %v3385_v60 }
 0x9be   :  { %3410 = vmatpush3.bf16.msra.mxu1 %v3409_v4 }
 0x9bf   :  { %2806 = vmatmul.mubr.f32.vlgmr.msra.gmra.mrb[0].mxu0 %v2461_v62 }
 0xa92   :  { %v2551_v8 = vpop.f32.mrb[0].mxu0 }
 0xa93   :  { %v2552_v9 = vadd.f32 %v2736_v7, %v2551_v8  ;;  %v2807_v10 = vpop.f32.mrb[1].mxu0 }
 0xa95   :  { %2841 = vmatmul.mubr.f32.vlgmr.msra.gmra.mrb[0].mxu1 %v2552_v9 }
 0xb68   :  { %v2644_v12 = vpop.f32.mrb[0].mxu1 }
 0xb69   :  { %v2645_v13 = vadd.f32 %v2737_v11, %v2644_v12  ;;  %v2842_v14 = vpop.f32.mrb[1].mxu1 }
 0xb6b   :  { %v2738_v15 = vmul.f32 -1.442695, %v2645_v13 }
 0xb6d   :  { %3578 = vpow2.f32 %v2738_v15 }
 0xb77   :  { %v3579_v16 = vpop.eup %3578 }
 0xb78   :  { %v2651_v17 = vadd.f32 1.0, %v3579_v16 }
 0xb7a   :  { %3580 = vrcp.f32 %v2651_v17 }
 0xb84   :  { %v3581_v18 = vpop.eup %3580 }
 0xb85   :  { %2654 = vst [vmem:[#allocation16] sm:$0xff] %v3581_v18 }
 0xb86   :  { %3703 = shalt.err (!%p3700_p10)
}
 0xb87   :  { %s3704_s23 = scalar_lea.hbm %s4047_s10, 128 }
 0xb88   :  { %p3705_p11 = scmp.ne.s32.totalorder %s4047_s10, %s3704_s23  ;;  %p3708_p12 = scmp.lt.u32.totalorder %s3704_s23, %s4047_s10 }
 0xb8a   :  { %p3710_p13 = pnand %p3708_p12, %p3705_p11 }
 0xb8c   :  { %3713 = shalt.err (!%p3710_p13)
}
 0xb8d   :  { %2664 = dma.vmem_to_hbm [thread:$0]  %s2662_s3, 128, %s4047_s10, [#allocation9]  }
 0xb8e   :  { %3720 = dma.done.wait [#allocation9], 128  }
 0xb8f   :  { %3721 = vsyncadd [#allocation9], 4294967168 }
 0xb90   :  { %2668 = vsyncpa [#allocation8], 1 }
 0xb91   :  { %2669 = vsyncpa [#allocation11], 1 }
 0xb92   :  { %2670 = vsyncpa [#allocation14], 1 }
 0xb93   :  { %2671 = vsyncpa [#allocation9], 1 }

</bundles_post_ra>
